<compile_context>
chip_gen: v5e
topology: v5e:2x2
jax: 0.10.0
libtpu: 0.0.40
codegen_flags: <defaults>
</compile_context>

<pallas_src>
import jax
import jax.numpy as jnp
from jax.experimental import pallas as pl
from jax.experimental.pallas import tpu as pltpu

H1 = 1024  # fc1 output width (fixed by the module)
H2 = 1024  # fc2 output width (fixed by the module)


def mlp2h_kernel(x_ref, w1t_ref, b1_ref, w2t_ref, b2_ref, w3_ref, b3_ref, o_ref):
    # x_ref:   (TB, D)  bf16 batch tile of the input
    # w1t_ref: (D, H1)  bf16 fc1 weight, pre-transposed in the wrapper
    # b1_ref:  (1, H1)  f32
    # w2t_ref: (H1, H2) bf16 fc2 weight, pre-transposed in the wrapper
    # b2_ref:  (1, H2)  f32
    # w3_ref:  (1, H2)  f32 fc3 weight (output width 1) -> VPU, not MXU
    # b3_ref:  (1,)     f32 scalar in SMEM
    # o_ref:   (TB, 1)

    # fc1 + ReLU  (bf16 x bf16 on the MXU, f32 accumulation)
    h1 = jnp.dot(x_ref[...], w1t_ref[...], preferred_element_type=jnp.float32)
    h1 = jnp.maximum(h1 + b1_ref[...], 0.0)

    # fc2 + ReLU  (~99% of the FLOPs) -- cast activations to bf16 so the MXU
    # gets native-width inputs; accumulate in f32, bias/ReLU in f32.
    h2 = jnp.dot(h1.astype(jnp.bfloat16), w2t_ref[...],
                 preferred_element_type=jnp.float32)
    h2 = jnp.maximum(h2 + b2_ref[...], 0.0)

    # fc3: output width is 1, so an MXU matmul would run at 1/128-1/256 lane
    # utilization and need an extra transpose relayout.  VPU broadcast-multiply
    # + XLU cross-lane reduction rides otherwise-idle slots under the fc2 MXU
    # work.  Bias is a scalar read from SMEM.
    y = jnp.sum(h2 * w3_ref[...], axis=-1, keepdims=True) + b3_ref[0]

    o_ref[...] = y.astype(o_ref.dtype)


def mlp2h_forward(x, w1, b1, w2, b2, w3, b3, *, block_b=1024):
    B, D = x.shape
    assert w1.shape == (H1, D) and b1.shape == (H1,)
    assert w2.shape == (H2, H1) and b2.shape == (H2,)
    assert w3.shape == (1, H2) and b3.shape == (1,)

    out_dtype = x.dtype

    # Layout/dtype plumbing done once outside the kernel: pre-transpose hidden
    # layer weights so the kernel issues plain row-major MXU matmuls, cast the
    # matmul operands to bf16 (halves HBM weight bytes, MXU-native input),
    # keep biases in f32 as (1, H) rows for lane broadcast, and keep the fc3
    # weight/bias in f32 (it is consumed on the VPU against f32 activations).
    x_bf = x.astype(jnp.bfloat16)
    w1t = jnp.asarray(w1).T.astype(jnp.bfloat16)   # (D, H1)
    w2t = jnp.asarray(w2).T.astype(jnp.bfloat16)   # (H1, H2)
    b1r = jnp.reshape(b1, (1, H1)).astype(jnp.float32)
    b2r = jnp.reshape(b2, (1, H2)).astype(jnp.float32)
    w3r = jnp.asarray(w3).astype(jnp.float32)      # (1, H2)
    b3s = jnp.reshape(b3, (1,)).astype(jnp.float32)  # scalar in SMEM

    # Batch tiling.  Bigger tiles amortize the per-grid-step pipeline overhead
    # and feed the MXU more rows per weight pass; bf16 + single-buffered
    # weights keep the per-step VMEM well under the scoped limits.
    tb = min(block_b, B)
    if tb != B:
        tb = max(8, (tb // 8) * 8)   # keep the (8, 128) sublane constraint happy
    grid_steps = pl.cdiv(B, tb)
    grid = (grid_steps,)

    # Megacore split only pays off when there are several batch tiles per core;
    # at small B it just duplicates the weight DMA into each TensorCore.
    dim_sem = ("parallel",) if grid_steps >= 4 else ("arbitrary",)

    # Grid-invariant operands: constant index_map, fetched once -> no need for
    # a second pipeline buffer.
    resident = dict(pipeline_mode=pl.Buffered(1))

    return pl.pallas_call(
        mlp2h_kernel,
        out_shape=jax.ShapeDtypeStruct((B, 1), out_dtype),
        grid=grid,
        in_specs=[
            pl.BlockSpec((tb, D), lambda i: (i, 0)),                    # x: tiled over batch
            pl.BlockSpec((D, H1), lambda i: (0, 0), **resident),        # w1^T (bf16, resident)
            pl.BlockSpec((1, H1), lambda i: (0, 0), **resident),        # b1
            pl.BlockSpec((H1, H2), lambda i: (0, 0), **resident),       # w2^T (bf16, resident)
            pl.BlockSpec((1, H2), lambda i: (0, 0), **resident),        # b2
            pl.BlockSpec((1, H2), lambda i: (0, 0), **resident),        # w3 (VPU reduce)
            pl.BlockSpec(memory_space=pltpu.MemorySpace.SMEM),          # b3 scalar in SMEM
        ],
        out_specs=pl.BlockSpec((tb, 1), lambda i: (i, 0)),
        compiler_params=pltpu.CompilerParams(
            dimension_semantics=dim_sem,
            vmem_limit_bytes=64 << 20,   # headroom for large tiles on v5e's small default
        ),
    )(x_bf, w1t, b1r, w2t, b2r, w3r, b3s)


if __name__ == "__main__":
    # Small shapes consistent with the module: batch=8, input_size=32
    B, D = 8, 32
    key = jax.random.PRNGKey(0)
    kx, k1w, k1b, k2w, k2b, k3w, k3b = jax.random.split(key, 7)

    x = jax.random.normal(kx, (B, D), dtype=jnp.float32)

    def linear_init(kw, kb, fan_out, fan_in):
        # Mimic nn.Linear default init: U(-1/sqrt(fan_in), 1/sqrt(fan_in))
        bound = 1.0 / jnp.sqrt(jnp.float32(fan_in))
        w = jax.random.uniform(kw, (fan_out, fan_in), jnp.float32, -bound, bound)
        b = jax.random.uniform(kb, (fan_out,), jnp.float32, -bound, bound)
        return w, b

    w1, b1 = linear_init(k1w, k1b, H1, D)
    w2, b2 = linear_init(k2w, k2b, H2, H1)
    w3, b3 = linear_init(k3w, k3b, 1, H2)

    out = mlp2h_forward(x, w1, b1, w2, b2, w3, b3)
    out = jax.block_until_ready(out)

    # Pure-JAX f32 reference (HIGHEST precision).  Kernel runs the matmuls with
    # bf16 inputs / f32 accumulation, so the tolerance is loosened accordingly.
    hp = jax.lax.Precision.HIGHEST
    h1 = jnp.maximum(jnp.dot(x, w1.T, precision=hp) + b1, 0.0)
    h2 = jnp.maximum(jnp.dot(h1, w2.T, precision=hp) + b2, 0.0)
    ref = jnp.dot(h2, w3.T, precision=hp) + b3

    assert out.shape == (B, 1)
    assert jnp.allclose(out, ref, atol=2e-2, rtol=2e-2), "mismatch vs reference"

    print("KERNEL_OK")
</pallas_src>

<mosaic_0001>
module attributes {stable_mosaic.version = 11 : i64} {
  func.func @mlp2h_kernel(%arg0: i32, %arg1: memref<8x32xbf16, #tpu.memory_space<vmem>>, %arg2: memref<32x1024xbf16, #tpu.memory_space<vmem>>, %arg3: memref<1x1024xf32, #tpu.memory_space<vmem>>, %arg4: memref<1024x1024xbf16, #tpu.memory_space<vmem>>, %arg5: memref<1x1024xf32, #tpu.memory_space<vmem>>, %arg6: memref<1x1024xf32, #tpu.memory_space<vmem>>, %arg7: memref<1xf32, #tpu.memory_space<smem>>, %arg8: memref<8x1xf32, #tpu.memory_space<vmem>>) attributes {dimension_semantics = [#tpu.dimension_semantics<arbitrary>], iteration_bounds = array<i64: 1>, scalar_prefetch = 0 : i64, scratch_operands = 0 : i64, tpu.core_type = #tpu.core_type<tc>, window_params = [{transform_indices = @transform_0, window_bounds = array<i64: 8, 32>}, {pipeline_mode = #tpu.pipeline_mode<synchronous>, transform_indices = @transform_1, window_bounds = array<i64: 32, 1024>}, {pipeline_mode = #tpu.pipeline_mode<synchronous>, transform_indices = @transform_2, window_bounds = array<i64: 1, 1024>}, {pipeline_mode = #tpu.pipeline_mode<synchronous>, transform_indices = @transform_3, window_bounds = array<i64: 1024, 1024>}, {pipeline_mode = #tpu.pipeline_mode<synchronous>, transform_indices = @transform_4, window_bounds = array<i64: 1, 1024>}, {pipeline_mode = #tpu.pipeline_mode<synchronous>, transform_indices = @transform_5, window_bounds = array<i64: 1, 1024>}, {transform_indices = @transform_6, window_bounds = array<i64: 1>}, {transform_indices = @transform_7, window_bounds = array<i64: 8, 1>}]} {
    %c0 = arith.constant 0 : index
    %c0_0 = arith.constant 0 : index
    %0 = vector.load %arg1[%c0, %c0_0] : memref<8x32xbf16, #tpu.memory_space<vmem>>, vector<8x32xbf16>
    %c0_1 = arith.constant 0 : index
    %c0_2 = arith.constant 0 : index
    %1 = vector.load %arg2[%c0_1, %c0_2] : memref<32x1024xbf16, #tpu.memory_space<vmem>>, vector<32x1024xbf16>
    %cst = arith.constant dense<0.000000e+00> : vector<8x1024xf32>
    %2 = tpu.matmul %0, %1, %cst {dimension_numbers = #tpu.dot_dimension_numbers<[1], [0], [0], [1], [0, 0, 1, 1], [], []>} : vector<8x32xbf16>, vector<32x1024xbf16>, vector<8x1024xf32> -> vector<8x1024xf32>
    %c0_3 = arith.constant 0 : index
    %c0_4 = arith.constant 0 : index
    %3 = vector.load %arg3[%c0_3, %c0_4] : memref<1x1024xf32, #tpu.memory_space<vmem>>, vector<1x1024xf32>
    %4 = vector.broadcast %3 : vector<1x1024xf32> to vector<8x1024xf32>
    %5 = arith.addf %2, %4 : vector<8x1024xf32>
    %cst_5 = arith.constant 0.000000e+00 : f32
    %6 = vector.broadcast %cst_5 : f32 to vector<8x1024xf32>
    %7 = arith.maximumf %5, %6 : vector<8x1024xf32>
    %8 = arith.truncf %7 : vector<8x1024xf32> to vector<8x1024xbf16>
    %c0_6 = arith.constant 0 : index
    %c0_7 = arith.constant 0 : index
    %9 = vector.load %arg4[%c0_6, %c0_7] : memref<1024x1024xbf16, #tpu.memory_space<vmem>>, vector<1024x1024xbf16>
    %cst_8 = arith.constant dense<0.000000e+00> : vector<8x1024xf32>
    %10 = tpu.matmul %8, %9, %cst_8 {dimension_numbers = #tpu.dot_dimension_numbers<[1], [0], [0], [1], [0, 0, 1, 1], [], []>} : vector<8x1024xbf16>, vector<1024x1024xbf16>, vector<8x1024xf32> -> vector<8x1024xf32>
    %c0_9 = arith.constant 0 : index
    %c0_10 = arith.constant 0 : index
    %11 = vector.load %arg5[%c0_9, %c0_10] : memref<1x1024xf32, #tpu.memory_space<vmem>>, vector<1x1024xf32>
    %12 = vector.broadcast %11 : vector<1x1024xf32> to vector<8x1024xf32>
    %13 = arith.addf %10, %12 : vector<8x1024xf32>
    %cst_11 = arith.constant 0.000000e+00 : f32
    %14 = vector.broadcast %cst_11 : f32 to vector<8x1024xf32>
    %15 = arith.maximumf %13, %14 : vector<8x1024xf32>
    %c0_12 = arith.constant 0 : index
    %c0_13 = arith.constant 0 : index
    %16 = vector.load %arg6[%c0_12, %c0_13] : memref<1x1024xf32, #tpu.memory_space<vmem>>, vector<1x1024xf32>
    %17 = vector.broadcast %16 : vector<1x1024xf32> to vector<8x1024xf32>
    %18 = arith.mulf %15, %17 : vector<8x1024xf32>
    %cst_14 = arith.constant dense<0.000000e+00> : vector<8xf32>
    %19 = vector.multi_reduction <add>, %18, %cst_14 [1] : vector<8x1024xf32> to vector<8xf32>
    %20 = vector.shape_cast %19 : vector<8xf32> to vector<8x1xf32>
    %c0_15 = arith.constant 0 : index
    %21 = memref.load %arg7[%c0_15] : memref<1xf32, #tpu.memory_space<smem>>
    %22 = vector.broadcast %21 : f32 to vector<8x1xf32>
    %23 = arith.addf %20, %22 : vector<8x1xf32>
    %c0_16 = arith.constant 0 : index
    %c0_17 = arith.constant 0 : index
    %24 = vector.load %arg8[%c0_16, %c0_17] : memref<8x1xf32, #tpu.memory_space<vmem>>, vector<8x1xf32>
    tpu.vector_store %arg8[%c0_16, %c0_17], %23 {strides = array<i32>} : memref<8x1xf32, #tpu.memory_space<vmem>>, vector<8x1xf32>,
    return
  }
  func.func @transform_0(%arg0: i32) -> (i32, i32) {
    %c0_i32 = arith.constant 0 : i32
    %c0_i32_0 = arith.constant 0 : i32
    return %arg0, %c0_i32 : i32, i32
  }
  func.func @transform_1(%arg0: i32) -> (i32, i32) {
    %c0_i32 = arith.constant 0 : i32
    %c0_i32_0 = arith.constant 0 : i32
    %c0_i32_1 = arith.constant 0 : i32
    return %c0_i32, %c0_i32_0 : i32, i32
  }
  func.func @transform_2(%arg0: i32) -> (i32, i32) {
    %c0_i32 = arith.constant 0 : i32
    %c0_i32_0 = arith.constant 0 : i32
    %c0_i32_1 = arith.constant 0 : i32
    return %c0_i32, %c0_i32_0 : i32, i32
  }
  func.func @transform_3(%arg0: i32) -> (i32, i32) {
    %c0_i32 = arith.constant 0 : i32
    %c0_i32_0 = arith.constant 0 : i32
    %c0_i32_1 = arith.constant 0 : i32
    return %c0_i32, %c0_i32_0 : i32, i32
  }
  func.func @transform_4(%arg0: i32) -> (i32, i32) {
    %c0_i32 = arith.constant 0 : i32
    %c0_i32_0 = arith.constant 0 : i32
    %c0_i32_1 = arith.constant 0 : i32
    return %c0_i32, %c0_i32_0 : i32, i32
  }
  func.func @transform_5(%arg0: i32) -> (i32, i32) {
    %c0_i32 = arith.constant 0 : i32
    %c0_i32_0 = arith.constant 0 : i32
    %c0_i32_1 = arith.constant 0 : i32
    return %c0_i32, %c0_i32_0 : i32, i32
  }
  func.func @transform_6(%arg0: i32) -> i32 {
    %c0_i32 = arith.constant 0 : i32
    %c0_i32_0 = arith.constant 0 : i32
    return %c0_i32 : i32
  }
  func.func @transform_7(%arg0: i32) -> (i32, i32) {
    %c0_i32 = arith.constant 0 : i32
    %c0_i32_0 = arith.constant 0 : i32
    return %arg0, %c0_i32 : i32, i32
  }
}

</mosaic_0001>

<bundles_post_ra>
// kernel: tpu_custom_call.1
= control target key start
LH: loop header
LB: loop body
LE: loop exit
PB: predicated region body
PF: predicated region fallthrough
CT: control target
= control target key end

     0   :  { %13 = vsyncpa [#allocation4], 0  ;;  %s7375_s0 = inlined_call_operand.hbm [shape: bf16[8,32], index: 0, kind: input, shape index: {}]   ;;  %s7376_s1 = inlined_call_operand.hbm [shape: bf16[32,1024], index: 1, kind: input, shape index: {}]   ;;  %s7377_s2 = inlined_call_operand.hbm [shape: f32[1,1024], index: 2, kind: input, shape index: {}]   ;;  %s7378_s3 = inlined_call_operand.hbm [shape: bf16[1024,1024], index: 3, kind: input, shape index: {}]   ;;  %s7379_s4 = inlined_call_operand.hbm [shape: f32[1,1024], index: 4, kind: input, shape index: {}]   ;;  %s7380_s5 = inlined_call_operand.hbm [shape: f32[1,1024], index: 5, kind: input, shape index: {}]   ;;  %s7381_s6 = inlined_call_operand.<no memory space> [shape: f32[1], index: 6, kind: input, shape index: {}]   ;;  %s7382_s7 = inlined_call_operand.vmem [shape: f32[8,1], index: 7, kind: output, shape index: {}]  }
   0x1   :  { %14 = vsyncpa [#allocation6], 0 }
   0x2   :  { %15 = vsyncpa [#allocation9], 0  ;;  %s32_s26 = sshll.u32 %s7376_s1, 4  ;;  %s33_s26 = int_to_ptr.hbm [resolvable:$true] %s32_s26 }
   0x3   :  { %16 = vsyncpa [#allocation12], 0  ;;  %s7143_s27 = smov [#allocation5]   ;;  %s56_s8 = sshll.u32 %s7378_s3, 4  ;;  %s57_s8 = int_to_ptr.hbm [resolvable:$true] %s56_s8 }
   0x4   :  { %s34_s28 = sshll.u32 %s7143_s27, 4  ;;  %s7144_s9 = smov 512   ;;  %s35_s28 = int_to_ptr.vmem [resolvable:$true] %s34_s28 }
   0x5   :  { %s7145_s10 = smov 32   ;;  %s7146_s11 = smov [#allocation8]  }
   0x6   :  { %40 = dma.hbm_to_vmem [thread:$0]  %s33_s26, 2048, %s35_s28, [#allocation6], %s7144_s9, %s7144_s9, %s7145_s10  }
   0x7   :  { %s58_s12 = sshll.u32 %s7146_s11, 4  ;;  %s22_s15 = sshll.u32 %s7375_s0, 4  ;;  %s59_s12 = int_to_ptr.vmem [resolvable:$true] %s58_s12  ;;  %s23_s15 = int_to_ptr.hbm [resolvable:$true] %s22_s15 }
   0x8   :  { %64 = dma.hbm_to_vmem [thread:$0]  %s57_s8, 65536, %s59_s12, [#allocation9], %s7144_s9, %s7144_s9, %s7145_s10  }
   0x9   :  { %s46_s17 = sshll.u32 %s7377_s2, 4  ;;  %s7147_s18 = smov [#allocation3]   ;;  %s47_s17 = int_to_ptr.hbm [resolvable:$true] %s46_s17 }
   0xa   :  { %s24_s19 = sshll.u32 %s7147_s18, 4  ;;  %s7148_s3 = smov [#allocation7]   ;;  %s25_s19 = int_to_ptr.vmem [resolvable:$true] %s24_s19 }
   0xb   :  { %27 = dma.hbm_to_vmem [thread:$0]  %s23_s15, 64, %s25_s19, [#allocation4]  }
   0xc   :  { %s48_s20 = sshll.u32 %s7148_s3, 4  ;;  %s70_s23 = sshll.u32 %s7379_s4, 4  ;;  %s49_s20 = int_to_ptr.vmem [resolvable:$true] %s48_s20  ;;  %s71_s23 = int_to_ptr.hbm [resolvable:$true] %s70_s23 }
   0xd   :  { %51 = dma.hbm_to_vmem [thread:$0]  %s47_s17, 128, %s49_s20, [#allocation6]  }
   0xe   :  { %s81_s25 = sshll.u32 %s7380_s5, 4  ;;  %s7149_s26 = smov [#allocation10]   ;;  %s82_s25 = int_to_ptr.hbm [resolvable:$true] %s81_s25 }
   0xf   :  { %s72_s2 = sshll.u32 %s7149_s26, 4  ;;  %s7150_s27 = smov [#allocation11]   ;;  %s73_s2 = int_to_ptr.vmem [resolvable:$true] %s72_s2 }
  0x10   :  { %75 = dma.hbm_to_vmem [thread:$0]  %s71_s23, 128, %s73_s2, [#allocation9]  }
  0x11   :  { %s83_s28 = sshll.u32 %s7150_s27, 4  ;;  %s84_s28 = int_to_ptr.vmem [resolvable:$true] %s83_s28 }
  0x12   :  { %86 = dma.hbm_to_vmem [thread:$0]  %s82_s25, 128, %s84_s28, [#allocation12]  }
  0x13   :  { %7135 = dma.done.wait [#allocation4], 64  }
  0x14   :  { %7136 = vsyncadd [#allocation4], 4294967232 }
  0x15   :  { %7137 = dma.done.wait [#allocation6], 2176  }
  0x16   :  { %7138 = vsyncadd [#allocation6], 4294965120 }
  0x17   :  { %7139 = dma.done.wait [#allocation9], 65664  }
  0x18   :  { %7140 = vsyncadd [#allocation9], 4294901632 }
  0x19   :  { %7141 = dma.done.wait [#allocation12], 128  }
  0x1a   :  { %7142 = vsyncadd [#allocation12], 4294967168  ;;  %vm229_vm0 = vcmask 261120   ;;  %v4365_v0 = vld [vmem:[#allocation5 + $0x40] sm:$0xf]  ;;  %vm4321_vm1 = vcmask 7168  }
  0x1b   :  { %v6463_v1 = vld [vmem:[#allocation5 + $0x5c] sm:$0xf0]  ;;  %v6459_v2 = vld [vmem:[#allocation5 + $0x44] sm:$0xf]  ;;  %v4373_v5 = vld [vmem:[#allocation5 + $0x48] sm:$0xf] }
  0x1c   :  { %v4366_v3 = vor.u32 %v6463_v1, %v4365_v0  ;;  %v4367_v4 = vld [vmem:[#allocation5 + $0x60] sm:$0xf0]  ;;  %v6464_v6 = vld [vmem:[#allocation5 + $0x64] sm:$0xf0]  ;;  %v6460_v9 = vld [vmem:[#allocation5 + $0x4c] sm:$0xf] }
  0x1d   :  { %v4370_v7 = vor.u32 %v6459_v2, %v4367_v4  ;;  %v4374_v8 = vor.u32 %v6464_v6, %v4373_v5  ;;  %v4375_v10 = vld [vmem:[#allocation5 + $0x68] sm:$0xf0]  ;;  %v4333_v11 = vld [vmem:[#allocation5] sm:$0xf]  ;;  %v6451_v14 = vld [vmem:[#allocation5 + $0x4] sm:$0xf] }
  0x1e   :  { %239 = vmatpush.bf16.msra.mxu0 %v4366_v3  ;;  %v4378_v12 = vor.u32 %v6460_v9, %v4375_v10  ;;  %v6455_v13 = vld [vmem:[#allocation5 + $0x1c] sm:$0xf0]  ;;  %v4335_v15 = vld [vmem:[#allocation5 + $0x20] sm:$0xf0]  ;;  %v4341_v18 = vld [vmem:[#allocation5 + $0x8] sm:$0xf] }
  0x1f   :  { %252 = vmatpush.bf16.msra.mxu1 %v4370_v7  ;;  %265 = vmatpush.bf16.msra.mxu2 %v4374_v8  ;;  %v4334_v16 = vor.u32 %v6455_v13, %v4333_v11  ;;  %v4338_v17 = vor.u32 %v6451_v14, %v4335_v15  ;;  %v6456_v19 = vld [vmem:[#allocation5 + $0x24] sm:$0xf0]  ;;  %v6452_v20 = vld [vmem:[#allocation5 + $0xc] sm:$0xf]  ;;  %v7209_v23 = vld [vmem:[#allocation3] sm:$0xf] }
  0x20   :  { %278 = vmatpush.bf16.msra.mxu3 %v4378_v12  ;;  %v4342_v21 = vor.u32 %v6456_v19, %v4341_v18  ;;  %v4343_v22 = vld [vmem:[#allocation5 + $0x28] sm:$0xf0]  ;;  %v4381_v24 = vld [vmem:[#allocation5 + $0x50] sm:$0xf]  ;;  %v6461_v27 = vld [vmem:[#allocation5 + $0x54] sm:$0xf] }
  0x21   :  { %v4346_v25 = vor.u32 %v6452_v20, %v4343_v22  ;;  %v6465_v26 = vld [vmem:[#allocation5 + $0x6c] sm:$0xf0]  ;;  %v4383_v28 = vld [vmem:[#allocation5 + $0x70] sm:$0xf0]  ;;  %v4389_v31 = vld [vmem:[#allocation5 + $0x58] sm:$0xf] }
  0x22   :  { %240 = vmatpush.bf16.msra.mxu0 %v4334_v16  ;;  %v4382_v29 = vor.u32 %v6465_v26, %v4381_v24  ;;  %v4386_v30 = vor.u32 %v6461_v27, %v4383_v28  ;;  %v6466_v32 = vld [vmem:[#allocation5 + $0x74] sm:$0xf0]  ;;  %v6462_v33 = vld [vmem:[#allocation5 + $0x5c] sm:$0xf]  ;;  %v4349_v36 = vld [vmem:[#allocation5 + $0x10] sm:$0xf] }
  0x23   :  { %253 = vmatpush.bf16.msra.mxu1 %v4338_v17  ;;  %266 = vmatpush.bf16.msra.mxu2 %v4342_v21  ;;  %v4390_v34 = vor.u32 %v6466_v32, %v4389_v31  ;;  %v4391_v35 = vld [vmem:[#allocation5 + $0x78] sm:$0xf0]  ;;  %v6457_v37 = vld [vmem:[#allocation5 + $0x2c] sm:$0xf0]  ;;  %v6453_v40 = vld [vmem:[#allocation5 + $0x14] sm:$0xf] }
  0x24   :  { %279 = vmatpush.bf16.msra.mxu3 %v4346_v25  ;;  %v4394_v38 = vor.u32 %v6462_v33, %v4391_v35  ;;  %v4350_v39 = vor.u32 %v6457_v37, %v4349_v36  ;;  %v4351_v41 = vld [vmem:[#allocation5 + $0x30] sm:$0xf0]  ;;  %v4357_v42 = vld [vmem:[#allocation5 + $0x18] sm:$0xf]  ;;  %v6454_v45 = vld [vmem:[#allocation5 + $0x1c] sm:$0xf] }
  0x25   :  { %4395 = vmatmul.msk.bf16.vlgmr.msra.gmra.mxu0 %vm229_vm0, %v7209_v23  ;;  %v4354_v43 = vor.u32 %v6453_v40, %v4351_v41  ;;  %v6458_v44 = vld [vmem:[#allocation5 + $0x34] sm:$0xf0]  ;;  %v4359_v46 = vld [vmem:[#allocation5 + $0x38] sm:$0xf0]  ;;  %v4629_v47 = vld [vmem:[#allocation8 + $0x1c0] sm:$0xf] }
  0x26   :  { %291 = vmatpush.bf16.msrb.mxu0 %v4382_v29  ;;  %4396 = vmatmul.msk.bf16.vlgmr.msra.gmra.mxu1 %vm229_vm0, %v7209_v23  ;;  %v6527_v48 = vld [vmem:[#allocation8 + $0x1dc] sm:$0xf0]  ;;  %v4358_v50 = vor.u32 %v6458_v44, %v4357_v42  ;;  %v4362_v55 = vor.u32 %v6454_v45, %v4359_v46 }
  0x27   :  { %304 = vmatpush.bf16.msrb.mxu1 %v4386_v30  ;;  %4397 = vmatmul.msk.bf16.vlgmr.msra.gmra.mxu2 %vm229_vm0, %v7209_v23  ;;  %v4885_v49 = vld [vmem:[#allocation8 + $0x3c0] sm:$0xf]  ;;  %v4630_v51 = vor.u32 %v6527_v48, %v4629_v47 }
  0x28   :  { %4398 = vmatmul.msk.bf16.vlgmr.msra.gmra.mxu3 %vm229_vm0, %v7209_v23  ;;  %317 = vmatpush.bf16.msrb.mxu2 %v4390_v34  ;;  %v6591_v52 = vld [vmem:[#allocation8 + $0x3dc] sm:$0xf0] }
  0x29   :  { %v4597_v53 = vld [vmem:[#allocation8 + $0x180] sm:$0xf]  ;;  %330 = vmatpush.bf16.msrb.mxu3 %v4394_v38  ;;  %v4886_v56 = vor.u32 %v6591_v52, %v4885_v49 }
  0x2a   :  { %v6519_v54 = vld [vmem:[#allocation8 + $0x19c] sm:$0xf0]  ;;  %292 = vmatpush.bf16.msrb.mxu0 %v4350_v39 }
  0x2b   :  { %v4853_v57 = vld [vmem:[#allocation8 + $0x380] sm:$0xf]  ;;  %305 = vmatpush.bf16.msrb.mxu1 %v4354_v43  ;;  %v4598_v60 = vor.u32 %v6519_v54, %v4597_v53 }
  0x2c   :  { %v6583_v58 = vld [vmem:[#allocation8 + $0x39c] sm:$0xf0]  ;;  %318 = vmatpush.bf16.msrb.mxu2 %v4358_v50 }
  0x2d   :  { %v5141_v59 = vld [vmem:[#allocation8 + $0x5c0] sm:$0xf]  ;;  %v4854_v0 = vor.u32 %v6583_v58, %v4853_v57  ;;  %331 = vmatpush.bf16.msrb.mxu3 %v4362_v55 }
  0x2e   :  { %3443 = vmatpush.bf16.msra.mxu0 %v4630_v51  ;;  %v6655_v61 = vld [vmem:[#allocation8 + $0x5dc] sm:$0xf0] }
  0x2f   :  { %v5397_v62 = vld [vmem:[#allocation8 + $0x7c0] sm:$0xf]  ;;  %3456 = vmatpush.bf16.msra.mxu1 %v4886_v56  ;;  %v5142_v1 = vor.u32 %v6655_v61, %v5141_v59 }
  0x30   :  { %v6719_v63 = vld [vmem:[#allocation8 + $0x7dc] sm:$0xf0] }
  0x31   :  { %v5398_v2 = vor.u32 %v6719_v63, %v5397_v62  ;;  %v4565_v3 = vld [vmem:[#allocation8 + $0x140] sm:$0xf]  ;;  %3469 = vmatpush.bf16.msra.mxu2 %v5142_v1 }
  0x32   :  { %v6511_v4 = vld [vmem:[#allocation8 + $0x15c] sm:$0xf0]  ;;  %3444 = vmatpush.bf16.msra.mxu0 %v4598_v60 }
  0x33   :  { %v4821_v5 = vld [vmem:[#allocation8 + $0x340] sm:$0xf]  ;;  %3482 = vmatpush.bf16.msra.mxu3 %v5398_v2  ;;  %v4566_v12 = vor.u32 %v6511_v4, %v4565_v3  ;;  %3457 = vmatpush.bf16.msra.mxu1 %v4854_v0 }
  0x34   :  { %v6575_v6 = vld [vmem:[#allocation8 + $0x35c] sm:$0xf0] }
  0x35   :  { %v5109_v7 = vld [vmem:[#allocation8 + $0x580] sm:$0xf]  ;;  %v4822_v14 = vor.u32 %v6575_v6, %v4821_v5  ;;  %4399 = vmatmul.msk.bf16.vlgmr.msrb.gmra.mxu0 %vm229_vm0, %v7209_v23 }
  0x36   :  { %v6647_v8 = vld [vmem:[#allocation8 + $0x59c] sm:$0xf0]  ;;  %3445 = vmatpush.bf16.msra.mxu0 %v4566_v12  ;;  %4400 = vmatmul.msk.bf16.vlgmr.msrb.gmra.mxu1 %vm229_vm0, %v7209_v23 }
  0x37   :  { %v5110_v9 = vor.u32 %v6647_v8, %v5109_v7  ;;  %v5365_v10 = vld [vmem:[#allocation8 + $0x780] sm:$0xf]  ;;  %3458 = vmatpush.bf16.msra.mxu1 %v4822_v14  ;;  %4401 = vmatmul.msk.bf16.vlgmr.msrb.gmra.mxu2 %vm229_vm0, %v7209_v23 }
  0x38   :  { %v6711_v11 = vld [vmem:[#allocation8 + $0x79c] sm:$0xf0]  ;;  %4402 = vmatmul.msk.bf16.vlgmr.msrb.gmra.mxu3 %vm229_vm0, %v7209_v23 }
  0x39   :  { %v5366_v13 = vor.u32 %v6711_v11, %v5365_v10  ;;  %v5077_v15 = vld [vmem:[#allocation8 + $0x540] sm:$0xf]  ;;  %3470 = vmatpush.bf16.msra.mxu2 %v5110_v9 }
  0x3a   :  { %v6639_v16 = vld [vmem:[#allocation8 + $0x55c] sm:$0xf0] }
  0x3b   :  { %v5333_v17 = vld [vmem:[#allocation8 + $0x740] sm:$0xf]  ;;  %v5078_v22 = vor.u32 %v6639_v16, %v5077_v15  ;;  %3483 = vmatpush.bf16.msra.mxu3 %v5366_v13 }
  0x3c   :  { %v6703_v18 = vld [vmem:[#allocation8 + $0x75c] sm:$0xf0] }
  0x3d   :  { %v4533_v19 = vld [vmem:[#allocation8 + $0x100] sm:$0xf]  ;;  %v5334_v25 = vor.u32 %v6703_v18, %v5333_v17  ;;  %3471 = vmatpush.bf16.msra.mxu2 %v5078_v22 }
  0x3e   :  { %v6503_v20 = vld [vmem:[#allocation8 + $0x11c] sm:$0xf0] }
  0x3f   :  { %v4789_v21 = vld [vmem:[#allocation8 + $0x300] sm:$0xf]  ;;  %v4534_v30 = vor.u32 %v6503_v20, %v4533_v19  ;;  %3484 = vmatpush.bf16.msra.mxu3 %v5334_v25 }
  0x40   :  { %v6567_v24 = vld [vmem:[#allocation8 + $0x31c] sm:$0xf0] }
  0x41   :  { %v5045_v26 = vld [vmem:[#allocation8 + $0x500] sm:$0xf]  ;;  %v4790_v31 = vor.u32 %v6567_v24, %v4789_v21  ;;  %3446 = vmatpush.bf16.msra.mxu0 %v4534_v30 }
  0x42   :  { %v6631_v27 = vld [vmem:[#allocation8 + $0x51c] sm:$0xf0] }
  0x43   :  { %v5301_v28 = vld [vmem:[#allocation8 + $0x700] sm:$0xf]  ;;  %v5046_v35 = vor.u32 %v6631_v27, %v5045_v26  ;;  %3459 = vmatpush.bf16.msra.mxu1 %v4790_v31 }
  0x44   :  { %v6695_v29 = vld [vmem:[#allocation8 + $0x71c] sm:$0xf0] }
  0x45   :  { %v4501_v32 = vld [vmem:[#allocation8 + $0xc0] sm:$0xf]  ;;  %v5302_v37 = vor.u32 %v6695_v29, %v5301_v28  ;;  %3472 = vmatpush.bf16.msra.mxu2 %v5046_v35 }
  0x46   :  { %v6495_v33 = vld [vmem:[#allocation8 + $0xdc] sm:$0xf0] }
  0x47   :  { %v4757_v34 = vld [vmem:[#allocation8 + $0x2c0] sm:$0xf]  ;;  %v4502_v42 = vor.u32 %v6495_v33, %v4501_v32  ;;  %3485 = vmatpush.bf16.msra.mxu3 %v5302_v37 }
  0x48   :  { %v6559_v36 = vld [vmem:[#allocation8 + $0x2dc] sm:$0xf0] }
  0x49   :  { %v5013_v38 = vld [vmem:[#allocation8 + $0x4c0] sm:$0xf]  ;;  %v4758_v43 = vor.u32 %v6559_v36, %v4757_v34  ;;  %3447 = vmatpush.bf16.msra.mxu0 %v4502_v42 }
  0x4a   :  { %v6623_v39 = vld [vmem:[#allocation8 + $0x4dc] sm:$0xf0] }
  0x4b   :  { %v5269_v40 = vld [vmem:[#allocation8 + $0x6c0] sm:$0xf]  ;;  %v5014_v47 = vor.u32 %v6623_v39, %v5013_v38  ;;  %3460 = vmatpush.bf16.msra.mxu1 %v4758_v43 }
  0x4c   :  { %v6687_v41 = vld [vmem:[#allocation8 + $0x6dc] sm:$0xf0] }
  0x4d   :  { %v4469_v44 = vld [vmem:[#allocation8 + $0x80] sm:$0xf]  ;;  %v5270_v49 = vor.u32 %v6687_v41, %v5269_v40  ;;  %3473 = vmatpush.bf16.msra.mxu2 %v5014_v47 }
  0x4e   :  { %v6487_v45 = vld [vmem:[#allocation8 + $0x9c] sm:$0xf0] }
  0x4f   :  { %v4725_v46 = vld [vmem:[#allocation8 + $0x280] sm:$0xf]  ;;  %v4470_v54 = vor.u32 %v6487_v45, %v4469_v44  ;;  %3486 = vmatpush.bf16.msra.mxu3 %v5270_v49 }
  0x50   :  { %v6551_v48 = vld [vmem:[#allocation8 + $0x29c] sm:$0xf0] }
  0x51   :  { %v4981_v50 = vld [vmem:[#allocation8 + $0x480] sm:$0xf]  ;;  %v4726_v23 = vor.u32 %v6551_v48, %v4725_v46  ;;  %3448 = vmatpush.bf16.msra.mxu0 %v4470_v54 }
  0x52   :  { %v6615_v51 = vld [vmem:[#allocation8 + $0x49c] sm:$0xf0] }
  0x53   :  { %v5237_v52 = vld [vmem:[#allocation8 + $0x680] sm:$0xf]  ;;  %v4982_v58 = vor.u32 %v6615_v51, %v4981_v50  ;;  %3461 = vmatpush.bf16.msra.mxu1 %v4726_v23 }
  0x54   :  { %v6679_v53 = vld [vmem:[#allocation8 + $0x69c] sm:$0xf0] }
  0x55   :  { %v4437_v55 = vld [vmem:[#allocation8 + $0x40] sm:$0xf]  ;;  %v5238_v60 = vor.u32 %v6679_v53, %v5237_v52  ;;  %3474 = vmatpush.bf16.msra.mxu2 %v4982_v58 }
  0x56   :  { %v6479_v56 = vld [vmem:[#allocation8 + $0x5c] sm:$0xf0] }
  0x57   :  { %v4693_v57 = vld [vmem:[#allocation8 + $0x240] sm:$0xf]  ;;  %v4438_v1 = vor.u32 %v6479_v56, %v4437_v55  ;;  %3487 = vmatpush.bf16.msra.mxu3 %v5238_v60 }
  0x58   :  { %v6543_v59 = vld [vmem:[#allocation8 + $0x25c] sm:$0xf0] }
  0x59   :  { %v4949_v61 = vld [vmem:[#allocation8 + $0x440] sm:$0xf]  ;;  %v4694_v4 = vor.u32 %v6543_v59, %v4693_v57  ;;  %3449 = vmatpush.bf16.msra.mxu0 %v4438_v1 }
  0x5a   :  { %v6607_v62 = vld [vmem:[#allocation8 + $0x45c] sm:$0xf0] }
  0x5b   :  { %v5205_v63 = vld [vmem:[#allocation8 + $0x640] sm:$0xf]  ;;  %v4950_v8 = vor.u32 %v6607_v62, %v4949_v61  ;;  %3462 = vmatpush.bf16.msra.mxu1 %v4694_v4 }
  0x5c   :  { %v6671_v0 = vld [vmem:[#allocation8 + $0x65c] sm:$0xf0] }
  0x5d   :  { %v4405_v2 = vld [vmem:[#allocation8] sm:$0xf]  ;;  %v5206_v12 = vor.u32 %v6671_v0, %v5205_v63  ;;  %3475 = vmatpush.bf16.msra.mxu2 %v4950_v8 }
  0x5e   :  { %v6471_v3 = vld [vmem:[#allocation8 + $0x1c] sm:$0xf0] }
  0x5f   :  { %v4661_v5 = vld [vmem:[#allocation8 + $0x200] sm:$0xf]  ;;  %v4406_v16 = vor.u32 %v6471_v3, %v4405_v2  ;;  %3488 = vmatpush.bf16.msra.mxu3 %v5206_v12 }
  0x60   :  { %v6535_v6 = vld [vmem:[#allocation8 + $0x21c] sm:$0xf0] }
  0x61   :  { %v5653_v7 = vld [vmem:[#allocation8 + $0x9c0] sm:$0xf]  ;;  %v4662_v20 = vor.u32 %v6535_v6, %v4661_v5  ;;  %3450 = vmatpush.bf16.msra.mxu0 %v4406_v16 }
  0x62   :  { %v6783_v9 = vld [vmem:[#allocation8 + $0x9dc] sm:$0xf0] }
  0x63   :  { %v5909_v10 = vld [vmem:[#allocation8 + $0xbc0] sm:$0xf]  ;;  %v5654_v21 = vor.u32 %v6783_v9, %v5653_v7  ;;  %3463 = vmatpush.bf16.msra.mxu1 %v4662_v20 }
  0x64   :  { %v6847_v11 = vld [vmem:[#allocation8 + $0xbdc] sm:$0xf0] }
  0x65   :  { %v4917_v13 = vld [vmem:[#allocation8 + $0x400] sm:$0xf]  ;;  %v5910_v25 = vor.u32 %v6847_v11, %v5909_v10  ;;  %3495 = vmatpush.bf16.msrb.mxu0 %v5654_v21 }
  0x66   :  { %v6599_v14 = vld [vmem:[#allocation8 + $0x41c] sm:$0xf0] }
  0x67   :  { %v5173_v15 = vld [vmem:[#allocation8 + $0x600] sm:$0xf]  ;;  %v4918_v28 = vor.u32 %v6599_v14, %v4917_v13  ;;  %3508 = vmatpush.bf16.msrb.mxu1 %v5910_v25 }
  0x68   :  { %v6663_v17 = vld [vmem:[#allocation8 + $0x61c] sm:$0xf0] }
  0x69   :  { %v6165_v18 = vld [vmem:[#allocation8 + $0xdc0] sm:$0xf]  ;;  %v5174_v31 = vor.u32 %v6663_v17, %v5173_v15  ;;  %3476 = vmatpush.bf16.msra.mxu2 %v4918_v28 }
  0x6a   :  { %v6911_v19 = vld [vmem:[#allocation8 + $0xddc] sm:$0xf0] }
  0x6b   :  { %v6421_v22 = vld [vmem:[#allocation8 + $0xfc0] sm:$0xf]  ;;  %v6166_v32 = vor.u32 %v6911_v19, %v6165_v18  ;;  %3489 = vmatpush.bf16.msra.mxu3 %v5174_v31 }
  0x6c   :  { %v6975_v24 = vld [vmem:[#allocation8 + $0xfdc] sm:$0xf0] }
  0x6d   :  { %v5621_v26 = vld [vmem:[#allocation8 + $0x980] sm:$0xf]  ;;  %v6422_v33 = vor.u32 %v6975_v24, %v6421_v22  ;;  %3521 = vmatpush.bf16.msrb.mxu2 %v6166_v32 }
  0x6e   :  { %v6775_v27 = vld [vmem:[#allocation8 + $0x99c] sm:$0xf0] }
  0x6f   :  { %v5877_v29 = vld [vmem:[#allocation8 + $0xb80] sm:$0xf]  ;;  %v5622_v36 = vor.u32 %v6775_v27, %v5621_v26  ;;  %3534 = vmatpush.bf16.msrb.mxu3 %v6422_v33 }
  0x70   :  { %v6839_v30 = vld [vmem:[#allocation8 + $0xb9c] sm:$0xf0] }
  0x71   :  { %v6133_v34 = vld [vmem:[#allocation8 + $0xd80] sm:$0xf]  ;;  %v5878_v39 = vor.u32 %v6839_v30, %v5877_v29  ;;  %3496 = vmatpush.bf16.msrb.mxu0 %v5622_v36 }
  0x72   :  { %v6903_v35 = vld [vmem:[#allocation8 + $0xd9c] sm:$0xf0] }
  0x73   :  { %v6389_v37 = vld [vmem:[#allocation8 + $0xf80] sm:$0xf]  ;;  %v6134_v44 = vor.u32 %v6903_v35, %v6133_v34  ;;  %3509 = vmatpush.bf16.msrb.mxu1 %v5878_v39 }
  0x74   :  { %v6967_v38 = vld [vmem:[#allocation8 + $0xf9c] sm:$0xf0] }
  0x75   :  { %v5589_v40 = vld [vmem:[#allocation8 + $0x940] sm:$0xf]  ;;  %v6390_v45 = vor.u32 %v6967_v38, %v6389_v37  ;;  %3522 = vmatpush.bf16.msrb.mxu2 %v6134_v44 }
  0x76   :  { %v6767_v41 = vld [vmem:[#allocation8 + $0x95c] sm:$0xf0] }
  0x77   :  { %v5845_v42 = vld [vmem:[#allocation8 + $0xb40] sm:$0xf]  ;;  %v5590_v48 = vor.u32 %v6767_v41, %v5589_v40  ;;  %3535 = vmatpush.bf16.msrb.mxu3 %v6390_v45 }
  0x78   :  { %v6831_v43 = vld [vmem:[#allocation8 + $0xb5c] sm:$0xf0] }
  0x79   :  { %v6101_v46 = vld [vmem:[#allocation8 + $0xd40] sm:$0xf]  ;;  %v5846_v51 = vor.u32 %v6831_v43, %v5845_v42  ;;  %3497 = vmatpush.bf16.msrb.mxu0 %v5590_v48 }
  0x7a   :  { %v6895_v47 = vld [vmem:[#allocation8 + $0xd5c] sm:$0xf0] }
  0x7b   :  { %v6357_v49 = vld [vmem:[#allocation8 + $0xf40] sm:$0xf]  ;;  %v6102_v55 = vor.u32 %v6895_v47, %v6101_v46  ;;  %3510 = vmatpush.bf16.msrb.mxu1 %v5846_v51 }
  0x7c   :  { %v6959_v50 = vld [vmem:[#allocation8 + $0xf5c] sm:$0xf0] }
  0x7d   :  { %v5557_v52 = vld [vmem:[#allocation8 + $0x900] sm:$0xf]  ;;  %v6358_v56 = vor.u32 %v6959_v50, %v6357_v49  ;;  %3523 = vmatpush.bf16.msrb.mxu2 %v6102_v55  ;;  %v7227_v50 = vld [vmem:[#allocation7] sm:$0xff]  ;;  %v6523_v55 = vld [vmem:[#allocation8 + $0x1c4] sm:$0xf] }
  0x7e   :  { %v6759_v53 = vld [vmem:[#allocation8 + $0x91c] sm:$0xf0]  ;;  %v133_v51 = vperm.slane %v7227_v50, 0 }
  0x7f   :  { %v5813_v54 = vld [vmem:[#allocation8 + $0xb00] sm:$0xf]  ;;  %v5558_v59 = vor.u32 %v6759_v53, %v5557_v52  ;;  %3536 = vmatpush.bf16.msrb.mxu3 %v6358_v56  ;;  %v134_v52 = vperm.slane %v7227_v50, 1  ;;  %v4631_v56 = vld [vmem:[#allocation8 + $0x1e0] sm:$0xf0] }
  0x80   :  { %v6823_v23 = vld [vmem:[#allocation8 + $0xb1c] sm:$0xf0] }
  0x81   :  { %v6069_v57 = vld [vmem:[#allocation8 + $0xd00] sm:$0xf]  ;;  %v5814_v62 = vor.u32 %v6823_v23, %v5813_v54  ;;  %3498 = vmatpush.bf16.msrb.mxu0 %v5558_v59  ;;  %v4887_v59 = vld [vmem:[#allocation8 + $0x3e0] sm:$0xf0] }
  0x82   :  { %v6887_v58 = vld [vmem:[#allocation8 + $0xd1c] sm:$0xf0] }
  0x83   :  { %v6325_v60 = vld [vmem:[#allocation8 + $0xf00] sm:$0xf]  ;;  %v6070_v3 = vor.u32 %v6887_v58, %v6069_v57  ;;  %3511 = vmatpush.bf16.msrb.mxu1 %v5814_v62  ;;  %v6587_v58 = vld [vmem:[#allocation8 + $0x3c4] sm:$0xf]  ;;  %v135_v62 = vperm.slane %v7227_v50, 2 }
  0x84   :  { %v6951_v61 = vld [vmem:[#allocation8 + $0xf1c] sm:$0xf0] }
  0x85   :  { %v5525_v63 = vld [vmem:[#allocation8 + $0x8c0] sm:$0xf]  ;;  %v6326_v4 = vor.u32 %v6951_v61, %v6325_v60  ;;  %3524 = vmatpush.bf16.msrb.mxu2 %v6070_v3  ;;  %v6515_v3 = vld [vmem:[#allocation8 + $0x184] sm:$0xf] }
  0x86   :  { %v6751_v0 = vld [vmem:[#allocation8 + $0x8dc] sm:$0xf0] }
  0x87   :  { %v5781_v1 = vld [vmem:[#allocation8 + $0xac0] sm:$0xf]  ;;  %v5526_v5 = vor.u32 %v6751_v0, %v5525_v63  ;;  %3537 = vmatpush.bf16.msrb.mxu3 %v6326_v4  ;;  %v4634_v63 = vor.u32 %v6523_v55, %v4631_v56  ;;  %v4599_v4 = vld [vmem:[#allocation8 + $0x1a0] sm:$0xf0] }
  0x88   :  { %v6815_v2 = vld [vmem:[#allocation8 + $0xadc] sm:$0xf0]  ;;  %v5335_v55 = vld [vmem:[#allocation8 + $0x760] sm:$0xf0] }
  0x89   :  { %v5782_v6 = vor.u32 %v6815_v2, %v5781_v1  ;;  %v5493_v7 = vld [vmem:[#allocation8 + $0x880] sm:$0xf]  ;;  %3499 = vmatpush.bf16.msrb.mxu0 %v5526_v5  ;;  %v136_v1 = vperm.slane %v7227_v50, 3  ;;  %v4890_v2 = vor.u32 %v6587_v58, %v4887_v59  ;;  %v6491_v56 = vld [vmem:[#allocation8 + $0xc4] sm:$0xf] }
  0x8a   :  { %v6743_v8 = vld [vmem:[#allocation8 + $0x89c] sm:$0xf0]  ;;  %v4503_v58 = vld [vmem:[#allocation8 + $0xe0] sm:$0xf0] }
  0x8b   :  { %v5749_v9 = vld [vmem:[#allocation8 + $0xa80] sm:$0xf]  ;;  %v5494_v11 = vor.u32 %v6743_v8, %v5493_v7  ;;  %3512 = vmatpush.bf16.msrb.mxu1 %v5782_v6  ;;  %v6579_v6 = vld [vmem:[#allocation8 + $0x384] sm:$0xf] }
  0x8c   :  { %v6807_v10 = vld [vmem:[#allocation8 + $0xa9c] sm:$0xf0]  ;;  %v4855_v7 = vld [vmem:[#allocation8 + $0x3a0] sm:$0xf0] }
  0x8d   :  { %v5750_v12 = vor.u32 %v6807_v10, %v5749_v9  ;;  %3500 = vmatpush.bf16.msrb.mxu0 %v5494_v11  ;;  %v6037_v13 = vld [vmem:[#allocation8 + $0xcc0] sm:$0xf]  ;;  %v6555_v59 = vld [vmem:[#allocation8 + $0x2c4] sm:$0xf] }
  0x8e   :  { %v6879_v14 = vld [vmem:[#allocation8 + $0xcdc] sm:$0xf0] }
  0x8f   :  { %3513 = vmatpush.bf16.msrb.mxu1 %v5750_v12  ;;  %v6293_v15 = vld [vmem:[#allocation8 + $0xec0] sm:$0xf]  ;;  %v6038_v16 = vor.u32 %v6879_v14, %v6037_v13  ;;  %v4602_v12 = vor.u32 %v6515_v3, %v4599_v4  ;;  %v6651_v13 = vld [vmem:[#allocation8 + $0x5c4] sm:$0xf]  ;;  %v140_v3 = vperm.slane %v7227_v50, 7 }
  0x90   :  { %v6943_v17 = vld [vmem:[#allocation8 + $0xedc] sm:$0xf0]  ;;  %v5143_v14 = vld [vmem:[#allocation8 + $0x5e0] sm:$0xf0] }
  0x91   :  { %v6294_v18 = vor.u32 %v6943_v17, %v6293_v15  ;;  %v5461_v19 = vld [vmem:[#allocation8 + $0x840] sm:$0xf]  ;;  %3525 = vmatpush.bf16.msrb.mxu2 %v6038_v16  ;;  %v6715_v15 = vld [vmem:[#allocation8 + $0x7c4] sm:$0xf] }
  0x92   :  { %v6735_v20 = vld [vmem:[#allocation8 + $0x85c] sm:$0xf0]  ;;  %v6627_v4 = vld [vmem:[#allocation8 + $0x504] sm:$0xf] }
  0x93   :  { %v5462_v21 = vor.u32 %v6735_v20, %v5461_v19  ;;  %v5717_v22 = vld [vmem:[#allocation8 + $0xa40] sm:$0xf]  ;;  %3538 = vmatpush.bf16.msrb.mxu3 %v6294_v18  ;;  %v4858_v18 = vor.u32 %v6579_v6, %v4855_v7  ;;  %v5399_v19 = vld [vmem:[#allocation8 + $0x7e0] sm:$0xf0] }
  0x94   :  { %v6799_v24 = vld [vmem:[#allocation8 + $0xa5c] sm:$0xf0]  ;;  %v6507_v20 = vld [vmem:[#allocation8 + $0x144] sm:$0xf] }
  0x95   :  { %v5718_v25 = vor.u32 %v6799_v24, %v5717_v22  ;;  %v6005_v26 = vld [vmem:[#allocation8 + $0xc80] sm:$0xf]  ;;  %3501 = vmatpush.bf16.msrb.mxu0 %v5462_v21  ;;  %v4567_v21 = vld [vmem:[#allocation8 + $0x160] sm:$0xf0] }
  0x96   :  { %v6871_v27 = vld [vmem:[#allocation8 + $0xc9c] sm:$0xf0]  ;;  %v6571_v24 = vld [vmem:[#allocation8 + $0x344] sm:$0xf] }
  0x97   :  { %v6261_v28 = vld [vmem:[#allocation8 + $0xe80] sm:$0xf]  ;;  %v6006_v29 = vor.u32 %v6871_v27, %v6005_v26  ;;  %3514 = vmatpush.bf16.msrb.mxu1 %v5718_v25  ;;  %v4823_v25 = vld [vmem:[#allocation8 + $0x360] sm:$0xf0]  ;;  %v5146_v27 = vor.u32 %v6651_v13, %v5143_v14 }
  0x98   :  { %v6935_v30 = vld [vmem:[#allocation8 + $0xe9c] sm:$0xf0]  ;;  %v5047_v6 = vld [vmem:[#allocation8 + $0x520] sm:$0xf0] }
  0x99   :  { %v6262_v31 = vor.u32 %v6935_v30, %v6261_v28  ;;  %v5429_v32 = vld [vmem:[#allocation8 + $0x800] sm:$0xf]  ;;  %3526 = vmatpush.bf16.msrb.mxu2 %v6006_v29  ;;  %v137_v28 = vperm.slane %v7227_v50, 4  ;;  %v5402_v30 = vor.u32 %v6715_v15, %v5399_v19  ;;  %v4471_v14 = vld [vmem:[#allocation8 + $0xa0] sm:$0xf0] }
  0x9a   :  { %v6727_v33 = vld [vmem:[#allocation8 + $0x81c] sm:$0xf0]  ;;  %v6547_v15 = vld [vmem:[#allocation8 + $0x284] sm:$0xf] }
  0x9b   :  { %v5685_v34 = vld [vmem:[#allocation8 + $0xa00] sm:$0xf]  ;;  %v5430_v35 = vor.u32 %v6727_v33, %v5429_v32  ;;  %3539 = vmatpush.bf16.msrb.mxu3 %v6262_v31  ;;  %v4570_v31 = vor.u32 %v6507_v20, %v4567_v21  ;;  %v6643_v32 = vld [vmem:[#allocation8 + $0x584] sm:$0xf] }
  0x9c   :  { %v6791_v36 = vld [vmem:[#allocation8 + $0xa1c] sm:$0xf0]  ;;  %v5111_v33 = vld [vmem:[#allocation8 + $0x5a0] sm:$0xf0] }
  0x9d   :  { %v5686_v37 = vor.u32 %v6791_v36, %v5685_v34  ;;  %3502 = vmatpush.bf16.msrb.mxu0 %v5430_v35  ;;  %v5973_v38 = vld [vmem:[#allocation8 + $0xc40] sm:$0xf]  ;;  %v6707_v34 = vld [vmem:[#allocation8 + $0x784] sm:$0xf]  ;;  %v4826_v36 = vor.u32 %v6571_v24, %v4823_v25 }
  0x9e   :  { %v6863_v39 = vld [vmem:[#allocation8 + $0xc5c] sm:$0xf0]  ;;  %v6619_v21 = vld [vmem:[#allocation8 + $0x4c4] sm:$0xf] }
  0x9f   :  { %3515 = vmatpush.bf16.msrb.mxu1 %v5686_v37  ;;  %v5974_v40 = vor.u32 %v6863_v39, %v5973_v38  ;;  %v6229_v41 = vld [vmem:[#allocation8 + $0xe40] sm:$0xf]  ;;  %v5367_v37 = vld [vmem:[#allocation8 + $0x7a0] sm:$0xf0] }
  0xa0   :  { %v6927_v42 = vld [vmem:[#allocation8 + $0xe5c] sm:$0xf0]  ;;  %v6499_v38 = vld [vmem:[#allocation8 + $0x104] sm:$0xf] }
  0xa1   :  { %v6230_v43 = vor.u32 %v6927_v42, %v6229_v41  ;;  %3527 = vmatpush.bf16.msrb.mxu2 %v5974_v40  ;;  %v5941_v44 = vld [vmem:[#allocation8 + $0xc00] sm:$0xf]  ;;  %v4535_v39 = vld [vmem:[#allocation8 + $0x120] sm:$0xf0]  ;;  %v138_v40 = vperm.slane %v7227_v50, 5 }
  0xa2   :  { %v6855_v45 = vld [vmem:[#allocation8 + $0xc1c] sm:$0xf0]  ;;  %v242_v53 = vpop.f32.mrf.mxu0  ;;  %v6563_v41 = vld [vmem:[#allocation8 + $0x304] sm:$0xf] }
  0xa3   :  { %3540 = vmatpush.bf16.msrb.mxu3 %v6230_v43  ;;  %v5942_v46 = vor.u32 %v6855_v45, %v5941_v44  ;;  %v6197_v47 = vld [vmem:[#allocation8 + $0xe00] sm:$0xf]  ;;  %v243_v54 = vadd.f32 %v242_v53, %v133_v51  ;;  %v255_v23 = vpop.f32.mrf.mxu1  ;;  %v4791_v42 = vld [vmem:[#allocation8 + $0x320] sm:$0xf0]  ;;  %v5114_v44 = vor.u32 %v6643_v32, %v5111_v33 }
  0xa4   :  { %v6919_v48 = vld [vmem:[#allocation8 + $0xe1c] sm:$0xf0]  ;;  %v256_v57 = vadd.f32 %v255_v23, %v134_v52  ;;  %v5079_v51 = vld [vmem:[#allocation8 + $0x560] sm:$0xf0] }
  0xa5   :  { %v6198_v49 = vor.u32 %v6919_v48, %v6197_v47  ;;  %3528 = vmatpush.bf16.msrb.mxu2 %v5942_v46  ;;  %v337_v60 = vmax.f32 %v243_v54, 0.0  ;;  %v5370_v47 = vor.u32 %v6707_v34, %v5367_v37  ;;  %v4538_v48 = vor.u32 %v6499_v38, %v4535_v39  ;;  %v6699_v23 = vld [vmem:[#allocation8 + $0x744] sm:$0xf] }
  0xa6   :  { %v338_v61 = vmax.f32 %v256_v57, 0.0  ;;  %v4794_v54 = vor.u32 %v6563_v41, %v4791_v42  ;;  %v6683_v24 = vld [vmem:[#allocation8 + $0x6c4] sm:$0xf] }
  0xa7   :  { %3541 = vmatpush.bf16.msrb.mxu3 %v6198_v49  ;;  %v7232_v0 = vpack.c.bf16 %v337_v60, %v337_v60  ;;  %v6635_v49 = vld [vmem:[#allocation8 + $0x544] sm:$0xf] }
  0xa8   :  { %v7235_v5 = vpack.c.bf16 %v338_v61, %v338_v61  ;;  %v4759_v60 = vld [vmem:[#allocation8 + $0x2e0] sm:$0xf0] }
  0xa9   :  { %3451 = vmatmul.bf16.vlgmr.msra.gmra.mxu0 %v7232_v0  ;;  %v4439_v32 = vld [vmem:[#allocation8 + $0x60] sm:$0xf0] }
  0xaa   :  { %v268_v8 = vpop.f32.mrf.mxu2  ;;  %3464 = vmatmul.bf16.vlgmr.msra.gmra.mxu1 %v7235_v5  ;;  %3547 = vmatpush.bf16.msra.mxu0 %v4634_v63  ;;  %v244_v11 = vpop.f32.mrf.mxu0  ;;  %v139_v63 = vperm.slane %v7227_v50, 6  ;;  %v5050_v50 = vor.u32 %v6627_v4, %v5047_v6  ;;  %v4695_v37 = vld [vmem:[#allocation8 + $0x260] sm:$0xf0] }
  0xab   :  { %v269_v9 = vadd.f32 %v268_v8, %v135_v62  ;;  %v281_v10 = vpop.f32.mrf.mxu3  ;;  %3560 = vmatpush.bf16.msra.mxu1 %v4890_v2  ;;  %v257_v17 = vpop.f32.mrf.mxu1  ;;  %v5082_v62 = vor.u32 %v6635_v49, %v5079_v51  ;;  %v5338_v2 = vor.u32 %v6699_v23, %v5335_v55  ;;  %v4506_v8 = vor.u32 %v6491_v56, %v4503_v58  ;;  %v5303_v11 = vld [vmem:[#allocation8 + $0x720] sm:$0xf0] }
  0xac   :  { %v282_v16 = vadd.f32 %v281_v10, %v136_v1  ;;  %v6691_v10 = vld [vmem:[#allocation8 + $0x704] sm:$0xf] }
  0xad   :  { %v339_v22 = vmax.f32 %v269_v9, 0.0  ;;  %v4762_v9 = vor.u32 %v6555_v59, %v4759_v60  ;;  %v5306_v20 = vor.u32 %v6691_v10, %v5303_v11  ;;  %v6611_v42 = vld [vmem:[#allocation8 + $0x484] sm:$0xf] }
  0xae   :  { %v340_v26 = vmax.f32 %v282_v16, 0.0  ;;  %3548 = vmatpush.bf16.msra.mxu0 %v4602_v12  ;;  %v6483_v12 = vld [vmem:[#allocation8 + $0x84] sm:$0xf] }
  0xaf   :  { %v7240_v29 = vpack.c.bf16 %v339_v22, %v339_v22  ;;  %3561 = vmatpush.bf16.msra.mxu1 %v4858_v18  ;;  %v4727_v16 = vld [vmem:[#allocation8 + $0x2a0] sm:$0xf0] }
  0xb0   :  { %v7242_v35 = vpack.c.bf16 %v340_v26, %v340_v26  ;;  %v5015_v22 = vld [vmem:[#allocation8 + $0x4e0] sm:$0xf0] }
  0xb1   :  { %3477 = vmatmul.bf16.vlgmr.msra.gmra.mxu2 %v7240_v29  ;;  %v5018_v39 = vor.u32 %v6619_v21, %v5015_v22  ;;  %v6467_v49 = vld [vmem:[#allocation8 + $0x4] sm:$0xf] }
  0xb2   :  { %3490 = vmatmul.bf16.vlgmr.msra.gmra.mxu3 %v7242_v35  ;;  %3573 = vmatpush.bf16.msra.mxu2 %v5146_v27  ;;  %v270_v43 = vpop.f32.mrf.mxu2  ;;  %v294_v46 = vpop.f32.mrf.mxu0  ;;  %v4474_v27 = vor.u32 %v6483_v12, %v4471_v14  ;;  %v4407_v51 = vld [vmem:[#allocation8 + $0x20] sm:$0xf0] }
  0xb3   :  { %3586 = vmatpush.bf16.msra.mxu3 %v5402_v30  ;;  %v283_v45 = vpop.f32.mrf.mxu3  ;;  %3549 = vmatpush.bf16.msra.mxu0 %v4570_v31  ;;  %v295_v52 = vadd.f32 %v294_v46, %v137_v28  ;;  %v307_v53 = vpop.f32.mrf.mxu1  ;;  %v4730_v28 = vor.u32 %v6547_v15, %v4727_v16  ;;  %v5271_v30 = vld [vmem:[#allocation8 + $0x6e0] sm:$0xf0] }
  0xb4   :  { %3562 = vmatpush.bf16.msra.mxu1 %v4826_v36  ;;  %v308_v57 = vadd.f32 %v307_v53, %v138_v40  ;;  %v6475_v31 = vld [vmem:[#allocation8 + $0x44] sm:$0xf]  ;;  %v5274_v41 = vor.u32 %v6683_v24, %v5271_v30 }
  0xb5   :  { %v341_v61 = vmax.f32 %v295_v52, 0.0  ;;  %v6539_v36 = vld [vmem:[#allocation8 + $0x244] sm:$0xf]  ;;  %v4442_v46 = vor.u32 %v6475_v31, %v4439_v32 }
  0xb6   :  { %3574 = vmatpush.bf16.msra.mxu2 %v5114_v44  ;;  %v342_v1 = vmax.f32 %v308_v57, 0.0  ;;  %v4983_v43 = vld [vmem:[#allocation8 + $0x4a0] sm:$0xf0] }
  0xb7   :  { %3587 = vmatpush.bf16.msra.mxu3 %v5370_v47  ;;  %3550 = vmatpush.bf16.msra.mxu0 %v4538_v48  ;;  %v7249_v7 = vpack.c.bf16 %v341_v61, %v341_v61  ;;  %v6675_v44 = vld [vmem:[#allocation8 + $0x684] sm:$0xf]  ;;  %v4698_v47 = vor.u32 %v6539_v36, %v4695_v37  ;;  %v4986_v23 = vor.u32 %v6611_v42, %v4983_v43 }
  0xb8   :  { %3563 = vmatpush.bf16.msra.mxu1 %v4794_v54  ;;  %v7251_v13 = vpack.c.bf16 %v342_v1, %v342_v1  ;;  %v5239_v48 = vld [vmem:[#allocation8 + $0x6a0] sm:$0xf0] }
  0xb9   :  { %3503 = vmatmul.bf16.vlgmr.msrb.gmra.mxu0 %v7249_v7  ;;  %v6531_v52 = vld [vmem:[#allocation8 + $0x204] sm:$0xf]  ;;  %v5242_v59 = vor.u32 %v6675_v44, %v5239_v48 }
  0xba   :  { %3575 = vmatpush.bf16.msra.mxu2 %v5082_v62  ;;  %v320_v17 = vpop.f32.mrf.mxu2  ;;  %3516 = vmatmul.bf16.vlgmr.msrb.gmra.mxu1 %v7251_v13  ;;  %v296_v25 = vpop.f32.mrf.mxu0  ;;  %v4663_v53 = vld [vmem:[#allocation8 + $0x220] sm:$0xf0] }
  0xbb   :  { %3588 = vmatpush.bf16.msra.mxu3 %v5338_v2  ;;  %v321_v18 = vadd.f32 %v320_v17, %v139_v63  ;;  %v333_v19 = vpop.f32.mrf.mxu3  ;;  %3551 = vmatpush.bf16.msra.mxu0 %v4506_v8  ;;  %v309_v33 = vpop.f32.mrf.mxu1  ;;  %v6779_v54 = vld [vmem:[#allocation8 + $0x9c4] sm:$0xf]  ;;  %v4410_v63 = vor.u32 %v6467_v49, %v4407_v51  ;;  %v4666_v1 = vor.u32 %v6531_v52, %v4663_v53 }
  0xbc   :  { %v334_v26 = vadd.f32 %v333_v19, %v140_v3  ;;  %3564 = vmatpush.bf16.msra.mxu1 %v4762_v9  ;;  %v5655_v56 = vld [vmem:[#allocation8 + $0x9e0] sm:$0xf0] }
  0xbd   :  { %v343_v34 = vmax.f32 %v321_v18, 0.0  ;;  %v6843_v57 = vld [vmem:[#allocation8 + $0xbc4] sm:$0xf]  ;;  %v5658_v4 = vor.u32 %v6779_v54, %v5655_v56 }
  0xbe   :  { %v344_v38 = vmax.f32 %v334_v26, 0.0  ;;  %3576 = vmatpush.bf16.msra.mxu2 %v5050_v50  ;;  %v5911_v58 = vld [vmem:[#allocation8 + $0xbe0] sm:$0xf0] }
  0xbf   :  { %v7255_v40 = vpack.c.bf16 %v343_v34, %v343_v34  ;;  %3589 = vmatpush.bf16.msra.mxu3 %v5306_v20  ;;  %3552 = vmatpush.bf16.msra.mxu0 %v4474_v27  ;;  %v6603_v61 = vld [vmem:[#allocation8 + $0x444] sm:$0xf]  ;;  %v5914_v6 = vor.u32 %v6843_v57, %v5911_v58 }
  0xc0   :  { %v7257_v45 = vpack.c.bf16 %v344_v38, %v344_v38  ;;  %3565 = vmatpush.bf16.msra.mxu1 %v4730_v28  ;;  %v4951_v62 = vld [vmem:[#allocation8 + $0x460] sm:$0xf0] }
  0xc1   :  { %3529 = vmatmul.bf16.vlgmr.msrb.gmra.mxu2 %v7255_v40  ;;  %v6667_v2 = vld [vmem:[#allocation8 + $0x644] sm:$0xf]  ;;  %v4954_v9 = vor.u32 %v6603_v61, %v4951_v62 }
  0xc2   :  { %3542 = vmatmul.bf16.vlgmr.msrb.gmra.mxu3 %v7257_v45  ;;  %3577 = vmatpush.bf16.msra.mxu2 %v5018_v39  ;;  %v322_v55 = vpop.f32.mrf.mxu2  ;;  %v5207_v3 = vld [vmem:[#allocation8 + $0x660] sm:$0xf0] }
  0xc3   :  { %3590 = vmatpush.bf16.msra.mxu3 %v5274_v41  ;;  %v335_v60 = vpop.f32.mrf.mxu3  ;;  %3553 = vmatpush.bf16.msra.mxu0 %v4442_v46  ;;  %v6771_v8 = vld [vmem:[#allocation8 + $0x984] sm:$0xf]  ;;  %v5210_v14 = vor.u32 %v6667_v2, %v5207_v3 }
  0xc4   :  { %3566 = vmatpush.bf16.msra.mxu1 %v4698_v47  ;;  %v5623_v10 = vld [vmem:[#allocation8 + $0x9a0] sm:$0xf0] }
  0xc5   :  { %v6835_v11 = vld [vmem:[#allocation8 + $0xb84] sm:$0xf]  ;;  %v5626_v20 = vor.u32 %v6771_v8, %v5623_v10 }
  0xc6   :  { %3578 = vmatpush.bf16.msra.mxu2 %v4986_v23  ;;  %v5879_v12 = vld [vmem:[#allocation8 + $0xba0] sm:$0xf0] }
  0xc7   :  { %3591 = vmatpush.bf16.msra.mxu3 %v5242_v59  ;;  %v6595_v15 = vld [vmem:[#allocation8 + $0x404] sm:$0xf]  ;;  %3554 = vmatpush.bf16.msra.mxu0 %v4410_v63  ;;  %v5882_v21 = vor.u32 %v6835_v11, %v5879_v12 }
  0xc8   :  { %v4919_v16 = vld [vmem:[#allocation8 + $0x420] sm:$0xf0]  ;;  %3567 = vmatpush.bf16.msra.mxu1 %v4666_v1 }
  0xc9   :  { %v6659_v17 = vld [vmem:[#allocation8 + $0x604] sm:$0xf]  ;;  %v4922_v26 = vor.u32 %v6595_v15, %v4919_v16 }
  0xca   :  { %v5175_v50 = vld [vmem:[#allocation8 + $0x620] sm:$0xf0]  ;;  %3579 = vmatpush.bf16.msra.mxu2 %v4954_v9  ;;  %3555 = vmatmul.bf16.vlgmr.msra.gmra.mxu0 %v7232_v0 }
  0xcb   :  { %v6907_v18 = vld [vmem:[#allocation8 + $0xdc4] sm:$0xf]  ;;  %3599 = vmatpush.bf16.msrb.mxu0 %v5658_v4  ;;  %3592 = vmatpush.bf16.msra.mxu3 %v5210_v14  ;;  %v5178_v31 = vor.u32 %v6659_v17, %v5175_v50 }
  0xcc   :  { %v6167_v19 = vld [vmem:[#allocation8 + $0xde0] sm:$0xf0]  ;;  %3612 = vmatpush.bf16.msrb.mxu1 %v5914_v6 }
  0xcd   :  { %v6971_v22 = vld [vmem:[#allocation8 + $0xfc4] sm:$0xf]  ;;  %v6170_v32 = vor.u32 %v6907_v18, %v6167_v19  ;;  %3568 = vmatmul.bf16.vlgmr.msra.gmra.mxu1 %v7235_v5 }
  0xce   :  { %v6423_v24 = vld [vmem:[#allocation8 + $0xfe0] sm:$0xf0]  ;;  %3580 = vmatpush.bf16.msra.mxu2 %v4922_v26 }
  0xcf   :  { %v6763_v25 = vld [vmem:[#allocation8 + $0x944] sm:$0xf]  ;;  %v6426_v33 = vor.u32 %v6971_v22, %v6423_v24  ;;  %3600 = vmatpush.bf16.msrb.mxu0 %v5626_v20  ;;  %3593 = vmatpush.bf16.msra.mxu3 %v5178_v31 }
  0xd0   :  { %v5591_v27 = vld [vmem:[#allocation8 + $0x960] sm:$0xf0]  ;;  %3613 = vmatpush.bf16.msrb.mxu1 %v5882_v21 }
  0xd1   :  { %v6827_v28 = vld [vmem:[#allocation8 + $0xb44] sm:$0xf]  ;;  %v5594_v37 = vor.u32 %v6763_v25, %v5591_v27  ;;  %3581 = vmatmul.bf16.vlgmr.msra.gmra.mxu2 %v7240_v29 }
  0xd2   :  { %v5847_v30 = vld [vmem:[#allocation8 + $0xb60] sm:$0xf0]  ;;  %3625 = vmatpush.bf16.msrb.mxu2 %v6170_v32  ;;  %3594 = vmatmul.bf16.vlgmr.msra.gmra.mxu3 %v7242_v35 }
  0xd3   :  { %v6899_v34 = vld [vmem:[#allocation8 + $0xd84] sm:$0xf]  ;;  %v5850_v38 = vor.u32 %v6827_v28, %v5847_v30  ;;  %3638 = vmatpush.bf16.msrb.mxu3 %v6426_v33  ;;  %3601 = vmatpush.bf16.msrb.mxu0 %v5594_v37  ;;  %v4637_v37 = vld [vmem:[#allocation8 + $0x1c8] sm:$0xf] }
  0xd4   :  { %v6135_v36 = vld [vmem:[#allocation8 + $0xda0] sm:$0xf0] }
  0xd5   :  { %v6963_v39 = vld [vmem:[#allocation8 + $0xf84] sm:$0xf]  ;;  %v6138_v47 = vor.u32 %v6899_v34, %v6135_v36  ;;  %3614 = vmatpush.bf16.msrb.mxu1 %v5850_v38 }
  0xd6   :  { %v6391_v41 = vld [vmem:[#allocation8 + $0xfa0] sm:$0xf0] }
  0xd7   :  { %v6755_v42 = vld [vmem:[#allocation8 + $0x904] sm:$0xf]  ;;  %v6394_v48 = vor.u32 %v6963_v39, %v6391_v41  ;;  %3626 = vmatpush.bf16.msrb.mxu2 %v6138_v47  ;;  %v6528_v39 = vld [vmem:[#allocation8 + $0x1e4] sm:$0xf0] }
  0xd8   :  { %v5559_v43 = vld [vmem:[#allocation8 + $0x920] sm:$0xf0]  ;;  %v4893_v41 = vld [vmem:[#allocation8 + $0x3c8] sm:$0xf] }
  0xd9   :  { %v6819_v44 = vld [vmem:[#allocation8 + $0xb04] sm:$0xf]  ;;  %v5562_v52 = vor.u32 %v6755_v42, %v5559_v43  ;;  %3639 = vmatpush.bf16.msrb.mxu3 %v6394_v48  ;;  %v6592_v42 = vld [vmem:[#allocation8 + $0x3e4] sm:$0xf0] }
  0xda   :  { %v5815_v46 = vld [vmem:[#allocation8 + $0xb20] sm:$0xf0] }
  0xdb   :  { %v6891_v49 = vld [vmem:[#allocation8 + $0xd44] sm:$0xf]  ;;  %v5818_v53 = vor.u32 %v6819_v44, %v5815_v46  ;;  %3602 = vmatpush.bf16.msrb.mxu0 %v5562_v52  ;;  %v4638_v52 = vor.u32 %v6528_v39, %v4637_v37  ;;  %v4509_v37 = vld [vmem:[#allocation8 + $0xc8] sm:$0xf] }
  0xdc   :  { %v6103_v51 = vld [vmem:[#allocation8 + $0xd60] sm:$0xf0] }
  0xdd   :  { %v6955_v54 = vld [vmem:[#allocation8 + $0xf44] sm:$0xf]  ;;  %v6106_v59 = vor.u32 %v6891_v49, %v6103_v51  ;;  %3615 = vmatpush.bf16.msrb.mxu1 %v5818_v53  ;;  %v4894_v53 = vor.u32 %v6592_v42, %v4893_v41  ;;  %v4765_v41 = vld [vmem:[#allocation8 + $0x2c8] sm:$0xf] }
  0xde   :  { %v6359_v23 = vld [vmem:[#allocation8 + $0xf60] sm:$0xf0]  ;;  %v6560_v42 = vld [vmem:[#allocation8 + $0x2e4] sm:$0xf0] }
  0xdf   :  { %v6747_v55 = vld [vmem:[#allocation8 + $0x8c4] sm:$0xf]  ;;  %v6362_v60 = vor.u32 %v6955_v54, %v6359_v23  ;;  %3627 = vmatpush.bf16.msrb.mxu2 %v6106_v59  ;;  %v4605_v54 = vld [vmem:[#allocation8 + $0x188] sm:$0xf] }
  0xe0   :  { %v5527_v56 = vld [vmem:[#allocation8 + $0x8e0] sm:$0xf0] }
  0xe1   :  { %v6811_v57 = vld [vmem:[#allocation8 + $0xac4] sm:$0xf]  ;;  %v5530_v63 = vor.u32 %v6747_v55, %v5527_v56  ;;  %3640 = vmatpush.bf16.msrb.mxu3 %v6362_v60  ;;  %v6520_v55 = vld [vmem:[#allocation8 + $0x1a4] sm:$0xf0] }
  0xe2   :  { %v5783_v58 = vld [vmem:[#allocation8 + $0xae0] sm:$0xf0]  ;;  %v4861_v56 = vld [vmem:[#allocation8 + $0x388] sm:$0xf] }
  0xe3   :  { %v6883_v61 = vld [vmem:[#allocation8 + $0xd04] sm:$0xf]  ;;  %v5786_v1 = vor.u32 %v6811_v57, %v5783_v58  ;;  %3603 = vmatpush.bf16.msrb.mxu0 %v5530_v63  ;;  %v6584_v57 = vld [vmem:[#allocation8 + $0x3a4] sm:$0xf0] }
  0xe4   :  { %v6071_v62 = vld [vmem:[#allocation8 + $0xd20] sm:$0xf0]  ;;  %v5149_v63 = vld [vmem:[#allocation8 + $0x5c8] sm:$0xf] }
  0xe5   :  { %v6947_v2 = vld [vmem:[#allocation8 + $0xf04] sm:$0xf]  ;;  %v6074_v10 = vor.u32 %v6883_v61, %v6071_v62  ;;  %3616 = vmatpush.bf16.msrb.mxu1 %v5786_v1  ;;  %v6656_v1 = vld [vmem:[#allocation8 + $0x5e4] sm:$0xf0] }
  0xe6   :  { %v6327_v3 = vld [vmem:[#allocation8 + $0xf20] sm:$0xf0] }
  0xe7   :  { %v6739_v4 = vld [vmem:[#allocation8 + $0x884] sm:$0xf]  ;;  %v6330_v11 = vor.u32 %v6947_v2, %v6327_v3  ;;  %3628 = vmatpush.bf16.msrb.mxu2 %v6074_v10  ;;  %v4606_v2 = vor.u32 %v6520_v55, %v4605_v54  ;;  %v4862_v3 = vor.u32 %v6584_v57, %v4861_v56  ;;  %v6512_v10 = vld [vmem:[#allocation8 + $0x164] sm:$0xf0] }
  0xe8   :  { %v5495_v6 = vld [vmem:[#allocation8 + $0x8a0] sm:$0xf0]  ;;  %v6552_v55 = vld [vmem:[#allocation8 + $0x2a4] sm:$0xf0] }
  0xe9   :  { %v6803_v8 = vld [vmem:[#allocation8 + $0xa84] sm:$0xf]  ;;  %v5498_v15 = vor.u32 %v6739_v4, %v5495_v6  ;;  %3641 = vmatpush.bf16.msrb.mxu3 %v6330_v11  ;;  %v5405_v4 = vld [vmem:[#allocation8 + $0x7c8] sm:$0xf] }
  0xea   :  { %v5751_v9 = vld [vmem:[#allocation8 + $0xaa0] sm:$0xf0]  ;;  %v6720_v6 = vld [vmem:[#allocation8 + $0x7e4] sm:$0xf0] }
  0xeb   :  { %v6875_v12 = vld [vmem:[#allocation8 + $0xcc4] sm:$0xf]  ;;  %v5754_v16 = vor.u32 %v6803_v8, %v5751_v9  ;;  %3604 = vmatpush.bf16.msrb.mxu0 %v5498_v15  ;;  %v4573_v9 = vld [vmem:[#allocation8 + $0x148] sm:$0xf] }
  0xec   :  { %v6039_v14 = vld [vmem:[#allocation8 + $0xce0] sm:$0xf0]  ;;  %v6576_v15 = vld [vmem:[#allocation8 + $0x364] sm:$0xf0] }
  0xed   :  { %v6939_v17 = vld [vmem:[#allocation8 + $0xec4] sm:$0xf]  ;;  %v6042_v22 = vor.u32 %v6875_v12, %v6039_v14  ;;  %3617 = vmatpush.bf16.msrb.mxu1 %v5754_v16  ;;  %v5150_v12 = vor.u32 %v6656_v1, %v5149_v63  ;;  %v4829_v14 = vld [vmem:[#allocation8 + $0x348] sm:$0xf]  ;;  %v5406_v16 = vor.u32 %v6720_v6, %v5405_v4 }
  0xee   :  { %v6295_v50 = vld [vmem:[#allocation8 + $0xee0] sm:$0xf0]  ;;  %v5021_v57 = vld [vmem:[#allocation8 + $0x4c8] sm:$0xf] }
  0xef   :  { %v6731_v18 = vld [vmem:[#allocation8 + $0x844] sm:$0xf]  ;;  %v6298_v24 = vor.u32 %v6939_v17, %v6295_v50  ;;  %3629 = vmatpush.bf16.msrb.mxu2 %v6042_v22  ;;  %v5117_v17 = vld [vmem:[#allocation8 + $0x588] sm:$0xf] }
  0xf0   :  { %v5463_v19 = vld [vmem:[#allocation8 + $0x860] sm:$0xf0]  ;;  %v6648_v50 = vld [vmem:[#allocation8 + $0x5a4] sm:$0xf0] }
  0xf1   :  { %v6795_v20 = vld [vmem:[#allocation8 + $0xa44] sm:$0xf]  ;;  %v5466_v28 = vor.u32 %v6731_v18, %v5463_v19  ;;  %3642 = vmatpush.bf16.msrb.mxu3 %v6298_v24  ;;  %v4574_v18 = vor.u32 %v6512_v10, %v4573_v9  ;;  %v5373_v19 = vld [vmem:[#allocation8 + $0x788] sm:$0xf] }
  0xf2   :  { %v5719_v21 = vld [vmem:[#allocation8 + $0xa60] sm:$0xf0]  ;;  %v4541_v22 = vld [vmem:[#allocation8 + $0x108] sm:$0xf] }
  0xf3   :  { %v6867_v25 = vld [vmem:[#allocation8 + $0xc84] sm:$0xf]  ;;  %v5722_v30 = vor.u32 %v6795_v20, %v5719_v21  ;;  %3605 = vmatpush.bf16.msrb.mxu0 %v5466_v28  ;;  %v6712_v20 = vld [vmem:[#allocation8 + $0x7a4] sm:$0xf0]  ;;  %v4830_v21 = vor.u32 %v6576_v15, %v4829_v14 }
  0xf4   :  { %v6007_v26 = vld [vmem:[#allocation8 + $0xca0] sm:$0xf0]  ;;  %v6504_v24 = vld [vmem:[#allocation8 + $0x124] sm:$0xf0]  ;;  %v5374_v28 = vor.u32 %v6712_v20, %v5373_v19 }
  0xf5   :  { %v6931_v27 = vld [vmem:[#allocation8 + $0xe84] sm:$0xf]  ;;  %v6010_v38 = vor.u32 %v6867_v25, %v6007_v26  ;;  %3618 = vmatpush.bf16.msrb.mxu1 %v5722_v30  ;;  %v5118_v25 = vor.u32 %v6648_v50, %v5117_v17  ;;  %v4797_v26 = vld [vmem:[#allocation8 + $0x308] sm:$0xf] }
  0xf6   :  { %v6263_v31 = vld [vmem:[#allocation8 + $0xea0] sm:$0xf0]  ;;  %v5085_v30 = vld [vmem:[#allocation8 + $0x548] sm:$0xf] }
  0xf7   :  { %v6723_v32 = vld [vmem:[#allocation8 + $0x804] sm:$0xf]  ;;  %v6266_v43 = vor.u32 %v6931_v27, %v6263_v31  ;;  %3630 = vmatpush.bf16.msrb.mxu2 %v6010_v38  ;;  %v6568_v27 = vld [vmem:[#allocation8 + $0x324] sm:$0xf0] }
  0xf8   :  { %v5431_v33 = vld [vmem:[#allocation8 + $0x820] sm:$0xf0]  ;;  %v6640_v31 = vld [vmem:[#allocation8 + $0x564] sm:$0xf0] }
  0xf9   :  { %v6787_v34 = vld [vmem:[#allocation8 + $0xa04] sm:$0xf]  ;;  %v5434_v47 = vor.u32 %v6723_v32, %v5431_v33  ;;  %3643 = vmatpush.bf16.msrb.mxu3 %v6266_v43  ;;  %v4542_v32 = vor.u32 %v6504_v24, %v4541_v22  ;;  %v5341_v33 = vld [vmem:[#allocation8 + $0x748] sm:$0xf]  ;;  %v5086_v39 = vor.u32 %v6640_v31, %v5085_v30 }
  0xfa   :  { %v5687_v36 = vld [vmem:[#allocation8 + $0xa20] sm:$0xf0]  ;;  %v6496_v38 = vld [vmem:[#allocation8 + $0xe4] sm:$0xf0] }
  0xfb   :  { %v6859_v44 = vld [vmem:[#allocation8 + $0xc44] sm:$0xf]  ;;  %v5690_v48 = vor.u32 %v6787_v34, %v5687_v36  ;;  %3606 = vmatpush.bf16.msrb.mxu0 %v5434_v47  ;;  %v6704_v34 = vld [vmem:[#allocation8 + $0x764] sm:$0xf0]  ;;  %v4798_v36 = vor.u32 %v6568_v27, %v4797_v26  ;;  %v4510_v47 = vor.u32 %v6496_v38, %v4509_v37 }
  0xfc   :  { %v5975_v46 = vld [vmem:[#allocation8 + $0xc60] sm:$0xf0]  ;;  %v5342_v43 = vor.u32 %v6704_v34, %v5341_v33  ;;  %v4445_v63 = vld [vmem:[#allocation8 + $0x48] sm:$0xf] }
  0xfd   :  { %v6923_v49 = vld [vmem:[#allocation8 + $0xe44] sm:$0xf]  ;;  %v5978_v23 = vor.u32 %v6859_v44, %v5975_v46  ;;  %3619 = vmatpush.bf16.msrb.mxu1 %v5690_v48  ;;  %v5053_v44 = vld [vmem:[#allocation8 + $0x508] sm:$0xf] }
  0xfe   :  { %v6231_v51 = vld [vmem:[#allocation8 + $0xe60] sm:$0xf0]  ;;  %3607 = vmatmul.bf16.vlgmr.msrb.gmra.mxu0 %v7249_v7  ;;  %v6632_v46 = vld [vmem:[#allocation8 + $0x524] sm:$0xf0] }
  0xff   :  { %v6234_v58 = vor.u32 %v6923_v49, %v6231_v51  ;;  %v6851_v59 = vld [vmem:[#allocation8 + $0xc04] sm:$0xf]  ;;  %3651 = vmatpush.bf16.msra.mxu0 %v4638_v52  ;;  %3631 = vmatpush.bf16.msrb.mxu2 %v5978_v23  ;;  %v5309_v48 = vld [vmem:[#allocation8 + $0x708] sm:$0xf]  ;;  %v4766_v51 = vor.u32 %v6560_v42, %v4765_v41  ;;  %v5054_v54 = vor.u32 %v6632_v46, %v5053_v44 }
 0x100   :  { %v5943_v60 = vld [vmem:[#allocation8 + $0xc20] sm:$0xf0]  ;;  %3620 = vmatmul.bf16.vlgmr.msrb.gmra.mxu1 %v7251_v13  ;;  %v6696_v49 = vld [vmem:[#allocation8 + $0x724] sm:$0xf0] }
 0x101   :  { %v6915_v61 = vld [vmem:[#allocation8 + $0xe04] sm:$0xf]  ;;  %3664 = vmatpush.bf16.msra.mxu1 %v4894_v53  ;;  %v5946_v8 = vor.u32 %v6851_v59, %v5943_v60  ;;  %3644 = vmatpush.bf16.msrb.mxu3 %v6234_v58  ;;  %v4477_v52 = vld [vmem:[#allocation8 + $0x88] sm:$0xf]  ;;  %v5310_v56 = vor.u32 %v6696_v49, %v5309_v48 }
 0x102   :  { %v6199_v62 = vld [vmem:[#allocation8 + $0xe20] sm:$0xf0]  ;;  %v6488_v53 = vld [vmem:[#allocation8 + $0xa4] sm:$0xf0] }
 0x103   :  { %v6202_v11 = vor.u32 %v6915_v61, %v6199_v62  ;;  %3652 = vmatpush.bf16.msra.mxu0 %v4606_v2  ;;  %3632 = vmatpush.bf16.msrb.mxu2 %v5946_v8  ;;  %v4733_v23 = vld [vmem:[#allocation8 + $0x288] sm:$0xf]  ;;  %v4478_v59 = vor.u32 %v6488_v53, %v4477_v52 }
 0x104   :  { %v6624_v58 = vld [vmem:[#allocation8 + $0x4e4] sm:$0xf0]  ;;  %v4734_v62 = vor.u32 %v6552_v55, %v4733_v23 }
 0x105   :  { %3665 = vmatpush.bf16.msra.mxu1 %v4862_v3  ;;  %3645 = vmatpush.bf16.msrb.mxu3 %v6202_v11  ;;  %v5277_v60 = vld [vmem:[#allocation8 + $0x6c8] sm:$0xf]  ;;  %v5022_v2 = vor.u32 %v6624_v58, %v5021_v57 }
 0x106   :  { %3633 = vmatmul.bf16.vlgmr.msrb.gmra.mxu2 %v7255_v40  ;;  %v6688_v61 = vld [vmem:[#allocation8 + $0x6e4] sm:$0xf0] }
 0x107   :  { %3677 = vmatpush.bf16.msra.mxu2 %v5150_v12  ;;  %3653 = vmatpush.bf16.msra.mxu0 %v4574_v18  ;;  %v6480_v1 = vld [vmem:[#allocation8 + $0x64] sm:$0xf0]  ;;  %v5278_v6 = vor.u32 %v6688_v61, %v5277_v60 }
 0x108   :  { %3646 = vmatmul.bf16.vlgmr.msrb.gmra.mxu3 %v7257_v45  ;;  %v4701_v3 = vld [vmem:[#allocation8 + $0x248] sm:$0xf]  ;;  %v4446_v10 = vor.u32 %v6480_v1, %v4445_v63 }
 0x109   :  { %3690 = vmatpush.bf16.msra.mxu3 %v5406_v16  ;;  %3666 = vmatpush.bf16.msra.mxu1 %v4830_v21  ;;  %v6544_v4 = vld [vmem:[#allocation8 + $0x264] sm:$0xf0] }
 0x10a   :  { %v4989_v8 = vld [vmem:[#allocation8 + $0x488] sm:$0xf]  ;;  %v4702_v15 = vor.u32 %v6544_v4, %v4701_v3 }
 0x10b   :  { %3678 = vmatpush.bf16.msra.mxu2 %v5118_v25  ;;  %3654 = vmatpush.bf16.msra.mxu0 %v4542_v32  ;;  %v6616_v9 = vld [vmem:[#allocation8 + $0x4a4] sm:$0xf0] }
 0x10c   :  { %v5245_v11 = vld [vmem:[#allocation8 + $0x688] sm:$0xf]  ;;  %v4990_v18 = vor.u32 %v6616_v9, %v4989_v8 }
 0x10d   :  { %3691 = vmatpush.bf16.msra.mxu3 %v5374_v28  ;;  %3667 = vmatpush.bf16.msra.mxu1 %v4798_v36  ;;  %v6680_v12 = vld [vmem:[#allocation8 + $0x6a4] sm:$0xf0] }
 0x10e   :  { %v4413_v14 = vld [vmem:[#allocation8 + $0x8] sm:$0xf]  ;;  %v5246_v22 = vor.u32 %v6680_v12, %v5245_v11 }
 0x10f   :  { %3679 = vmatpush.bf16.msra.mxu2 %v5086_v39  ;;  %3655 = vmatpush.bf16.msra.mxu0 %v4510_v47  ;;  %v6472_v16 = vld [vmem:[#allocation8 + $0x24] sm:$0xf0] }
 0x110   :  { %v4669_v17 = vld [vmem:[#allocation8 + $0x208] sm:$0xf]  ;;  %v4414_v27 = vor.u32 %v6472_v16, %v4413_v14 }
 0x111   :  { %3692 = vmatpush.bf16.msra.mxu3 %v5342_v43  ;;  %3668 = vmatpush.bf16.msra.mxu1 %v4766_v51  ;;  %v6536_v50 = vld [vmem:[#allocation8 + $0x224] sm:$0xf0] }
 0x112   :  { %v5661_v19 = vld [vmem:[#allocation8 + $0x9c8] sm:$0xf]  ;;  %v4670_v31 = vor.u32 %v6536_v50, %v4669_v17 }
 0x113   :  { %3680 = vmatpush.bf16.msra.mxu2 %v5054_v54  ;;  %3656 = vmatpush.bf16.msra.mxu0 %v4478_v59  ;;  %v6784_v20 = vld [vmem:[#allocation8 + $0x9e4] sm:$0xf0] }
 0x114   :  { %v5917_v21 = vld [vmem:[#allocation8 + $0xbc8] sm:$0xf]  ;;  %v5662_v32 = vor.u32 %v6784_v20, %v5661_v19 }
 0x115   :  { %3693 = vmatpush.bf16.msra.mxu3 %v5310_v56  ;;  %3669 = vmatpush.bf16.msra.mxu1 %v4734_v62  ;;  %v6848_v24 = vld [vmem:[#allocation8 + $0xbe4] sm:$0xf0] }
 0x116   :  { %v4957_v25 = vld [vmem:[#allocation8 + $0x448] sm:$0xf]  ;;  %v5918_v34 = vor.u32 %v6848_v24, %v5917_v21 }
 0x117   :  { %3681 = vmatpush.bf16.msra.mxu2 %v5022_v2  ;;  %v6608_v26 = vld [vmem:[#allocation8 + $0x464] sm:$0xf0]  ;;  %3657 = vmatpush.bf16.msra.mxu0 %v4446_v10 }
 0x118   :  { %v5213_v28 = vld [vmem:[#allocation8 + $0x648] sm:$0xf]  ;;  %v4958_v36 = vor.u32 %v6608_v26, %v4957_v25 }
 0x119   :  { %3694 = vmatpush.bf16.msra.mxu3 %v5278_v6  ;;  %v6672_v30 = vld [vmem:[#allocation8 + $0x664] sm:$0xf0]  ;;  %3670 = vmatpush.bf16.msra.mxu1 %v4702_v15 }
 0x11a   :  { %v5629_v33 = vld [vmem:[#allocation8 + $0x988] sm:$0xf]  ;;  %v5214_v41 = vor.u32 %v6672_v30, %v5213_v28 }
 0x11b   :  { %3682 = vmatpush.bf16.msra.mxu2 %v4990_v18  ;;  %v6776_v37 = vld [vmem:[#allocation8 + $0x9a4] sm:$0xf0]  ;;  %3658 = vmatpush.bf16.msra.mxu0 %v4414_v27 }
 0x11c   :  { %v5885_v38 = vld [vmem:[#allocation8 + $0xb88] sm:$0xf]  ;;  %v5630_v49 = vor.u32 %v6776_v37, %v5629_v33 }
 0x11d   :  { %v6840_v39 = vld [vmem:[#allocation8 + $0xba4] sm:$0xf0]  ;;  %3695 = vmatpush.bf16.msra.mxu3 %v5246_v22  ;;  %3671 = vmatpush.bf16.msra.mxu1 %v4670_v31 }
 0x11e   :  { %v4925_v42 = vld [vmem:[#allocation8 + $0x408] sm:$0xf]  ;;  %v5886_v53 = vor.u32 %v6840_v39, %v5885_v38  ;;  %3659 = vmatmul.bf16.vlgmr.msra.gmra.mxu0 %v7232_v0 }
 0x11f   :  { %v6600_v43 = vld [vmem:[#allocation8 + $0x424] sm:$0xf0]  ;;  %3703 = vmatpush.bf16.msrb.mxu0 %v5662_v32  ;;  %3683 = vmatpush.bf16.msra.mxu2 %v4958_v36 }
 0x120   :  { %v5181_v44 = vld [vmem:[#allocation8 + $0x608] sm:$0xf]  ;;  %v4926_v54 = vor.u32 %v6600_v43, %v4925_v42  ;;  %3672 = vmatmul.bf16.vlgmr.msra.gmra.mxu1 %v7235_v5 }
 0x121   :  { %v6664_v46 = vld [vmem:[#allocation8 + $0x624] sm:$0xf0]  ;;  %3716 = vmatpush.bf16.msrb.mxu1 %v5918_v34  ;;  %3696 = vmatpush.bf16.msra.mxu3 %v5214_v41 }
 0x122   :  { %v6173_v47 = vld [vmem:[#allocation8 + $0xdc8] sm:$0xf]  ;;  %v5182_v56 = vor.u32 %v6664_v46, %v5181_v44 }
 0x123   :  { %v6912_v48 = vld [vmem:[#allocation8 + $0xde4] sm:$0xf0]  ;;  %3704 = vmatpush.bf16.msrb.mxu0 %v5630_v49  ;;  %3684 = vmatpush.bf16.msra.mxu2 %v4926_v54 }
 0x124   :  { %v6429_v51 = vld [vmem:[#allocation8 + $0xfc8] sm:$0xf]  ;;  %v6174_v57 = vor.u32 %v6912_v48, %v6173_v47 }
 0x125   :  { %v6976_v52 = vld [vmem:[#allocation8 + $0xfe4] sm:$0xf0]  ;;  %3717 = vmatpush.bf16.msrb.mxu1 %v5886_v53  ;;  %3697 = vmatpush.bf16.msra.mxu3 %v5182_v56 }
 0x126   :  { %v5597_v23 = vld [vmem:[#allocation8 + $0x948] sm:$0xf]  ;;  %v6430_v60 = vor.u32 %v6976_v52, %v6429_v51  ;;  %3685 = vmatmul.bf16.vlgmr.msra.gmra.mxu2 %v7240_v29 }
 0x127   :  { %v6768_v55 = vld [vmem:[#allocation8 + $0x964] sm:$0xf0]  ;;  %3729 = vmatpush.bf16.msrb.mxu2 %v6174_v57 }
 0x128   :  { %v5853_v58 = vld [vmem:[#allocation8 + $0xb48] sm:$0xf]  ;;  %v5598_v63 = vor.u32 %v6768_v55, %v5597_v23  ;;  %3698 = vmatmul.bf16.vlgmr.msra.gmra.mxu3 %v7242_v35 }
 0x129   :  { %v6832_v59 = vld [vmem:[#allocation8 + $0xb64] sm:$0xf0]  ;;  %3742 = vmatpush.bf16.msrb.mxu3 %v6430_v60 }
 0x12a   :  { %v6141_v61 = vld [vmem:[#allocation8 + $0xd88] sm:$0xf]  ;;  %v5854_v3 = vor.u32 %v6832_v59, %v5853_v58  ;;  %3705 = vmatpush.bf16.msrb.mxu0 %v5598_v63 }
 0x12b   :  { %v6904_v62 = vld [vmem:[#allocation8 + $0xda4] sm:$0xf0] }
 0x12c   :  { %v6397_v1 = vld [vmem:[#allocation8 + $0xf88] sm:$0xf]  ;;  %v6142_v8 = vor.u32 %v6904_v62, %v6141_v61  ;;  %3718 = vmatpush.bf16.msrb.mxu1 %v5854_v3  ;;  %v6588_v3 = vld [vmem:[#allocation8 + $0x3cc] sm:$0xf] }
 0x12d   :  { %v6968_v2 = vld [vmem:[#allocation8 + $0xfa4] sm:$0xf0] }
 0x12e   :  { %v5565_v4 = vld [vmem:[#allocation8 + $0x908] sm:$0xf]  ;;  %v6398_v11 = vor.u32 %v6968_v2, %v6397_v1  ;;  %3730 = vmatpush.bf16.msrb.mxu2 %v6142_v8  ;;  %v6524_v1 = vld [vmem:[#allocation8 + $0x1cc] sm:$0xf] }
 0x12f   :  { %v6760_v6 = vld [vmem:[#allocation8 + $0x924] sm:$0xf0]  ;;  %v4639_v2 = vld [vmem:[#allocation8 + $0x1e8] sm:$0xf0] }
 0x130   :  { %v5821_v9 = vld [vmem:[#allocation8 + $0xb08] sm:$0xf]  ;;  %v5566_v15 = vor.u32 %v6760_v6, %v5565_v4  ;;  %3743 = vmatpush.bf16.msrb.mxu3 %v6398_v11  ;;  %v4895_v6 = vld [vmem:[#allocation8 + $0x3e8] sm:$0xf0] }
 0x131   :  { %v6824_v10 = vld [vmem:[#allocation8 + $0xb24] sm:$0xf0] }
 0x132   :  { %v6109_v12 = vld [vmem:[#allocation8 + $0xd48] sm:$0xf]  ;;  %v5822_v50 = vor.u32 %v6824_v10, %v5821_v9  ;;  %3706 = vmatpush.bf16.msrb.mxu0 %v5566_v15  ;;  %v4642_v15 = vor.u32 %v6524_v1, %v4639_v2  ;;  %v6700_v2 = vld [vmem:[#allocation8 + $0x74c] sm:$0xf] }
 0x133   :  { %v6896_v14 = vld [vmem:[#allocation8 + $0xd64] sm:$0xf0] }
 0x134   :  { %v6365_v16 = vld [vmem:[#allocation8 + $0xf48] sm:$0xf]  ;;  %v6110_v20 = vor.u32 %v6896_v14, %v6109_v12  ;;  %3719 = vmatpush.bf16.msrb.mxu1 %v5822_v50 }
 0x135   :  { %v6960_v17 = vld [vmem:[#allocation8 + $0xf64] sm:$0xf0] }
 0x136   :  { %v5533_v18 = vld [vmem:[#allocation8 + $0x8c8] sm:$0xf]  ;;  %v6366_v24 = vor.u32 %v6960_v17, %v6365_v16  ;;  %3731 = vmatpush.bf16.msrb.mxu2 %v6110_v20  ;;  %v6516_v16 = vld [vmem:[#allocation8 + $0x18c] sm:$0xf]  ;;  %v4898_v17 = vor.u32 %v6588_v3, %v4895_v6 }
 0x137   :  { %v6752_v19 = vld [vmem:[#allocation8 + $0x8e4] sm:$0xf0]  ;;  %v4863_v20 = vld [vmem:[#allocation8 + $0x3a8] sm:$0xf0] }
 0x138   :  { %v5789_v21 = vld [vmem:[#allocation8 + $0xac8] sm:$0xf]  ;;  %v5534_v27 = vor.u32 %v6752_v19, %v5533_v18  ;;  %3744 = vmatpush.bf16.msrb.mxu3 %v6366_v24  ;;  %v4607_v18 = vld [vmem:[#allocation8 + $0x1a8] sm:$0xf0] }
 0x139   :  { %v6816_v22 = vld [vmem:[#allocation8 + $0xae4] sm:$0xf0]  ;;  %v6580_v19 = vld [vmem:[#allocation8 + $0x38c] sm:$0xf] }
 0x13a   :  { %v6077_v25 = vld [vmem:[#allocation8 + $0xd08] sm:$0xf]  ;;  %v5790_v31 = vor.u32 %v6816_v22, %v5789_v21  ;;  %3707 = vmatpush.bf16.msrb.mxu0 %v5534_v27  ;;  %v6652_v27 = vld [vmem:[#allocation8 + $0x5cc] sm:$0xf] }
 0x13b   :  { %v6888_v26 = vld [vmem:[#allocation8 + $0xd24] sm:$0xf0]  ;;  %v5343_v3 = vld [vmem:[#allocation8 + $0x768] sm:$0xf0] }
 0x13c   :  { %v6333_v28 = vld [vmem:[#allocation8 + $0xf08] sm:$0xf]  ;;  %v6078_v34 = vor.u32 %v6888_v26, %v6077_v25  ;;  %3720 = vmatpush.bf16.msrb.mxu1 %v5790_v31  ;;  %v6716_v31 = vld [vmem:[#allocation8 + $0x7cc] sm:$0xf] }
 0x13d   :  { %v6952_v30 = vld [vmem:[#allocation8 + $0xf24] sm:$0xf0]  ;;  %v6492_v6 = vld [vmem:[#allocation8 + $0xcc] sm:$0xf] }
 0x13e   :  { %v5501_v32 = vld [vmem:[#allocation8 + $0x888] sm:$0xf]  ;;  %v6334_v38 = vor.u32 %v6952_v30, %v6333_v28  ;;  %3732 = vmatpush.bf16.msrb.mxu2 %v6078_v34  ;;  %v5151_v28 = vld [vmem:[#allocation8 + $0x5e8] sm:$0xf0]  ;;  %v4610_v30 = vor.u32 %v6516_v16, %v4607_v18 }
 0x13f   :  { %v6744_v33 = vld [vmem:[#allocation8 + $0x8a4] sm:$0xf0]  ;;  %v5055_v16 = vld [vmem:[#allocation8 + $0x528] sm:$0xf0] }
 0x140   :  { %v5757_v36 = vld [vmem:[#allocation8 + $0xa88] sm:$0xf]  ;;  %v5502_v42 = vor.u32 %v6744_v33, %v5501_v32  ;;  %3745 = vmatpush.bf16.msrb.mxu3 %v6334_v38  ;;  %v5407_v32 = vld [vmem:[#allocation8 + $0x7e8] sm:$0xf0]  ;;  %v4866_v33 = vor.u32 %v6580_v19, %v4863_v20  ;;  %v7273_v38 = vld [vmem:[#allocation10] sm:$0xff] }
 0x141   :  { %v6808_v37 = vld [vmem:[#allocation8 + $0xaa4] sm:$0xf0]  ;;  %v5311_v18 = vld [vmem:[#allocation8 + $0x728] sm:$0xf0] }
 0x142   :  { %v6045_v39 = vld [vmem:[#allocation8 + $0xcc8] sm:$0xf]  ;;  %v5758_v46 = vor.u32 %v6808_v37, %v5757_v36  ;;  %3708 = vmatpush.bf16.msrb.mxu0 %v5502_v42  ;;  %v6508_v36 = vld [vmem:[#allocation8 + $0x14c] sm:$0xf] }
 0x143   :  { %v6880_v41 = vld [vmem:[#allocation8 + $0xce4] sm:$0xf0]  ;;  %v4575_v37 = vld [vmem:[#allocation8 + $0x168] sm:$0xf0] }
 0x144   :  { %v6301_v43 = vld [vmem:[#allocation8 + $0xec8] sm:$0xf]  ;;  %v6046_v49 = vor.u32 %v6880_v41, %v6045_v39  ;;  %3721 = vmatpush.bf16.msrb.mxu1 %v5758_v46  ;;  %v5154_v41 = vor.u32 %v6652_v27, %v5151_v28  ;;  %v6572_v42 = vld [vmem:[#allocation8 + $0x34c] sm:$0xf] }
 0x145   :  { %v6944_v44 = vld [vmem:[#allocation8 + $0xee4] sm:$0xf0]  ;;  %v6644_v46 = vld [vmem:[#allocation8 + $0x58c] sm:$0xf] }
 0x146   :  { %v5469_v47 = vld [vmem:[#allocation8 + $0x848] sm:$0xf]  ;;  %v6302_v53 = vor.u32 %v6944_v44, %v6301_v43  ;;  %3733 = vmatpush.bf16.msrb.mxu2 %v6046_v49  ;;  %v4831_v43 = vld [vmem:[#allocation8 + $0x368] sm:$0xf0]  ;;  %v5410_v44 = vor.u32 %v6716_v31, %v5407_v32  ;;  %v867_v49 = vperm.slane %v7273_v38, 0 }
 0x147   :  { %v6736_v48 = vld [vmem:[#allocation8 + $0x864] sm:$0xf0]  ;;  %v6484_v20 = vld [vmem:[#allocation8 + $0x8c] sm:$0xf] }
 0x148   :  { %v5725_v51 = vld [vmem:[#allocation8 + $0xa48] sm:$0xf]  ;;  %v5470_v55 = vor.u32 %v6736_v48, %v5469_v47  ;;  %3746 = vmatpush.bf16.msrb.mxu3 %v6302_v53  ;;  %v5119_v47 = vld [vmem:[#allocation8 + $0x5a8] sm:$0xf0]  ;;  %v4578_v48 = vor.u32 %v6508_v36, %v4575_v37  ;;  %v4834_v53 = vor.u32 %v6572_v42, %v4831_v43 }
 0x149   :  { %v6800_v52 = vld [vmem:[#allocation8 + $0xa64] sm:$0xf0]  ;;  %v6620_v28 = vld [vmem:[#allocation8 + $0x4cc] sm:$0xf] }
 0x14a   :  { %v6013_v54 = vld [vmem:[#allocation8 + $0xc88] sm:$0xf]  ;;  %v5726_v59 = vor.u32 %v6800_v52, %v5725_v51  ;;  %3709 = vmatpush.bf16.msrb.mxu0 %v5470_v55  ;;  %v6708_v51 = vld [vmem:[#allocation8 + $0x78c] sm:$0xf]  ;;  %v5122_v55 = vor.u32 %v6644_v46, %v5119_v47 }
 0x14b   :  { %v6872_v23 = vld [vmem:[#allocation8 + $0xca4] sm:$0xf0]  ;;  %v5375_v52 = vld [vmem:[#allocation8 + $0x7a8] sm:$0xf0] }
 0x14c   :  { %v6269_v56 = vld [vmem:[#allocation8 + $0xe88] sm:$0xf]  ;;  %v6014_v63 = vor.u32 %v6872_v23, %v6013_v54  ;;  %3722 = vmatpush.bf16.msrb.mxu1 %v5726_v59  ;;  %v6500_v54 = vld [vmem:[#allocation8 + $0x10c] sm:$0xf]  ;;  %v5378_v59 = vor.u32 %v6708_v51, %v5375_v52 }
 0x14d   :  { %v6936_v57 = vld [vmem:[#allocation8 + $0xea4] sm:$0xf0]  ;;  %v4543_v23 = vld [vmem:[#allocation8 + $0x128] sm:$0xf0] }
 0x14e   :  { %v5437_v58 = vld [vmem:[#allocation8 + $0x808] sm:$0xf]  ;;  %v6270_v4 = vor.u32 %v6936_v57, %v6269_v56  ;;  %3734 = vmatpush.bf16.msrb.mxu2 %v6014_v63  ;;  %v6564_v56 = vld [vmem:[#allocation8 + $0x30c] sm:$0xf]  ;;  %v3465_v63 = vpop.f32.mrf.mxu1  ;;  %v4546_v1 = vor.u32 %v6500_v54, %v4543_v23  ;;  %v3491_v23 = vpop.f32.mrf.mxu3 }
 0x14f   :  { %v6728_v60 = vld [vmem:[#allocation8 + $0x824] sm:$0xf0]  ;;  %v4799_v57 = vld [vmem:[#allocation8 + $0x328] sm:$0xf0] }
 0x150   :  { %v5693_v61 = vld [vmem:[#allocation8 + $0xa08] sm:$0xf]  ;;  %v5438_v10 = vor.u32 %v6728_v60, %v5437_v58  ;;  %3747 = vmatpush.bf16.msrb.mxu3 %v6270_v4  ;;  %v3452_v58 = vpop.f32.mrf.mxu0  ;;  %v6636_v60 = vld [vmem:[#allocation8 + $0x54c] sm:$0xf]  ;;  %v4802_v4 = vor.u32 %v6564_v56, %v4799_v57 }
 0x151   :  { %v6792_v62 = vld [vmem:[#allocation8 + $0xa24] sm:$0xf0]  ;;  %v6476_v37 = vld [vmem:[#allocation8 + $0x4c] sm:$0xf] }
 0x152   :  { %v5981_v8 = vld [vmem:[#allocation8 + $0xc48] sm:$0xf]  ;;  %v5694_v14 = vor.u32 %v6792_v62, %v5693_v61  ;;  %3710 = vmatpush.bf16.msrb.mxu0 %v5438_v10  ;;  %v5087_v61 = vld [vmem:[#allocation8 + $0x568] sm:$0xf0]  ;;  %v3453_v62 = vadd.f32 %v3452_v58, %v867_v49 }
 0x153   :  { %v6864_v9 = vld [vmem:[#allocation8 + $0xc64] sm:$0xf0]  ;;  %v5090_v10 = vor.u32 %v6636_v60, %v5087_v61  ;;  %v6540_v42 = vld [vmem:[#allocation8 + $0x24c] sm:$0xf] }
 0x154   :  { %v6237_v11 = vld [vmem:[#allocation8 + $0xe48] sm:$0xf]  ;;  %v5982_v50 = vor.u32 %v6864_v9, %v5981_v8  ;;  %3723 = vmatpush.bf16.msrb.mxu1 %v5694_v14  ;;  %v4511_v8 = vld [vmem:[#allocation8 + $0xe8] sm:$0xf0]  ;;  %v3466_v9 = vadd.f32 %v3465_v63, %v3453_v62  ;;  %v5346_v14 = vor.u32 %v6700_v2, %v5343_v3 }
 0x155   :  { %v6928_v12 = vld [vmem:[#allocation8 + $0xe64] sm:$0xf0]  ;;  %3711 = vmatmul.bf16.vlgmr.msrb.gmra.mxu0 %v7249_v7  ;;  %v4703_v43 = vld [vmem:[#allocation8 + $0x268] sm:$0xf0] }
 0x156   :  { %v6238_v21 = vor.u32 %v6928_v12, %v6237_v11  ;;  %v5949_v22 = vld [vmem:[#allocation8 + $0xc08] sm:$0xf]  ;;  %3755 = vmatpush.bf16.msra.mxu0 %v4642_v15  ;;  %3735 = vmatpush.bf16.msrb.mxu2 %v5982_v50  ;;  %v6556_v11 = vld [vmem:[#allocation8 + $0x2cc] sm:$0xf]  ;;  %v3467_v31 = vpop.f32.mrf.mxu1 }
 0x157   :  { %v6856_v24 = vld [vmem:[#allocation8 + $0xc24] sm:$0xf0]  ;;  %3724 = vmatmul.bf16.vlgmr.msrb.gmra.mxu1 %v7251_v13  ;;  %v4767_v12 = vld [vmem:[#allocation8 + $0x2e8] sm:$0xf0] }
 0x158   :  { %v6205_v25 = vld [vmem:[#allocation8 + $0xe08] sm:$0xf]  ;;  %3768 = vmatpush.bf16.msra.mxu1 %v4898_v17  ;;  %v5950_v34 = vor.u32 %v6856_v24, %v5949_v22  ;;  %3748 = vmatpush.bf16.msrb.mxu3 %v6238_v21  ;;  %v6628_v15 = vld [vmem:[#allocation8 + $0x50c] sm:$0xf]  ;;  %v4514_v17 = vor.u32 %v6492_v6, %v4511_v8  ;;  %v4770_v19 = vor.u32 %v6556_v11, %v4767_v12 }
 0x159   :  { %v6920_v26 = vld [vmem:[#allocation8 + $0xe24] sm:$0xf0]  ;;  %v6692_v50 = vld [vmem:[#allocation8 + $0x70c] sm:$0xf]  ;;  %v5058_v22 = vor.u32 %v6628_v15, %v5055_v16 }
 0x15a   :  { %v6206_v39 = vor.u32 %v6920_v26, %v6205_v25  ;;  %3756 = vmatpush.bf16.msra.mxu0 %v4610_v30  ;;  %3736 = vmatpush.bf16.msrb.mxu2 %v5950_v34  ;;  %v4479_v21 = vld [vmem:[#allocation8 + $0xa8] sm:$0xf0]  ;;  %v3454_v26 = vpop.f32.mrf.mxu0  ;;  %v5314_v27 = vor.u32 %v6692_v50, %v5311_v18 }
 0x15b   :  { %v6548_v24 = vld [vmem:[#allocation8 + $0x28c] sm:$0xf]  ;;  %v4482_v32 = vor.u32 %v6484_v20, %v4479_v21 }
 0x15c   :  { %3769 = vmatpush.bf16.msra.mxu1 %v4866_v33  ;;  %3749 = vmatpush.bf16.msrb.mxu3 %v6206_v39  ;;  %v4735_v25 = vld [vmem:[#allocation8 + $0x2a8] sm:$0xf0] }
 0x15d   :  { %3737 = vmatmul.bf16.vlgmr.msrb.gmra.mxu2 %v7255_v40  ;;  %v5023_v30 = vld [vmem:[#allocation8 + $0x4e8] sm:$0xf0]  ;;  %v4738_v36 = vor.u32 %v6548_v24, %v4735_v25 }
 0x15e   :  { %3781 = vmatpush.bf16.msra.mxu2 %v5154_v41  ;;  %3757 = vmatpush.bf16.msra.mxu0 %v4578_v48  ;;  %v6684_v33 = vld [vmem:[#allocation8 + $0x6cc] sm:$0xf]  ;;  %v5026_v41 = vor.u32 %v6620_v28, %v5023_v30  ;;  %v3478_v48 = vpop.f32.mrf.mxu2  ;;  %v3517_v8 = vpop.f32.mrf.mxu1 }
 0x15f   :  { %3750 = vmatmul.bf16.vlgmr.msrb.gmra.mxu3 %v7257_v45  ;;  %v5279_v34 = vld [vmem:[#allocation8 + $0x6e8] sm:$0xf0]  ;;  %v3479_v54 = vadd.f32 %v3478_v48, %v3466_v9 }
 0x160   :  { %3794 = vmatpush.bf16.msra.mxu3 %v5410_v44  ;;  %3770 = vmatpush.bf16.msra.mxu1 %v4834_v53  ;;  %v4447_v39 = vld [vmem:[#allocation8 + $0x68] sm:$0xf0]  ;;  %v5282_v44 = vor.u32 %v6684_v33, %v5279_v34 }
 0x161   :  { %v6612_v46 = vld [vmem:[#allocation8 + $0x48c] sm:$0xf]  ;;  %v4450_v49 = vor.u32 %v6476_v37, %v4447_v39  ;;  %v3492_v63 = vadd.f32 %v3491_v23, %v3479_v54 }
 0x162   :  { %3782 = vmatpush.bf16.msra.mxu2 %v5122_v55  ;;  %3758 = vmatpush.bf16.msra.mxu0 %v4546_v1  ;;  %v4991_v47 = vld [vmem:[#allocation8 + $0x4a8] sm:$0xf0]  ;;  %v4706_v55 = vor.u32 %v6540_v42, %v4703_v43  ;;  %v3504_v1 = vpop.f32.mrf.mxu0 }
 0x163   :  { %v6676_v51 = vld [vmem:[#allocation8 + $0x68c] sm:$0xf]  ;;  %v3505_v12 = vadd.f32 %v3504_v1, %v3492_v63 }
 0x164   :  { %3795 = vmatpush.bf16.msra.mxu3 %v5378_v59  ;;  %3771 = vmatpush.bf16.msra.mxu1 %v4802_v4  ;;  %v5247_v52 = vld [vmem:[#allocation8 + $0x6a8] sm:$0xf0]  ;;  %v4994_v59 = vor.u32 %v6612_v46, %v4991_v47 }
 0x165   :  { %v6468_v53 = vld [vmem:[#allocation8 + $0xc] sm:$0xf]  ;;  %v5250_v2 = vor.u32 %v6676_v51, %v5247_v52  ;;  %v3518_v21 = vadd.f32 %v3517_v8, %v3505_v12 }
 0x166   :  { %3783 = vmatpush.bf16.msra.mxu2 %v5090_v10  ;;  %3759 = vmatpush.bf16.msra.mxu0 %v4514_v17  ;;  %v4415_v56 = vld [vmem:[#allocation8 + $0x28] sm:$0xf0] }
 0x167   :  { %v6532_v57 = vld [vmem:[#allocation8 + $0x20c] sm:$0xf]  ;;  %v4418_v9 = vor.u32 %v6468_v53, %v4415_v56 }
 0x168   :  { %3796 = vmatpush.bf16.msra.mxu3 %v5346_v14  ;;  %3772 = vmatpush.bf16.msra.mxu1 %v4770_v19  ;;  %v4671_v58 = vld [vmem:[#allocation8 + $0x228] sm:$0xf0] }
 0x169   :  { %v6780_v60 = vld [vmem:[#allocation8 + $0x9cc] sm:$0xf]  ;;  %v4674_v14 = vor.u32 %v6532_v57, %v4671_v58 }
 0x16a   :  { %3784 = vmatpush.bf16.msra.mxu2 %v5058_v22  ;;  %3760 = vmatpush.bf16.msra.mxu0 %v4482_v32  ;;  %v5663_v61 = vld [vmem:[#allocation8 + $0x9e8] sm:$0xf0]  ;;  %v3493_v32 = vpop.f32.mrf.mxu3  ;;  %v3506_v43 = vpop.f32.mrf.mxu0 }
 0x16b   :  { %v6844_v62 = vld [vmem:[#allocation8 + $0xbcc] sm:$0xf]  ;;  %v5666_v15 = vor.u32 %v6780_v60, %v5663_v61 }
 0x16c   :  { %3797 = vmatpush.bf16.msra.mxu3 %v5314_v27  ;;  %3773 = vmatpush.bf16.msra.mxu1 %v4738_v36  ;;  %v5919_v3 = vld [vmem:[#allocation8 + $0xbe8] sm:$0xf0]  ;;  %v3480_v27 = vpop.f32.mrf.mxu2 }
 0x16d   :  { %v6604_v4 = vld [vmem:[#allocation8 + $0x44c] sm:$0xf]  ;;  %v5922_v17 = vor.u32 %v6844_v62, %v5919_v3 }
 0x16e   :  { %3785 = vmatpush.bf16.msra.mxu2 %v5026_v41  ;;  %v4959_v6 = vld [vmem:[#allocation8 + $0x468] sm:$0xf0]  ;;  %3761 = vmatpush.bf16.msra.mxu0 %v4450_v49  ;;  %v3519_v49 = vpop.f32.mrf.mxu1 }
 0x16f   :  { %v6668_v10 = vld [vmem:[#allocation8 + $0x64c] sm:$0xf]  ;;  %v4962_v50 = vor.u32 %v6604_v4, %v4959_v6  ;;  %v868_v6 = vperm.slane %v7273_v38, 1 }
 0x170   :  { %3798 = vmatpush.bf16.msra.mxu3 %v5282_v44  ;;  %v5215_v11 = vld [vmem:[#allocation8 + $0x668] sm:$0xf0]  ;;  %3774 = vmatpush.bf16.msra.mxu1 %v4706_v55 }
 0x171   :  { %v6772_v16 = vld [vmem:[#allocation8 + $0x98c] sm:$0xf]  ;;  %v5218_v22 = vor.u32 %v6668_v10, %v5215_v11 }
 0x172   :  { %3786 = vmatpush.bf16.msra.mxu2 %v4994_v59  ;;  %v5631_v18 = vld [vmem:[#allocation8 + $0x9a8] sm:$0xf0]  ;;  %3762 = vmatpush.bf16.msra.mxu0 %v4418_v9  ;;  %v3543_v4 = vpop.f32.mrf.mxu3 }
 0x173   :  { %v6836_v19 = vld [vmem:[#allocation8 + $0xb8c] sm:$0xf]  ;;  %v5634_v33 = vor.u32 %v6772_v16, %v5631_v18  ;;  %v3556_v18 = vpop.f32.mrf.mxu0 }
 0x174   :  { %v5887_v20 = vld [vmem:[#allocation8 + $0xba8] sm:$0xf0]  ;;  %3799 = vmatpush.bf16.msra.mxu3 %v5250_v2  ;;  %3775 = vmatpush.bf16.msra.mxu1 %v4674_v14  ;;  %v3530_v62 = vpop.f32.mrf.mxu2 }
 0x175   :  { %v6596_v24 = vld [vmem:[#allocation8 + $0x40c] sm:$0xf]  ;;  %v5890_v37 = vor.u32 %v6836_v19, %v5887_v20  ;;  %3763 = vmatmul.bf16.vlgmr.msra.gmra.mxu0 %v7232_v0  ;;  %v3531_v3 = vadd.f32 %v3530_v62, %v3518_v21 }
 0x176   :  { %v4927_v25 = vld [vmem:[#allocation8 + $0x428] sm:$0xf0]  ;;  %3807 = vmatpush.bf16.msrb.mxu0 %v5666_v15  ;;  %3787 = vmatpush.bf16.msra.mxu2 %v4962_v50 }
 0x177   :  { %v6660_v26 = vld [vmem:[#allocation8 + $0x60c] sm:$0xf]  ;;  %v4930_v39 = vor.u32 %v6596_v24, %v4927_v25  ;;  %3776 = vmatmul.bf16.vlgmr.msra.gmra.mxu1 %v7235_v5  ;;  %v7285_v15 = vadd.f32 %v3543_v4, %v3531_v3  ;;  %v3569_v24 = vpop.f32.mrf.mxu1 }
 0x178   :  { %v5183_v28 = vld [vmem:[#allocation8 + $0x628] sm:$0xf0]  ;;  %3820 = vmatpush.bf16.msrb.mxu1 %v5922_v17  ;;  %3800 = vmatpush.bf16.msra.mxu3 %v5218_v22  ;;  %v3557_v22 = vadd.f32 %v3556_v18, %v868_v6  ;;  %v4645_v6 = vld [vmem:[#allocation8 + $0x1d0] sm:$0xf] }
 0x179   :  { %v6908_v30 = vld [vmem:[#allocation8 + $0xdcc] sm:$0xf]  ;;  %v5186_v44 = vor.u32 %v6660_v26, %v5183_v28 }
 0x17a   :  { %v6175_v31 = vld [vmem:[#allocation8 + $0xde8] sm:$0xf0]  ;;  %3808 = vmatpush.bf16.msrb.mxu0 %v5634_v33  ;;  %3788 = vmatpush.bf16.msra.mxu2 %v4930_v39  ;;  %v3570_v32 = vadd.f32 %v3569_v24, %v3557_v22  ;;  %v3545_v43 = vpop.f32.mrf.mxu3  ;;  %v4613_v24 = vld [vmem:[#allocation8 + $0x190] sm:$0xf] }
 0x17b   :  { %v6972_v34 = vld [vmem:[#allocation8 + $0xfcc] sm:$0xf]  ;;  %v6178_v46 = vor.u32 %v6908_v30, %v6175_v31  ;;  %v5413_v43 = vld [vmem:[#allocation8 + $0x7d0] sm:$0xf] }
 0x17c   :  { %v6431_v36 = vld [vmem:[#allocation8 + $0xfe8] sm:$0xf0]  ;;  %3821 = vmatpush.bf16.msrb.mxu1 %v5890_v37  ;;  %3801 = vmatpush.bf16.msra.mxu3 %v5186_v44  ;;  %v3532_v37 = vpop.f32.mrf.mxu2 }
 0x17d   :  { %v6764_v41 = vld [vmem:[#allocation8 + $0x94c] sm:$0xf]  ;;  %v6434_v51 = vor.u32 %v6972_v34, %v6431_v36  ;;  %3789 = vmatmul.bf16.vlgmr.msra.gmra.mxu2 %v7240_v29 }
 0x17e   :  { %v5599_v42 = vld [vmem:[#allocation8 + $0x968] sm:$0xf0]  ;;  %3833 = vmatpush.bf16.msrb.mxu2 %v6178_v46 }
 0x17f   :  { %v6828_v47 = vld [vmem:[#allocation8 + $0xb4c] sm:$0xf]  ;;  %v5602_v54 = vor.u32 %v6764_v41, %v5599_v42  ;;  %3802 = vmatmul.bf16.vlgmr.msra.gmra.mxu3 %v7242_v35 }
 0x180   :  { %v5855_v48 = vld [vmem:[#allocation8 + $0xb68] sm:$0xf0]  ;;  %3846 = vmatpush.bf16.msrb.mxu3 %v6434_v51 }
 0x181   :  { %v6900_v52 = vld [vmem:[#allocation8 + $0xd8c] sm:$0xf]  ;;  %v5858_v56 = vor.u32 %v6828_v47, %v5855_v48  ;;  %3809 = vmatpush.bf16.msrb.mxu0 %v5602_v54 }
 0x182   :  { %v6143_v53 = vld [vmem:[#allocation8 + $0xda8] sm:$0xf0] }
 0x183   :  { %v6964_v23 = vld [vmem:[#allocation8 + $0xf8c] sm:$0xf]  ;;  %v6146_v59 = vor.u32 %v6900_v52, %v6143_v53  ;;  %3822 = vmatpush.bf16.msrb.mxu1 %v5858_v56 }
 0x184   :  { %v6399_v55 = vld [vmem:[#allocation8 + $0xfa8] sm:$0xf0] }
 0x185   :  { %v6756_v57 = vld [vmem:[#allocation8 + $0x90c] sm:$0xf]  ;;  %v6402_v63 = vor.u32 %v6964_v23, %v6399_v55  ;;  %3834 = vmatpush.bf16.msrb.mxu2 %v6146_v59  ;;  %v3558_v23 = vpop.f32.mrf.mxu0 }
 0x186   :  { %v5567_v58 = vld [vmem:[#allocation8 + $0x928] sm:$0xf0] }
 0x187   :  { %v6820_v60 = vld [vmem:[#allocation8 + $0xb0c] sm:$0xf]  ;;  %v5570_v8 = vor.u32 %v6756_v57, %v5567_v58  ;;  %3847 = vmatpush.bf16.msrb.mxu3 %v6402_v63  ;;  %v3571_v58 = vpop.f32.mrf.mxu1 }
 0x188   :  { %v5823_v61 = vld [vmem:[#allocation8 + $0xb28] sm:$0xf0]  ;;  %v6649_v58 = vld [vmem:[#allocation8 + $0x5ac] sm:$0xf0] }
 0x189   :  { %v6892_v1 = vld [vmem:[#allocation8 + $0xd4c] sm:$0xf]  ;;  %v5826_v11 = vor.u32 %v6820_v60, %v5823_v61  ;;  %3810 = vmatpush.bf16.msrb.mxu0 %v5570_v8  ;;  %v6529_v8 = vld [vmem:[#allocation8 + $0x1ec] sm:$0xf0] }
 0x18a   :  { %v6111_v2 = vld [vmem:[#allocation8 + $0xd68] sm:$0xf0]  ;;  %v4646_v22 = vor.u32 %v6529_v8, %v4645_v6  ;;  %v5093_v8 = vld [vmem:[#allocation8 + $0x550] sm:$0xf] }
 0x18b   :  { %v6956_v9 = vld [vmem:[#allocation8 + $0xf4c] sm:$0xf]  ;;  %v6114_v16 = vor.u32 %v6892_v1, %v6111_v2  ;;  %3823 = vmatpush.bf16.msrb.mxu1 %v5826_v11  ;;  %v6593_v11 = vld [vmem:[#allocation8 + $0x3ec] sm:$0xf0] }
 0x18c   :  { %v6367_v10 = vld [vmem:[#allocation8 + $0xf68] sm:$0xf0] }
 0x18d   :  { %v6748_v12 = vld [vmem:[#allocation8 + $0x8cc] sm:$0xf]  ;;  %v6370_v19 = vor.u32 %v6956_v9, %v6367_v10  ;;  %3835 = vmatpush.bf16.msrb.mxu2 %v6114_v16  ;;  %v4901_v9 = vld [vmem:[#allocation8 + $0x3d0] sm:$0xf]  ;;  %v3582_v16 = vpop.f32.mrf.mxu2 }
 0x18e   :  { %v5535_v14 = vld [vmem:[#allocation8 + $0x8e8] sm:$0xf0] }
 0x18f   :  { %v6812_v17 = vld [vmem:[#allocation8 + $0xacc] sm:$0xf]  ;;  %v5538_v25 = vor.u32 %v6748_v12, %v5535_v14  ;;  %3848 = vmatpush.bf16.msrb.mxu3 %v6370_v19 }
 0x190   :  { %v5791_v50 = vld [vmem:[#allocation8 + $0xae8] sm:$0xf0] }
 0x191   :  { %v6884_v20 = vld [vmem:[#allocation8 + $0xd0c] sm:$0xf]  ;;  %v5794_v28 = vor.u32 %v6812_v17, %v5791_v50  ;;  %3811 = vmatpush.bf16.msrb.mxu0 %v5538_v25  ;;  %v3595_v17 = vpop.f32.mrf.mxu3  ;;  %v4902_v25 = vor.u32 %v6593_v11, %v4901_v9  ;;  %v6641_v9 = vld [vmem:[#allocation8 + $0x56c] sm:$0xf0] }
 0x192   :  { %v6079_v21 = vld [vmem:[#allocation8 + $0xd28] sm:$0xf0]  ;;  %v5349_v11 = vld [vmem:[#allocation8 + $0x750] sm:$0xf] }
 0x193   :  { %v6948_v26 = vld [vmem:[#allocation8 + $0xf0c] sm:$0xf]  ;;  %v6082_v33 = vor.u32 %v6884_v20, %v6079_v21  ;;  %3824 = vmatpush.bf16.msrb.mxu1 %v5794_v28  ;;  %v3583_v20 = vadd.f32 %v3582_v16, %v3570_v32  ;;  %v4869_v28 = vld [vmem:[#allocation8 + $0x390] sm:$0xf] }
 0x194   :  { %v6335_v27 = vld [vmem:[#allocation8 + $0xf28] sm:$0xf0]  ;;  %v5157_v32 = vld [vmem:[#allocation8 + $0x5d0] sm:$0xf] }
 0x195   :  { %v6740_v30 = vld [vmem:[#allocation8 + $0x88c] sm:$0xf]  ;;  %v6338_v39 = vor.u32 %v6948_v26, %v6335_v27  ;;  %3836 = vmatpush.bf16.msrb.mxu2 %v6082_v33  ;;  %v6521_v27 = vld [vmem:[#allocation8 + $0x1ac] sm:$0xf0]  ;;  %v3584_v23 = vpop.f32.mrf.mxu2 }
 0x196   :  { %v5503_v31 = vld [vmem:[#allocation8 + $0x8a8] sm:$0xf0]  ;;  %v4517_v16 = vld [vmem:[#allocation8 + $0xd0] sm:$0xf] }
 0x197   :  { %v6804_v34 = vld [vmem:[#allocation8 + $0xa8c] sm:$0xf]  ;;  %v5506_v44 = vor.u32 %v6740_v30, %v5503_v31  ;;  %3849 = vmatpush.bf16.msrb.mxu3 %v6338_v39  ;;  %v6585_v30 = vld [vmem:[#allocation8 + $0x3ac] sm:$0xf0]  ;;  %v7287_v31 = vadd.f32 %v3595_v17, %v3583_v20  ;;  %v3608_v20 = vpop.f32.mrf.mxu0 }
 0x198   :  { %v5759_v36 = vld [vmem:[#allocation8 + $0xaa8] sm:$0xf0]  ;;  %v6497_v17 = vld [vmem:[#allocation8 + $0xec] sm:$0xf0] }
 0x199   :  { %v6876_v41 = vld [vmem:[#allocation8 + $0xccc] sm:$0xf]  ;;  %v5762_v48 = vor.u32 %v6804_v34, %v5759_v36  ;;  %3812 = vmatpush.bf16.msrb.mxu0 %v5506_v44  ;;  %v6721_v44 = vld [vmem:[#allocation8 + $0x7ec] sm:$0xf0] }
 0x19a   :  { %v6047_v42 = vld [vmem:[#allocation8 + $0xce8] sm:$0xf0] }
 0x19b   :  { %v6940_v46 = vld [vmem:[#allocation8 + $0xecc] sm:$0xf]  ;;  %v6050_v52 = vor.u32 %v6876_v41, %v6047_v42  ;;  %3825 = vmatpush.bf16.msrb.mxu1 %v5762_v48  ;;  %v6657_v41 = vld [vmem:[#allocation8 + $0x5ec] sm:$0xf0]  ;;  %v4614_v42 = vor.u32 %v6521_v27, %v4613_v24  ;;  %v4518_v27 = vor.u32 %v6497_v17, %v4517_v16 }
 0x19c   :  { %v6303_v47 = vld [vmem:[#allocation8 + $0xee8] sm:$0xf0]  ;;  %v4581_v48 = vld [vmem:[#allocation8 + $0x150] sm:$0xf] }
 0x19d   :  { %v6732_v49 = vld [vmem:[#allocation8 + $0x84c] sm:$0xf]  ;;  %v6306_v55 = vor.u32 %v6940_v46, %v6303_v47  ;;  %3837 = vmatpush.bf16.msrb.mxu2 %v6050_v52  ;;  %v4870_v46 = vor.u32 %v6585_v30, %v4869_v28  ;;  %v5158_v52 = vor.u32 %v6657_v41, %v5157_v32  ;;  %v6633_v24 = vld [vmem:[#allocation8 + $0x52c] sm:$0xf0] }
 0x19e   :  { %v5471_v51 = vld [vmem:[#allocation8 + $0x868] sm:$0xf0]  ;;  %v5317_v28 = vld [vmem:[#allocation8 + $0x710] sm:$0xf] }
 0x19f   :  { %v6796_v53 = vld [vmem:[#allocation8 + $0xa4c] sm:$0xf]  ;;  %v5474_v59 = vor.u32 %v6732_v49, %v5471_v51  ;;  %3850 = vmatpush.bf16.msrb.mxu3 %v6306_v55  ;;  %v6513_v49 = vld [vmem:[#allocation8 + $0x16c] sm:$0xf0]  ;;  %v3597_v55 = vpop.f32.mrf.mxu3 }
 0x1a0   :  { %v5727_v54 = vld [vmem:[#allocation8 + $0xa68] sm:$0xf0]  ;;  %v6697_v30 = vld [vmem:[#allocation8 + $0x72c] sm:$0xf0]  ;;  %v3610_v55 = vpop.f32.mrf.mxu0 }
 0x1a1   :  { %v6868_v56 = vld [vmem:[#allocation8 + $0xc8c] sm:$0xf]  ;;  %v5730_v63 = vor.u32 %v6796_v53, %v5727_v54  ;;  %3813 = vmatpush.bf16.msrb.mxu0 %v5474_v59  ;;  %v4837_v53 = vld [vmem:[#allocation8 + $0x350] sm:$0xf]  ;;  %v4582_v59 = vor.u32 %v6513_v49, %v4581_v48 }
 0x1a2   :  { %v6015_v57 = vld [vmem:[#allocation8 + $0xca8] sm:$0xf0]  ;;  %v6577_v54 = vld [vmem:[#allocation8 + $0x36c] sm:$0xf0] }
 0x1a3   :  { %v6932_v60 = vld [vmem:[#allocation8 + $0xe8c] sm:$0xf]  ;;  %v6018_v4 = vor.u32 %v6868_v56, %v6015_v57  ;;  %3826 = vmatpush.bf16.msrb.mxu1 %v5730_v63  ;;  %v5414_v56 = vor.u32 %v6721_v44, %v5413_v43  ;;  %v5125_v57 = vld [vmem:[#allocation8 + $0x590] sm:$0xf] }
 0x1a4   :  { %v6271_v61 = vld [vmem:[#allocation8 + $0xea8] sm:$0xf0]  ;;  %v4549_v63 = vld [vmem:[#allocation8 + $0x110] sm:$0xf] }
 0x1a5   :  { %v6724_v62 = vld [vmem:[#allocation8 + $0x80c] sm:$0xf]  ;;  %v6274_v10 = vor.u32 %v6932_v60, %v6271_v61  ;;  %3838 = vmatpush.bf16.msrb.mxu2 %v6018_v4  ;;  %v5381_v60 = vld [vmem:[#allocation8 + $0x790] sm:$0xf] }
 0x1a6   :  { %v5439_v1 = vld [vmem:[#allocation8 + $0x828] sm:$0xf0]  ;;  %v6713_v61 = vld [vmem:[#allocation8 + $0x7ac] sm:$0xf0] }
 0x1a7   :  { %v6788_v2 = vld [vmem:[#allocation8 + $0xa0c] sm:$0xf]  ;;  %v5442_v50 = vor.u32 %v6724_v62, %v5439_v1  ;;  %3851 = vmatpush.bf16.msrb.mxu3 %v6274_v10  ;;  %v4838_v62 = vor.u32 %v6577_v54, %v4837_v53  ;;  %v6505_v1 = vld [vmem:[#allocation8 + $0x12c] sm:$0xf0]  ;;  %v5382_v6 = vor.u32 %v6713_v61, %v5381_v60 }
 0x1a8   :  { %v5695_v3 = vld [vmem:[#allocation8 + $0xa28] sm:$0xf0]  ;;  %v6569_v4 = vld [vmem:[#allocation8 + $0x32c] sm:$0xf0]  ;;  %v4550_v10 = vor.u32 %v6505_v1, %v4549_v63 }
 0x1a9   :  { %v6860_v12 = vld [vmem:[#allocation8 + $0xc4c] sm:$0xf]  ;;  %v5698_v21 = vor.u32 %v6788_v2, %v5695_v3  ;;  %3814 = vmatpush.bf16.msrb.mxu0 %v5442_v50  ;;  %v5126_v2 = vor.u32 %v6649_v58, %v5125_v57  ;;  %v4805_v3 = vld [vmem:[#allocation8 + $0x310] sm:$0xf]  ;;  %v5094_v50 = vor.u32 %v6641_v9, %v5093_v8 }
 0x1aa   :  { %v5983_v14 = vld [vmem:[#allocation8 + $0xc68] sm:$0xf0]  ;;  %v4741_v32 = vld [vmem:[#allocation8 + $0x290] sm:$0xf] }
 0x1ab   :  { %v6924_v18 = vld [vmem:[#allocation8 + $0xe4c] sm:$0xf]  ;;  %v5986_v26 = vor.u32 %v6860_v12, %v5983_v14  ;;  %3827 = vmatpush.bf16.msrb.mxu1 %v5698_v21  ;;  %v6705_v12 = vld [vmem:[#allocation8 + $0x76c] sm:$0xf0]  ;;  %v4806_v14 = vor.u32 %v6569_v4, %v4805_v3 }
 0x1ac   :  { %v6239_v19 = vld [vmem:[#allocation8 + $0xe68] sm:$0xf0]  ;;  %3815 = vmatmul.bf16.vlgmr.msrb.gmra.mxu0 %v7249_v7  ;;  %v5350_v21 = vor.u32 %v6705_v12, %v5349_v11  ;;  %v6553_v41 = vld [vmem:[#allocation8 + $0x2ac] sm:$0xf0]  ;;  %v3634_v11 = vpop.f32.mrf.mxu2 }
 0x1ad   :  { %v6242_v33 = vor.u32 %v6924_v18, %v6239_v19  ;;  %v6852_v34 = vld [vmem:[#allocation8 + $0xc0c] sm:$0xf]  ;;  %3859 = vmatpush.bf16.msra.mxu0 %v4646_v22  ;;  %3839 = vmatpush.bf16.msrb.mxu2 %v5986_v26  ;;  %v4773_v18 = vld [vmem:[#allocation8 + $0x2d0] sm:$0xf]  ;;  %v3621_v26 = vpop.f32.mrf.mxu1  ;;  %v4742_v48 = vor.u32 %v6553_v41, %v4741_v32 }
 0x1ae   :  { %v5951_v36 = vld [vmem:[#allocation8 + $0xc28] sm:$0xf0]  ;;  %3828 = vmatmul.bf16.vlgmr.msrb.gmra.mxu1 %v7251_v13  ;;  %v6561_v19 = vld [vmem:[#allocation8 + $0x2ec] sm:$0xf0] }
 0x1af   :  { %v6916_v37 = vld [vmem:[#allocation8 + $0xe0c] sm:$0xf]  ;;  %3872 = vmatpush.bf16.msra.mxu1 %v4902_v25  ;;  %v5954_v47 = vor.u32 %v6852_v34, %v5951_v36  ;;  %3852 = vmatpush.bf16.msrb.mxu3 %v6242_v33  ;;  %v5061_v22 = vld [vmem:[#allocation8 + $0x510] sm:$0xf]  ;;  %v3609_v25 = vadd.f32 %v3608_v20, %v7287_v31  ;;  %v4774_v33 = vor.u32 %v6561_v19, %v4773_v18  ;;  %v3647_v19 = vpop.f32.mrf.mxu3 }
 0x1b0   :  { %v6207_v39 = vld [vmem:[#allocation8 + $0xe28] sm:$0xf0]  ;;  %v4485_v34 = vld [vmem:[#allocation8 + $0x90] sm:$0xf] }
 0x1b1   :  { %v6210_v51 = vor.u32 %v6916_v37, %v6207_v39  ;;  %3860 = vmatpush.bf16.msra.mxu0 %v4614_v42  ;;  %3840 = vmatpush.bf16.msrb.mxu2 %v5954_v47  ;;  %v6489_v36 = vld [vmem:[#allocation8 + $0xac] sm:$0xf0]  ;;  %v3622_v37 = vadd.f32 %v3621_v26, %v3609_v25  ;;  %v5062_v39 = vor.u32 %v6633_v24, %v5061_v22  ;;  %v7294_v23 = vld [vmem:[#allocation11] sm:$0xff]  ;;  %v4275_v24 = vmax.f32 %v7285_v15, 0.0 }
 0x1b2   :  { %v5318_v42 = vor.u32 %v6697_v30, %v5317_v28  ;;  %v5029_v43 = vld [vmem:[#allocation8 + $0x4d0] sm:$0xf]  ;;  %v4486_v31 = vor.u32 %v6489_v36, %v4485_v34  ;;  %v4286_v25 = vperm.slane %v7294_v23, 1 }
 0x1b3   :  { %3873 = vmatpush.bf16.msra.mxu1 %v4870_v46  ;;  %3853 = vmatpush.bf16.msrb.mxu3 %v6210_v51  ;;  %v6625_v44 = vld [vmem:[#allocation8 + $0x4ec] sm:$0xf0]  ;;  %v3635_v18 = vadd.f32 %v3634_v11, %v3622_v37 }
 0x1b4   :  { %3841 = vmatmul.bf16.vlgmr.msrb.gmra.mxu2 %v7255_v40  ;;  %v5285_v46 = vld [vmem:[#allocation8 + $0x6d0] sm:$0xf] }
 0x1b5   :  { %3885 = vmatpush.bf16.msra.mxu2 %v5158_v52  ;;  %3861 = vmatpush.bf16.msra.mxu0 %v4582_v59  ;;  %v6689_v47 = vld [vmem:[#allocation8 + $0x6ec] sm:$0xf0]  ;;  %v5030_v52 = vor.u32 %v6625_v44, %v5029_v43  ;;  %v3623_v59 = vpop.f32.mrf.mxu1 }
 0x1b6   :  { %3854 = vmatmul.bf16.vlgmr.msrb.gmra.mxu3 %v7257_v45  ;;  %v4453_v49 = vld [vmem:[#allocation8 + $0x50] sm:$0xf] }
 0x1b7   :  { %3898 = vmatpush.bf16.msra.mxu3 %v5414_v56  ;;  %3874 = vmatpush.bf16.msra.mxu1 %v4838_v62  ;;  %v6481_v51 = vld [vmem:[#allocation8 + $0x6c] sm:$0xf0]  ;;  %v5286_v56 = vor.u32 %v6689_v47, %v5285_v46 }
 0x1b8   :  { %v4709_v53 = vld [vmem:[#allocation8 + $0x250] sm:$0xf]  ;;  %v4454_v60 = vor.u32 %v6481_v51, %v4453_v49 }
 0x1b9   :  { %3886 = vmatpush.bf16.msra.mxu2 %v5126_v2  ;;  %3862 = vmatpush.bf16.msra.mxu0 %v4550_v10  ;;  %v6545_v54 = vld [vmem:[#allocation8 + $0x26c] sm:$0xf0] }
 0x1ba   :  { %v4997_v57 = vld [vmem:[#allocation8 + $0x490] sm:$0xf]  ;;  %v4710_v1 = vor.u32 %v6545_v54, %v4709_v53 }
 0x1bb   :  { %3899 = vmatpush.bf16.msra.mxu3 %v5382_v6  ;;  %3875 = vmatpush.bf16.msra.mxu1 %v4806_v14  ;;  %v6617_v58 = vld [vmem:[#allocation8 + $0x4ac] sm:$0xf0] }
 0x1bc   :  { %v5253_v61 = vld [vmem:[#allocation8 + $0x690] sm:$0xf]  ;;  %v4998_v6 = vor.u32 %v6617_v58, %v4997_v57  ;;  %v3636_v57 = vpop.f32.mrf.mxu2 }
 0x1bd   :  { %3887 = vmatpush.bf16.msra.mxu2 %v5094_v50  ;;  %3863 = vmatpush.bf16.msra.mxu0 %v4518_v27  ;;  %v6681_v62 = vld [vmem:[#allocation8 + $0x6ac] sm:$0xf0]  ;;  %v4285_v50 = vperm.slane %v7294_v23, 0 }
 0x1be   :  { %v4421_v63 = vld [vmem:[#allocation8 + $0x10] sm:$0xf]  ;;  %v5254_v12 = vor.u32 %v6681_v62, %v5253_v61 }
 0x1bf   :  { %3900 = vmatpush.bf16.msra.mxu3 %v5350_v21  ;;  %3876 = vmatpush.bf16.msra.mxu1 %v4774_v33  ;;  %v6473_v2 = vld [vmem:[#allocation8 + $0x2c] sm:$0xf0]  ;;  %v3648_v33 = vadd.f32 %v3647_v19, %v3635_v18  ;;  %v4301_v47 = vmul.f32 %v4285_v50, %v4275_v24  ;;  %v869_v19 = vperm.slane %v7273_v38, 2  ;;  %v3673_v38 = vpop.f32.mrf.mxu1 }
 0x1c0   :  { %v4677_v3 = vld [vmem:[#allocation8 + $0x210] sm:$0xf]  ;;  %v4422_v20 = vor.u32 %v6473_v2, %v4421_v63  ;;  %v3649_v63 = vpop.f32.mrf.mxu3 }
 0x1c1   :  { %3888 = vmatpush.bf16.msra.mxu2 %v5062_v39  ;;  %3864 = vmatpush.bf16.msra.mxu0 %v4486_v31  ;;  %v6537_v4 = vld [vmem:[#allocation8 + $0x22c] sm:$0xf0]  ;;  %v4276_v15 = vmax.f32 %v3648_v33, 0.0  ;;  %v3660_v33 = vpop.f32.mrf.mxu0 }
 0x1c2   :  { %v5669_v8 = vld [vmem:[#allocation8 + $0x9d0] sm:$0xf]  ;;  %v4678_v26 = vor.u32 %v6537_v4, %v4677_v3 }
 0x1c3   :  { %3901 = vmatpush.bf16.msra.mxu3 %v5318_v42  ;;  %3877 = vmatpush.bf16.msra.mxu1 %v4742_v48  ;;  %v6785_v9 = vld [vmem:[#allocation8 + $0x9ec] sm:$0xf0] }
 0x1c4   :  { %v5925_v10 = vld [vmem:[#allocation8 + $0xbd0] sm:$0xf]  ;;  %v5670_v27 = vor.u32 %v6785_v9, %v5669_v8 }
 0x1c5   :  { %3889 = vmatpush.bf16.msra.mxu2 %v5030_v52  ;;  %v6849_v14 = vld [vmem:[#allocation8 + $0xbec] sm:$0xf0]  ;;  %3865 = vmatpush.bf16.msra.mxu0 %v4454_v60  ;;  %v4302_v52 = vmul.f32 %v4286_v25, %v4276_v15 }
 0x1c6   :  { %v4965_v16 = vld [vmem:[#allocation8 + $0x450] sm:$0xf]  ;;  %v5926_v34 = vor.u32 %v6849_v14, %v5925_v10 }
 0x1c7   :  { %3902 = vmatpush.bf16.msra.mxu3 %v5286_v56  ;;  %v6609_v17 = vld [vmem:[#allocation8 + $0x46c] sm:$0xf0]  ;;  %3878 = vmatpush.bf16.msra.mxu1 %v4710_v1  ;;  %v7300_v62 = vadd.f32 %v4302_v52, %v4301_v47 }
 0x1c8   :  { %v5221_v21 = vld [vmem:[#allocation8 + $0x650] sm:$0xf]  ;;  %v4966_v36 = vor.u32 %v6609_v17, %v4965_v16 }
 0x1c9   :  { %v6673_v22 = vld [vmem:[#allocation8 + $0x66c] sm:$0xf0]  ;;  %3890 = vmatpush.bf16.msra.mxu2 %v4998_v6  ;;  %3866 = vmatpush.bf16.msra.mxu0 %v4422_v20  ;;  %v3662_v63 = vpop.f32.mrf.mxu0 }
 0x1ca   :  { %v5637_v28 = vld [vmem:[#allocation8 + $0x990] sm:$0xf]  ;;  %v5222_v41 = vor.u32 %v6673_v22, %v5221_v21  ;;  %v4839_v63 = vld [vmem:[#allocation8 + $0x370] sm:$0xf0] }
 0x1cb   :  { %v6777_v30 = vld [vmem:[#allocation8 + $0x9ac] sm:$0xf0]  ;;  %3903 = vmatpush.bf16.msra.mxu3 %v5254_v12  ;;  %3879 = vmatpush.bf16.msra.mxu1 %v4678_v26 }
 0x1cc   :  { %v5893_v39 = vld [vmem:[#allocation8 + $0xb90] sm:$0xf]  ;;  %v5638_v48 = vor.u32 %v6777_v30, %v5637_v28  ;;  %3867 = vmatmul.bf16.vlgmr.msra.gmra.mxu0 %v7232_v0 }
 0x1cd   :  { %v6841_v37 = vld [vmem:[#allocation8 + $0xbac] sm:$0xf0]  ;;  %3911 = vmatpush.bf16.msrb.mxu0 %v5670_v27  ;;  %3891 = vmatpush.bf16.msra.mxu2 %v4966_v36 }
 0x1ce   :  { %v4933_v32 = vld [vmem:[#allocation8 + $0x410] sm:$0xf]  ;;  %v5894_v53 = vor.u32 %v6841_v37, %v5893_v39  ;;  %3880 = vmatmul.bf16.vlgmr.msra.gmra.mxu1 %v7235_v5  ;;  %v3661_v37 = vadd.f32 %v3660_v33, %v869_v19  ;;  %v6589_v19 = vld [vmem:[#allocation8 + $0x3d4] sm:$0xf] }
 0x1cf   :  { %v6601_v42 = vld [vmem:[#allocation8 + $0x42c] sm:$0xf0]  ;;  %3924 = vmatpush.bf16.msrb.mxu1 %v5926_v34  ;;  %3904 = vmatpush.bf16.msra.mxu3 %v5222_v41 }
 0x1d0   :  { %v5189_v43 = vld [vmem:[#allocation8 + $0x610] sm:$0xf]  ;;  %v4934_v54 = vor.u32 %v6601_v42, %v4933_v32 }
 0x1d1   :  { %v6665_v44 = vld [vmem:[#allocation8 + $0x62c] sm:$0xf0]  ;;  %3912 = vmatpush.bf16.msrb.mxu0 %v5638_v48 }
 0x1d2   :  { %v6181_v31 = vld [vmem:[#allocation8 + $0xdd0] sm:$0xf]  ;;  %v5190_v58 = vor.u32 %v6665_v44, %v5189_v43  ;;  %3892 = vmatpush.bf16.msra.mxu2 %v4934_v54 }
 0x1d3   :  { %v6913_v46 = vld [vmem:[#allocation8 + $0xdec] sm:$0xf0]  ;;  %3925 = vmatpush.bf16.msrb.mxu1 %v5894_v53 }
 0x1d4   :  { %v6437_v49 = vld [vmem:[#allocation8 + $0xfd0] sm:$0xf]  ;;  %v6182_v59 = vor.u32 %v6913_v46, %v6181_v31  ;;  %3905 = vmatpush.bf16.msra.mxu3 %v5190_v58  ;;  %v3674_v31 = vadd.f32 %v3673_v38, %v3661_v37 }
 0x1d5   :  { %v6977_v51 = vld [vmem:[#allocation8 + $0xfec] sm:$0xf0]  ;;  %3893 = vmatmul.bf16.vlgmr.msra.gmra.mxu2 %v7240_v29 }
 0x1d6   :  { %v5605_v55 = vld [vmem:[#allocation8 + $0x950] sm:$0xf]  ;;  %v6438_v1 = vor.u32 %v6977_v51, %v6437_v49  ;;  %3937 = vmatpush.bf16.msrb.mxu2 %v6182_v59 }
 0x1d7   :  { %v6769_v56 = vld [vmem:[#allocation8 + $0x96c] sm:$0xf0]  ;;  %3906 = vmatmul.bf16.vlgmr.msra.gmra.mxu3 %v7242_v35 }
 0x1d8   :  { %v5861_v60 = vld [vmem:[#allocation8 + $0xb50] sm:$0xf]  ;;  %v5606_v4 = vor.u32 %v6769_v56, %v5605_v55  ;;  %3950 = vmatpush.bf16.msrb.mxu3 %v6438_v1 }
 0x1d9   :  { %v6833_v61 = vld [vmem:[#allocation8 + $0xb6c] sm:$0xf0] }
 0x1da   :  { %v6149_v2 = vld [vmem:[#allocation8 + $0xd90] sm:$0xf]  ;;  %v5862_v9 = vor.u32 %v6833_v61, %v5861_v60  ;;  %3913 = vmatpush.bf16.msrb.mxu0 %v5606_v4  ;;  %v3675_v4 = vpop.f32.mrf.mxu1 }
 0x1db   :  { %v6905_v3 = vld [vmem:[#allocation8 + $0xdac] sm:$0xf0]  ;;  %v5127_v4 = vld [vmem:[#allocation8 + $0x5b0] sm:$0xf0] }
 0x1dc   :  { %v6405_v6 = vld [vmem:[#allocation8 + $0xf90] sm:$0xf]  ;;  %v6150_v12 = vor.u32 %v6905_v3, %v6149_v2  ;;  %3926 = vmatpush.bf16.msrb.mxu1 %v5862_v9 }
 0x1dd   :  { %v6969_v8 = vld [vmem:[#allocation8 + $0xfac] sm:$0xf0] }
 0x1de   :  { %v5573_v10 = vld [vmem:[#allocation8 + $0x910] sm:$0xf]  ;;  %v6406_v17 = vor.u32 %v6969_v8, %v6405_v6  ;;  %3938 = vmatpush.bf16.msrb.mxu2 %v6150_v12 }
 0x1df   :  { %v6761_v11 = vld [vmem:[#allocation8 + $0x92c] sm:$0xf0] }
 0x1e0   :  { %v5829_v14 = vld [vmem:[#allocation8 + $0xb10] sm:$0xf]  ;;  %v5574_v20 = vor.u32 %v6761_v11, %v5573_v10  ;;  %3951 = vmatpush.bf16.msrb.mxu3 %v6406_v17 }
 0x1e1   :  { %v6825_v16 = vld [vmem:[#allocation8 + $0xb2c] sm:$0xf0] }
 0x1e2   :  { %v6117_v50 = vld [vmem:[#allocation8 + $0xd50] sm:$0xf]  ;;  %v5830_v24 = vor.u32 %v6825_v16, %v5829_v14  ;;  %3914 = vmatpush.bf16.msrb.mxu0 %v5574_v20  ;;  %v3686_v20 = vpop.f32.mrf.mxu2 }
 0x1e3   :  { %v6897_v18 = vld [vmem:[#allocation8 + $0xd6c] sm:$0xf0] }
 0x1e4   :  { %v6373_v21 = vld [vmem:[#allocation8 + $0xf50] sm:$0xf]  ;;  %v6118_v27 = vor.u32 %v6897_v18, %v6117_v50  ;;  %3927 = vmatpush.bf16.msrb.mxu1 %v5830_v24  ;;  %v6525_v50 = vld [vmem:[#allocation8 + $0x1d4] sm:$0xf] }
 0x1e5   :  { %v6961_v22 = vld [vmem:[#allocation8 + $0xf6c] sm:$0xf0]  ;;  %v4647_v18 = vld [vmem:[#allocation8 + $0x1f0] sm:$0xf0] }
 0x1e6   :  { %v5541_v25 = vld [vmem:[#allocation8 + $0x8d0] sm:$0xf]  ;;  %v6374_v34 = vor.u32 %v6961_v22, %v6373_v21  ;;  %3939 = vmatpush.bf16.msrb.mxu2 %v6118_v27  ;;  %v4903_v22 = vld [vmem:[#allocation8 + $0x3f0] sm:$0xf0]  ;;  %v3699_v27 = vpop.f32.mrf.mxu3 }
 0x1e7   :  { %v6753_v26 = vld [vmem:[#allocation8 + $0x8ec] sm:$0xf0]  ;;  %v4906_v38 = vor.u32 %v6589_v19, %v4903_v22  ;;  %v5095_v19 = vld [vmem:[#allocation8 + $0x570] sm:$0xf0] }
 0x1e8   :  { %v5797_v28 = vld [vmem:[#allocation8 + $0xad0] sm:$0xf]  ;;  %v5542_v32 = vor.u32 %v6753_v26, %v5541_v25  ;;  %3952 = vmatpush.bf16.msrb.mxu3 %v6374_v34  ;;  %v3687_v26 = vadd.f32 %v3686_v20, %v3674_v31  ;;  %v5351_v22 = vld [vmem:[#allocation8 + $0x770] sm:$0xf0] }
 0x1e9   :  { %v6817_v30 = vld [vmem:[#allocation8 + $0xaec] sm:$0xf0] }
 0x1ea   :  { %v6085_v36 = vld [vmem:[#allocation8 + $0xd10] sm:$0xf]  ;;  %v5798_v43 = vor.u32 %v6817_v30, %v5797_v28  ;;  %3915 = vmatpush.bf16.msrb.mxu0 %v5542_v32  ;;  %v7306_v37 = vadd.f32 %v3699_v27, %v3687_v26  ;;  %v4519_v26 = vld [vmem:[#allocation8 + $0xf0] sm:$0xf0] }
 0x1eb   :  { %v6889_v39 = vld [vmem:[#allocation8 + $0xd2c] sm:$0xf0] }
 0x1ec   :  { %v6341_v41 = vld [vmem:[#allocation8 + $0xf10] sm:$0xf]  ;;  %v6086_v46 = vor.u32 %v6889_v39, %v6085_v36  ;;  %3928 = vmatpush.bf16.msrb.mxu1 %v5798_v43  ;;  %v4650_v36 = vor.u32 %v6525_v50, %v4647_v18  ;;  %v6517_v39 = vld [vmem:[#allocation8 + $0x194] sm:$0xf] }
 0x1ed   :  { %v6953_v42 = vld [vmem:[#allocation8 + $0xf2c] sm:$0xf0]  ;;  %v4871_v43 = vld [vmem:[#allocation8 + $0x3b0] sm:$0xf0] }
 0x1ee   :  { %v5509_v44 = vld [vmem:[#allocation8 + $0x890] sm:$0xf]  ;;  %v6342_v49 = vor.u32 %v6953_v42, %v6341_v41  ;;  %3940 = vmatpush.bf16.msrb.mxu2 %v6086_v46  ;;  %v4615_v41 = vld [vmem:[#allocation8 + $0x1b0] sm:$0xf0] }
 0x1ef   :  { %v6745_v15 = vld [vmem:[#allocation8 + $0x8ac] sm:$0xf0]  ;;  %v6581_v42 = vld [vmem:[#allocation8 + $0x394] sm:$0xf] }
 0x1f0   :  { %v5765_v47 = vld [vmem:[#allocation8 + $0xa90] sm:$0xf]  ;;  %v5510_v53 = vor.u32 %v6745_v15, %v5509_v44  ;;  %3953 = vmatpush.bf16.msrb.mxu3 %v6342_v49  ;;  %v5159_v49 = vld [vmem:[#allocation8 + $0x5f0] sm:$0xf0] }
 0x1f1   :  { %v6809_v48 = vld [vmem:[#allocation8 + $0xaac] sm:$0xf0]  ;;  %v6637_v18 = vld [vmem:[#allocation8 + $0x554] sm:$0xf] }
 0x1f2   :  { %v6053_v51 = vld [vmem:[#allocation8 + $0xcd0] sm:$0xf]  ;;  %v5766_v56 = vor.u32 %v6809_v48, %v5765_v47  ;;  %3916 = vmatpush.bf16.msrb.mxu0 %v5510_v53  ;;  %v6653_v48 = vld [vmem:[#allocation8 + $0x5d4] sm:$0xf]  ;;  %v5098_v27 = vor.u32 %v6637_v18, %v5095_v19 }
 0x1f3   :  { %v6881_v52 = vld [vmem:[#allocation8 + $0xcec] sm:$0xf0]  ;;  %v5415_v53 = vld [vmem:[#allocation8 + $0x7f0] sm:$0xf0] }
 0x1f4   :  { %v6309_v54 = vld [vmem:[#allocation8 + $0xed0] sm:$0xf]  ;;  %v6054_v59 = vor.u32 %v6881_v52, %v6053_v51  ;;  %3929 = vmatpush.bf16.msrb.mxu1 %v5766_v56  ;;  %v4618_v51 = vor.u32 %v6517_v39, %v4615_v41  ;;  %v6717_v52 = vld [vmem:[#allocation8 + $0x7d4] sm:$0xf] }
 0x1f5   :  { %v6945_v55 = vld [vmem:[#allocation8 + $0xeec] sm:$0xf0]  ;;  %v6509_v56 = vld [vmem:[#allocation8 + $0x154] sm:$0xf] }
 0x1f6   :  { %v5477_v57 = vld [vmem:[#allocation8 + $0x850] sm:$0xf]  ;;  %v6310_v1 = vor.u32 %v6945_v55, %v6309_v54  ;;  %3941 = vmatpush.bf16.msrb.mxu2 %v6054_v59  ;;  %v4874_v54 = vor.u32 %v6581_v42, %v4871_v43  ;;  %v5063_v39 = vld [vmem:[#allocation8 + $0x530] sm:$0xf0] }
 0x1f7   :  { %v6737_v58 = vld [vmem:[#allocation8 + $0x86c] sm:$0xf0]  ;;  %v6693_v42 = vld [vmem:[#allocation8 + $0x714] sm:$0xf] }
 0x1f8   :  { %v5733_v60 = vld [vmem:[#allocation8 + $0xa50] sm:$0xf]  ;;  %v5478_v6 = vor.u32 %v6737_v58, %v5477_v57  ;;  %3954 = vmatpush.bf16.msrb.mxu3 %v6310_v1  ;;  %v4583_v57 = vld [vmem:[#allocation8 + $0x170] sm:$0xf0]  ;;  %v3688_v58 = vpop.f32.mrf.mxu2  ;;  %v3701_v1 = vpop.f32.mrf.mxu3 }
 0x1f9   :  { %v6801_v61 = vld [vmem:[#allocation8 + $0xa6c] sm:$0xf0]  ;;  %v5319_v43 = vld [vmem:[#allocation8 + $0x730] sm:$0xf0] }
 0x1fa   :  { %v6021_v2 = vld [vmem:[#allocation8 + $0xc90] sm:$0xf]  ;;  %v5734_v11 = vor.u32 %v6801_v61, %v5733_v60  ;;  %3917 = vmatpush.bf16.msrb.mxu0 %v5478_v6  ;;  %v5162_v60 = vor.u32 %v6653_v48, %v5159_v49  ;;  %v6573_v61 = vld [vmem:[#allocation8 + $0x354] sm:$0xf]  ;;  %v4586_v6 = vor.u32 %v6509_v56, %v4583_v57 }
 0x1fb   :  { %v6873_v3 = vld [vmem:[#allocation8 + $0xcac] sm:$0xf0]  ;;  %v6549_v48 = vld [vmem:[#allocation8 + $0x294] sm:$0xf] }
 0x1fc   :  { %v6277_v8 = vld [vmem:[#allocation8 + $0xe90] sm:$0xf]  ;;  %v6022_v17 = vor.u32 %v6873_v3, %v6021_v2  ;;  %3930 = vmatpush.bf16.msrb.mxu1 %v5734_v11  ;;  %v5418_v2 = vor.u32 %v6717_v52, %v5415_v53  ;;  %v6645_v3 = vld [vmem:[#allocation8 + $0x594] sm:$0xf] }
 0x1fd   :  { %v6937_v9 = vld [vmem:[#allocation8 + $0xeac] sm:$0xf0]  ;;  %v6501_v11 = vld [vmem:[#allocation8 + $0x114] sm:$0xf] }
 0x1fe   :  { %v5445_v10 = vld [vmem:[#allocation8 + $0x810] sm:$0xf]  ;;  %v6278_v21 = vor.u32 %v6937_v9, %v6277_v8  ;;  %3942 = vmatpush.bf16.msrb.mxu2 %v6022_v17  ;;  %v6709_v8 = vld [vmem:[#allocation8 + $0x794] sm:$0xf] }
 0x1ff   :  { %v6729_v12 = vld [vmem:[#allocation8 + $0x82c] sm:$0xf0]  ;;  %v5383_v9 = vld [vmem:[#allocation8 + $0x7b0] sm:$0xf0] }
 0x200   :  { %v5701_v14 = vld [vmem:[#allocation8 + $0xa10] sm:$0xf]  ;;  %v5446_v28 = vor.u32 %v6729_v12, %v5445_v10  ;;  %3955 = vmatpush.bf16.msrb.mxu3 %v6278_v21  ;;  %v4842_v10 = vor.u32 %v6573_v61, %v4839_v63  ;;  %v4551_v12 = vld [vmem:[#allocation8 + $0x130] sm:$0xf0]  ;;  %v5386_v50 = vor.u32 %v6709_v8, %v5383_v9 }
 0x201   :  { %v6793_v16 = vld [vmem:[#allocation8 + $0xa2c] sm:$0xf0]  ;;  %v4807_v17 = vld [vmem:[#allocation8 + $0x330] sm:$0xf0]  ;;  %v4554_v20 = vor.u32 %v6501_v11, %v4551_v12 }
 0x202   :  { %v5989_v24 = vld [vmem:[#allocation8 + $0xc50] sm:$0xf]  ;;  %v5702_v34 = vor.u32 %v6793_v16, %v5701_v14  ;;  %3918 = vmatpush.bf16.msrb.mxu0 %v5446_v28  ;;  %v5130_v14 = vor.u32 %v6645_v3, %v5127_v4  ;;  %v6565_v16 = vld [vmem:[#allocation8 + $0x314] sm:$0xf] }
 0x203   :  { %v6865_v25 = vld [vmem:[#allocation8 + $0xc6c] sm:$0xf0]  ;;  %v6701_v21 = vld [vmem:[#allocation8 + $0x754] sm:$0xf] }
 0x204   :  { %v6245_v30 = vld [vmem:[#allocation8 + $0xe50] sm:$0xf]  ;;  %v5990_v32 = vor.u32 %v6865_v25, %v5989_v24  ;;  %3931 = vmatpush.bf16.msrb.mxu1 %v5702_v34  ;;  %v4810_v24 = vor.u32 %v6565_v16, %v4807_v17  ;;  %v6493_v25 = vld [vmem:[#allocation8 + $0xd4] sm:$0xf]  ;;  %v5354_v34 = vor.u32 %v6701_v21, %v5351_v22 }
 0x205   :  { %v6929_v33 = vld [vmem:[#allocation8 + $0xe6c] sm:$0xf0]  ;;  %3919 = vmatmul.bf16.vlgmr.msrb.gmra.mxu0 %v7249_v7  ;;  %v6557_v28 = vld [vmem:[#allocation8 + $0x2d4] sm:$0xf]  ;;  %v4522_v41 = vor.u32 %v6493_v25, %v4519_v26 }
 0x206   :  { %v6246_v44 = vor.u32 %v6929_v33, %v6245_v30  ;;  %v5957_v15 = vld [vmem:[#allocation8 + $0xc10] sm:$0xf]  ;;  %3963 = vmatpush.bf16.msra.mxu0 %v4650_v36  ;;  %3943 = vmatpush.bf16.msrb.mxu2 %v5990_v32  ;;  %v4775_v30 = vld [vmem:[#allocation8 + $0x2f0] sm:$0xf0]  ;;  %v3712_v33 = vpop.f32.mrf.mxu0  ;;  %v3725_v32 = vpop.f32.mrf.mxu1 }
 0x207   :  { %v6857_v31 = vld [vmem:[#allocation8 + $0xc2c] sm:$0xf0]  ;;  %3932 = vmatmul.bf16.vlgmr.msrb.gmra.mxu1 %v7251_v13  ;;  %v6629_v36 = vld [vmem:[#allocation8 + $0x514] sm:$0xf] }
 0x208   :  { %v6213_v46 = vld [vmem:[#allocation8 + $0xe10] sm:$0xf]  ;;  %3976 = vmatpush.bf16.msra.mxu1 %v4906_v38  ;;  %v5958_v55 = vor.u32 %v6857_v31, %v5957_v15  ;;  %3956 = vmatpush.bf16.msrb.mxu3 %v6246_v44  ;;  %v3713_v38 = vadd.f32 %v3712_v33, %v7306_v37  ;;  %v4778_v44 = vor.u32 %v6557_v28, %v4775_v30  ;;  %v6485_v15 = vld [vmem:[#allocation8 + $0x94] sm:$0xf] }
 0x209   :  { %v6921_v47 = vld [vmem:[#allocation8 + $0xe2c] sm:$0xf0]  ;;  %v4487_v31 = vld [vmem:[#allocation8 + $0xb0] sm:$0xf0] }
 0x20a   :  { %v6214_v59 = vor.u32 %v6921_v47, %v6213_v46  ;;  %3964 = vmatpush.bf16.msra.mxu0 %v4618_v51  ;;  %3944 = vmatpush.bf16.msrb.mxu2 %v5958_v55  ;;  %v3726_v46 = vadd.f32 %v3725_v32, %v3713_v38  ;;  %v5066_v47 = vor.u32 %v6629_v36, %v5063_v39  ;;  %v4743_v49 = vld [vmem:[#allocation8 + $0x2b0] sm:$0xf0] }
 0x20b   :  { %v5322_v51 = vor.u32 %v6693_v42, %v5319_v43  ;;  %v6621_v52 = vld [vmem:[#allocation8 + $0x4d4] sm:$0xf]  ;;  %v4490_v37 = vor.u32 %v6485_v15, %v4487_v31  ;;  %v4746_v56 = vor.u32 %v6549_v48, %v4743_v49 }
 0x20c   :  { %3977 = vmatpush.bf16.msra.mxu1 %v4874_v54  ;;  %3957 = vmatpush.bf16.msrb.mxu3 %v6214_v59  ;;  %v5031_v53 = vld [vmem:[#allocation8 + $0x4f0] sm:$0xf0] }
 0x20d   :  { %3945 = vmatmul.bf16.vlgmr.msrb.gmra.mxu2 %v7255_v40  ;;  %v6685_v54 = vld [vmem:[#allocation8 + $0x6d4] sm:$0xf]  ;;  %v5034_v59 = vor.u32 %v6621_v52, %v5031_v53 }
 0x20e   :  { %3989 = vmatpush.bf16.msra.mxu2 %v5162_v60  ;;  %3965 = vmatpush.bf16.msra.mxu0 %v4586_v6  ;;  %v5287_v55 = vld [vmem:[#allocation8 + $0x6f0] sm:$0xf0]  ;;  %v3714_v63 = vpop.f32.mrf.mxu0  ;;  %v3727_v4 = vpop.f32.mrf.mxu1 }
 0x20f   :  { %3958 = vmatmul.bf16.vlgmr.msrb.gmra.mxu3 %v7257_v45  ;;  %v6477_v57 = vld [vmem:[#allocation8 + $0x54] sm:$0xf]  ;;  %v5290_v1 = vor.u32 %v6685_v54, %v5287_v55 }
 0x210   :  { %4002 = vmatpush.bf16.msra.mxu3 %v5418_v2  ;;  %3978 = vmatpush.bf16.msra.mxu1 %v4842_v10  ;;  %v4455_v58 = vld [vmem:[#allocation8 + $0x70] sm:$0xf0] }
 0x211   :  { %v6541_v60 = vld [vmem:[#allocation8 + $0x254] sm:$0xf]  ;;  %v4458_v6 = vor.u32 %v6477_v57, %v4455_v58 }
 0x212   :  { %3990 = vmatpush.bf16.msra.mxu2 %v5130_v14  ;;  %3966 = vmatpush.bf16.msra.mxu0 %v4554_v20  ;;  %v4711_v61 = vld [vmem:[#allocation8 + $0x270] sm:$0xf0]  ;;  %v3738_v20 = vpop.f32.mrf.mxu2 }
 0x213   :  { %v6613_v2 = vld [vmem:[#allocation8 + $0x494] sm:$0xf]  ;;  %v4714_v11 = vor.u32 %v6541_v60, %v4711_v61  ;;  %v3739_v26 = vadd.f32 %v3738_v20, %v3726_v46 }
 0x214   :  { %4003 = vmatpush.bf16.msra.mxu3 %v5386_v50  ;;  %3979 = vmatpush.bf16.msra.mxu1 %v4810_v24  ;;  %v4999_v3 = vld [vmem:[#allocation8 + $0x4b0] sm:$0xf0] }
 0x215   :  { %v6677_v8 = vld [vmem:[#allocation8 + $0x694] sm:$0xf]  ;;  %v5002_v17 = vor.u32 %v6613_v2, %v4999_v3 }
 0x216   :  { %3991 = vmatpush.bf16.msra.mxu2 %v5098_v27  ;;  %3967 = vmatpush.bf16.msra.mxu0 %v4522_v41  ;;  %v5255_v9 = vld [vmem:[#allocation8 + $0x6b0] sm:$0xf0]  ;;  %v3751_v27 = vpop.f32.mrf.mxu3 }
 0x217   :  { %v6469_v10 = vld [vmem:[#allocation8 + $0x14] sm:$0xf]  ;;  %v5258_v21 = vor.u32 %v6677_v8, %v5255_v9  ;;  %v3752_v41 = vadd.f32 %v3751_v27, %v3739_v26 }
 0x218   :  { %4004 = vmatpush.bf16.msra.mxu3 %v5354_v34  ;;  %3980 = vmatpush.bf16.msra.mxu1 %v4778_v44  ;;  %v4423_v12 = vld [vmem:[#allocation8 + $0x30] sm:$0xf0]  ;;  %v4287_v34 = vperm.slane %v7294_v23, 2 }
 0x219   :  { %v6533_v14 = vld [vmem:[#allocation8 + $0x214] sm:$0xf]  ;;  %v4426_v28 = vor.u32 %v6469_v10, %v4423_v12 }
 0x21a   :  { %3992 = vmatpush.bf16.msra.mxu2 %v5066_v47  ;;  %3968 = vmatpush.bf16.msra.mxu0 %v4490_v37  ;;  %v4679_v16 = vld [vmem:[#allocation8 + $0x230] sm:$0xf0]  ;;  %v3740_v60 = vpop.f32.mrf.mxu2 }
 0x21b   :  { %v6781_v50 = vld [vmem:[#allocation8 + $0x9d4] sm:$0xf]  ;;  %v4682_v36 = vor.u32 %v6533_v14, %v4679_v16 }
 0x21c   :  { %4005 = vmatpush.bf16.msra.mxu3 %v5322_v51  ;;  %3981 = vmatpush.bf16.msra.mxu1 %v4746_v56  ;;  %v5671_v18 = vld [vmem:[#allocation8 + $0x9f0] sm:$0xf0]  ;;  %v4277_v51 = vmax.f32 %v3752_v41, 0.0 }
 0x21d   :  { %v6845_v19 = vld [vmem:[#allocation8 + $0xbd4] sm:$0xf]  ;;  %v5674_v39 = vor.u32 %v6781_v50, %v5671_v18 }
 0x21e   :  { %3993 = vmatpush.bf16.msra.mxu2 %v5034_v59  ;;  %v5927_v22 = vld [vmem:[#allocation8 + $0xbf0] sm:$0xf0]  ;;  %3969 = vmatpush.bf16.msra.mxu0 %v4458_v6  ;;  %v4303_v55 = vmul.f32 %v4287_v34, %v4277_v51  ;;  %v3753_v4 = vpop.f32.mrf.mxu3 }
 0x21f   :  { %v6605_v24 = vld [vmem:[#allocation8 + $0x454] sm:$0xf]  ;;  %v5930_v42 = vor.u32 %v6845_v19, %v5927_v22  ;;  %v7320_v22 = vld [vmem:[#allocation10] sm:$0xff] }
 0x220   :  { %4006 = vmatpush.bf16.msra.mxu3 %v5290_v1  ;;  %v4967_v25 = vld [vmem:[#allocation8 + $0x470] sm:$0xf0]  ;;  %3982 = vmatpush.bf16.msra.mxu1 %v4714_v11  ;;  %v7316_v3 = vadd.f32 %v7300_v62, %v4303_v55 }
 0x221   :  { %v6669_v30 = vld [vmem:[#allocation8 + $0x654] sm:$0xf]  ;;  %v4970_v43 = vor.u32 %v6605_v24, %v4967_v25  ;;  %v870_v24 = vperm.slane %v7320_v22, 3 }
 0x222   :  { %v5223_v33 = vld [vmem:[#allocation8 + $0x670] sm:$0xf0]  ;;  %3994 = vmatpush.bf16.msra.mxu2 %v5002_v17  ;;  %3970 = vmatpush.bf16.msra.mxu0 %v4426_v28 }
 0x223   :  { %v6773_v38 = vld [vmem:[#allocation8 + $0x994] sm:$0xf]  ;;  %v5226_v46 = vor.u32 %v6669_v30, %v5223_v33 }
 0x224   :  { %v5639_v32 = vld [vmem:[#allocation8 + $0x9b0] sm:$0xf0]  ;;  %4007 = vmatpush.bf16.msra.mxu3 %v5258_v21  ;;  %3983 = vmatpush.bf16.msra.mxu1 %v4682_v36 }
 0x225   :  { %v6837_v44 = vld [vmem:[#allocation8 + $0xb94] sm:$0xf]  ;;  %v5642_v53 = vor.u32 %v6773_v38, %v5639_v32  ;;  %3971 = vmatmul.bf16.vlgmr.msra.gmra.mxu0 %v7232_v0  ;;  %v3764_v38 = vpop.f32.mrf.mxu0 }
 0x226   :  { %v5895_v15 = vld [vmem:[#allocation8 + $0xbb0] sm:$0xf0]  ;;  %4015 = vmatpush.bf16.msrb.mxu0 %v5674_v39  ;;  %3995 = vmatpush.bf16.msra.mxu2 %v4970_v43  ;;  %v3765_v43 = vadd.f32 %v3764_v38, %v870_v24  ;;  %v4909_v24 = vld [vmem:[#allocation8 + $0x3d8] sm:$0xf] }
 0x227   :  { %v6597_v31 = vld [vmem:[#allocation8 + $0x414] sm:$0xf]  ;;  %v5898_v56 = vor.u32 %v6837_v44, %v5895_v15  ;;  %3984 = vmatmul.bf16.vlgmr.msra.gmra.mxu1 %v7235_v5  ;;  %v3777_v44 = vpop.f32.mrf.mxu1 }
 0x228   :  { %v4935_v47 = vld [vmem:[#allocation8 + $0x430] sm:$0xf0]  ;;  %4028 = vmatpush.bf16.msrb.mxu1 %v5930_v42  ;;  %4008 = vmatpush.bf16.msra.mxu3 %v5226_v46  ;;  %v3778_v51 = vadd.f32 %v3777_v44, %v3765_v43 }
 0x229   :  { %v6661_v48 = vld [vmem:[#allocation8 + $0x614] sm:$0xf]  ;;  %v4938_v57 = vor.u32 %v6597_v31, %v4935_v47 }
 0x22a   :  { %v5191_v49 = vld [vmem:[#allocation8 + $0x630] sm:$0xf0]  ;;  %4016 = vmatpush.bf16.msrb.mxu0 %v5642_v53 }
 0x22b   :  { %v6909_v23 = vld [vmem:[#allocation8 + $0xdd4] sm:$0xf]  ;;  %v5194_v61 = vor.u32 %v6661_v48, %v5191_v49  ;;  %3996 = vmatpush.bf16.msra.mxu2 %v4938_v57 }
 0x22c   :  { %v6183_v52 = vld [vmem:[#allocation8 + $0xdf0] sm:$0xf0]  ;;  %4029 = vmatpush.bf16.msrb.mxu1 %v5898_v56 }
 0x22d   :  { %v6973_v37 = vld [vmem:[#allocation8 + $0xfd4] sm:$0xf]  ;;  %v6186_v63 = vor.u32 %v6909_v23, %v6183_v52  ;;  %4009 = vmatpush.bf16.msra.mxu3 %v5194_v61  ;;  %v3766_v4 = vpop.f32.mrf.mxu0 }
 0x22e   :  { %v6439_v54 = vld [vmem:[#allocation8 + $0xff0] sm:$0xf0]  ;;  %3997 = vmatmul.bf16.vlgmr.msra.gmra.mxu2 %v7240_v29  ;;  %v6578_v4 = vld [vmem:[#allocation8 + $0x374] sm:$0xf0] }
 0x22f   :  { %v6765_v58 = vld [vmem:[#allocation8 + $0x954] sm:$0xf]  ;;  %v6442_v6 = vor.u32 %v6973_v37, %v6439_v54  ;;  %4041 = vmatpush.bf16.msrb.mxu2 %v6186_v63 }
 0x230   :  { %v5607_v59 = vld [vmem:[#allocation8 + $0x970] sm:$0xf0]  ;;  %4010 = vmatmul.bf16.vlgmr.msra.gmra.mxu3 %v7242_v35 }
 0x231   :  { %v6829_v1 = vld [vmem:[#allocation8 + $0xb54] sm:$0xf]  ;;  %v5610_v10 = vor.u32 %v6765_v58, %v5607_v59  ;;  %4054 = vmatpush.bf16.msrb.mxu3 %v6442_v6 }
 0x232   :  { %v5863_v2 = vld [vmem:[#allocation8 + $0xb70] sm:$0xf0] }
 0x233   :  { %v6901_v8 = vld [vmem:[#allocation8 + $0xd94] sm:$0xf]  ;;  %v5866_v14 = vor.u32 %v6829_v1, %v5863_v2  ;;  %4017 = vmatpush.bf16.msrb.mxu0 %v5610_v10  ;;  %v3779_v10 = vpop.f32.mrf.mxu1 }
 0x234   :  { %v6151_v9 = vld [vmem:[#allocation8 + $0xdb0] sm:$0xf0]  ;;  %v6650_v10 = vld [vmem:[#allocation8 + $0x5b4] sm:$0xf0] }
 0x235   :  { %v6965_v11 = vld [vmem:[#allocation8 + $0xf94] sm:$0xf]  ;;  %v6154_v50 = vor.u32 %v6901_v8, %v6151_v9  ;;  %4030 = vmatpush.bf16.msrb.mxu1 %v5866_v14 }
 0x236   :  { %v6407_v12 = vld [vmem:[#allocation8 + $0xfb0] sm:$0xf0] }
 0x237   :  { %v6757_v16 = vld [vmem:[#allocation8 + $0x914] sm:$0xf]  ;;  %v6410_v19 = vor.u32 %v6965_v11, %v6407_v12  ;;  %4042 = vmatpush.bf16.msrb.mxu2 %v6154_v50 }
 0x238   :  { %v5575_v17 = vld [vmem:[#allocation8 + $0x930] sm:$0xf0] }
 0x239   :  { %v6821_v62 = vld [vmem:[#allocation8 + $0xb14] sm:$0xf]  ;;  %v5578_v25 = vor.u32 %v6757_v16, %v5575_v17  ;;  %4055 = vmatpush.bf16.msrb.mxu3 %v6410_v19 }
 0x23a   :  { %v5831_v18 = vld [vmem:[#allocation8 + $0xb30] sm:$0xf0] }
 0x23b   :  { %v6893_v20 = vld [vmem:[#allocation8 + $0xd54] sm:$0xf]  ;;  %v5834_v28 = vor.u32 %v6821_v62, %v5831_v18  ;;  %4018 = vmatpush.bf16.msrb.mxu0 %v5578_v25  ;;  %v3790_v25 = vpop.f32.mrf.mxu2 }
 0x23c   :  { %v6119_v21 = vld [vmem:[#allocation8 + $0xd70] sm:$0xf0] }
 0x23d   :  { %v6957_v26 = vld [vmem:[#allocation8 + $0xf54] sm:$0xf]  ;;  %v6122_v34 = vor.u32 %v6893_v20, %v6119_v21  ;;  %4031 = vmatpush.bf16.msrb.mxu1 %v5834_v28  ;;  %v4653_v20 = vld [vmem:[#allocation8 + $0x1d8] sm:$0xf] }
 0x23e   :  { %v6375_v27 = vld [vmem:[#allocation8 + $0xf70] sm:$0xf0]  ;;  %v6530_v21 = vld [vmem:[#allocation8 + $0x1f4] sm:$0xf0] }
 0x23f   :  { %v6749_v30 = vld [vmem:[#allocation8 + $0x8d4] sm:$0xf]  ;;  %v6378_v32 = vor.u32 %v6957_v26, %v6375_v27  ;;  %4043 = vmatpush.bf16.msrb.mxu2 %v6122_v34  ;;  %v6594_v27 = vld [vmem:[#allocation8 + $0x3f4] sm:$0xf0]  ;;  %v3803_v34 = vpop.f32.mrf.mxu3 }
 0x240   :  { %v5543_v33 = vld [vmem:[#allocation8 + $0x8f0] sm:$0xf0]  ;;  %v4910_v44 = vor.u32 %v6594_v27, %v4909_v24  ;;  %v6642_v24 = vld [vmem:[#allocation8 + $0x574] sm:$0xf0] }
 0x241   :  { %v6813_v36 = vld [vmem:[#allocation8 + $0xad4] sm:$0xf]  ;;  %v5546_v15 = vor.u32 %v6749_v30, %v5543_v33  ;;  %4056 = vmatpush.bf16.msrb.mxu3 %v6378_v32  ;;  %v3791_v33 = vadd.f32 %v3790_v25, %v3778_v51  ;;  %v6706_v27 = vld [vmem:[#allocation8 + $0x774] sm:$0xf0] }
 0x242   :  { %v5799_v39 = vld [vmem:[#allocation8 + $0xaf0] sm:$0xf0] }
 0x243   :  { %v6885_v41 = vld [vmem:[#allocation8 + $0xd14] sm:$0xf]  ;;  %v5802_v47 = vor.u32 %v6813_v36, %v5799_v39  ;;  %4019 = vmatpush.bf16.msrb.mxu0 %v5546_v15  ;;  %v7324_v43 = vadd.f32 %v3803_v34, %v3791_v33  ;;  %v6498_v33 = vld [vmem:[#allocation8 + $0xf4] sm:$0xf0] }
 0x244   :  { %v6087_v42 = vld [vmem:[#allocation8 + $0xd30] sm:$0xf0] }
 0x245   :  { %v6949_v31 = vld [vmem:[#allocation8 + $0xf14] sm:$0xf]  ;;  %v6090_v23 = vor.u32 %v6885_v41, %v6087_v42  ;;  %4032 = vmatpush.bf16.msrb.mxu1 %v5802_v47  ;;  %v4654_v41 = vor.u32 %v6530_v21, %v4653_v20  ;;  %v4621_v42 = vld [vmem:[#allocation8 + $0x198] sm:$0xf] }
 0x246   :  { %v6343_v46 = vld [vmem:[#allocation8 + $0xf30] sm:$0xf0]  ;;  %v6586_v47 = vld [vmem:[#allocation8 + $0x3b4] sm:$0xf0] }
 0x247   :  { %v6741_v48 = vld [vmem:[#allocation8 + $0x894] sm:$0xf]  ;;  %v6346_v37 = vor.u32 %v6949_v31, %v6343_v46  ;;  %4044 = vmatpush.bf16.msrb.mxu2 %v6090_v23  ;;  %v6522_v31 = vld [vmem:[#allocation8 + $0x1b4] sm:$0xf0] }
 0x248   :  { %v5511_v49 = vld [vmem:[#allocation8 + $0x8b0] sm:$0xf0]  ;;  %v4877_v46 = vld [vmem:[#allocation8 + $0x398] sm:$0xf] }
 0x249   :  { %v6805_v52 = vld [vmem:[#allocation8 + $0xa94] sm:$0xf]  ;;  %v5514_v56 = vor.u32 %v6741_v48, %v5511_v49  ;;  %4057 = vmatpush.bf16.msrb.mxu3 %v6346_v37  ;;  %v6658_v37 = vld [vmem:[#allocation8 + $0x5f4] sm:$0xf0] }
 0x24a   :  { %v5767_v53 = vld [vmem:[#allocation8 + $0xab0] sm:$0xf0]  ;;  %v5101_v21 = vld [vmem:[#allocation8 + $0x558] sm:$0xf] }
 0x24b   :  { %v6877_v54 = vld [vmem:[#allocation8 + $0xcd4] sm:$0xf]  ;;  %v5770_v59 = vor.u32 %v6805_v52, %v5767_v53  ;;  %4020 = vmatpush.bf16.msrb.mxu0 %v5514_v56  ;;  %v5165_v53 = vld [vmem:[#allocation8 + $0x5d8] sm:$0xf]  ;;  %v5102_v34 = vor.u32 %v6642_v24, %v5101_v21 }
 0x24c   :  { %v6055_v55 = vld [vmem:[#allocation8 + $0xcf0] sm:$0xf0]  ;;  %v6722_v56 = vld [vmem:[#allocation8 + $0x7f4] sm:$0xf0] }
 0x24d   :  { %v6941_v57 = vld [vmem:[#allocation8 + $0xed4] sm:$0xf]  ;;  %v6058_v63 = vor.u32 %v6877_v54, %v6055_v55  ;;  %4033 = vmatpush.bf16.msrb.mxu1 %v5770_v59  ;;  %v4622_v54 = vor.u32 %v6522_v31, %v4621_v42  ;;  %v5421_v55 = vld [vmem:[#allocation8 + $0x7d8] sm:$0xf] }
 0x24e   :  { %v6311_v58 = vld [vmem:[#allocation8 + $0xef0] sm:$0xf0]  ;;  %v4589_v59 = vld [vmem:[#allocation8 + $0x158] sm:$0xf] }
 0x24f   :  { %v6733_v60 = vld [vmem:[#allocation8 + $0x854] sm:$0xf]  ;;  %v6314_v6 = vor.u32 %v6941_v57, %v6311_v58  ;;  %4045 = vmatpush.bf16.msrb.mxu2 %v6058_v63  ;;  %v4878_v57 = vor.u32 %v6586_v47, %v4877_v46  ;;  %v6634_v42 = vld [vmem:[#allocation8 + $0x534] sm:$0xf0] }
 0x250   :  { %v5479_v61 = vld [vmem:[#allocation8 + $0x870] sm:$0xf0]  ;;  %v5325_v46 = vld [vmem:[#allocation8 + $0x718] sm:$0xf] }
 0x251   :  { %v6797_v1 = vld [vmem:[#allocation8 + $0xa54] sm:$0xf]  ;;  %v5482_v11 = vor.u32 %v6733_v60, %v5479_v61  ;;  %4058 = vmatpush.bf16.msrb.mxu3 %v6314_v6  ;;  %v6514_v60 = vld [vmem:[#allocation8 + $0x174] sm:$0xf0]  ;;  %v3792_v61 = vpop.f32.mrf.mxu2  ;;  %v3805_v6 = vpop.f32.mrf.mxu3 }
 0x252   :  { %v5735_v2 = vld [vmem:[#allocation8 + $0xa70] sm:$0xf0]  ;;  %v6698_v47 = vld [vmem:[#allocation8 + $0x734] sm:$0xf0] }
 0x253   :  { %v6869_v8 = vld [vmem:[#allocation8 + $0xc94] sm:$0xf]  ;;  %v5738_v17 = vor.u32 %v6797_v1, %v5735_v2  ;;  %4021 = vmatpush.bf16.msrb.mxu0 %v5482_v11  ;;  %v5166_v1 = vor.u32 %v6658_v37, %v5165_v53  ;;  %v4845_v2 = vld [vmem:[#allocation8 + $0x358] sm:$0xf]  ;;  %v4590_v11 = vor.u32 %v6514_v60, %v4589_v59 }
 0x254   :  { %v6023_v9 = vld [vmem:[#allocation8 + $0xcb0] sm:$0xf0]  ;;  %v4749_v53 = vld [vmem:[#allocation8 + $0x298] sm:$0xf] }
 0x255   :  { %v6933_v12 = vld [vmem:[#allocation8 + $0xe94] sm:$0xf]  ;;  %v6026_v19 = vor.u32 %v6869_v8, %v6023_v9  ;;  %4034 = vmatpush.bf16.msrb.mxu1 %v5738_v17  ;;  %v5422_v8 = vor.u32 %v6722_v56, %v5421_v55  ;;  %v5133_v9 = vld [vmem:[#allocation8 + $0x598] sm:$0xf] }
 0x256   :  { %v6279_v14 = vld [vmem:[#allocation8 + $0xeb0] sm:$0xf0]  ;;  %v4557_v17 = vld [vmem:[#allocation8 + $0x118] sm:$0xf] }
 0x257   :  { %v6725_v16 = vld [vmem:[#allocation8 + $0x814] sm:$0xf]  ;;  %v6282_v26 = vor.u32 %v6933_v12, %v6279_v14  ;;  %4046 = vmatpush.bf16.msrb.mxu2 %v6026_v19  ;;  %v5389_v12 = vld [vmem:[#allocation8 + $0x798] sm:$0xf] }
 0x258   :  { %v5447_v50 = vld [vmem:[#allocation8 + $0x830] sm:$0xf0]  ;;  %v6714_v14 = vld [vmem:[#allocation8 + $0x7b4] sm:$0xf0] }
 0x259   :  { %v6789_v62 = vld [vmem:[#allocation8 + $0xa14] sm:$0xf]  ;;  %v5450_v36 = vor.u32 %v6725_v16, %v5447_v50  ;;  %4059 = vmatpush.bf16.msrb.mxu3 %v6282_v26  ;;  %v4846_v16 = vor.u32 %v6578_v4, %v4845_v2  ;;  %v6506_v50 = vld [vmem:[#allocation8 + $0x134] sm:$0xf0]  ;;  %v5390_v20 = vor.u32 %v6714_v14, %v5389_v12 }
 0x25a   :  { %v5703_v18 = vld [vmem:[#allocation8 + $0xa30] sm:$0xf0]  ;;  %v6570_v19 = vld [vmem:[#allocation8 + $0x334] sm:$0xf0]  ;;  %v4558_v25 = vor.u32 %v6506_v50, %v4557_v17 }
 0x25b   :  { %v6861_v28 = vld [vmem:[#allocation8 + $0xc54] sm:$0xf]  ;;  %v5706_v32 = vor.u32 %v6789_v62, %v5703_v18  ;;  %4022 = vmatpush.bf16.msrb.mxu0 %v5450_v36  ;;  %v5134_v62 = vor.u32 %v6650_v10, %v5133_v9  ;;  %v4813_v18 = vld [vmem:[#allocation8 + $0x318] sm:$0xf] }
 0x25c   :  { %v5991_v30 = vld [vmem:[#allocation8 + $0xc70] sm:$0xf0]  ;;  %v5357_v26 = vld [vmem:[#allocation8 + $0x758] sm:$0xf] }
 0x25d   :  { %v6925_v39 = vld [vmem:[#allocation8 + $0xe54] sm:$0xf]  ;;  %v5994_v15 = vor.u32 %v6861_v28, %v5991_v30  ;;  %4035 = vmatpush.bf16.msrb.mxu1 %v5706_v32  ;;  %v4814_v28 = vor.u32 %v6570_v19, %v4813_v18  ;;  %v4525_v30 = vld [vmem:[#allocation8 + $0xd8] sm:$0xf]  ;;  %v5358_v32 = vor.u32 %v6706_v27, %v5357_v26 }
 0x25e   :  { %v6247_v38 = vld [vmem:[#allocation8 + $0xe70] sm:$0xf0]  ;;  %4023 = vmatmul.bf16.vlgmr.msrb.gmra.mxu0 %v7249_v7  ;;  %v4781_v36 = vld [vmem:[#allocation8 + $0x2d8] sm:$0xf]  ;;  %v4526_v31 = vor.u32 %v6498_v33, %v4525_v30 }
 0x25f   :  { %v6250_v48 = vor.u32 %v6925_v39, %v6247_v38  ;;  %v6853_v49 = vld [vmem:[#allocation8 + $0xc14] sm:$0xf]  ;;  %4067 = vmatpush.bf16.msra.mxu0 %v4654_v41  ;;  %4047 = vmatpush.bf16.msrb.mxu2 %v5994_v15  ;;  %v6562_v39 = vld [vmem:[#allocation8 + $0x2f4] sm:$0xf0]  ;;  %v3816_v38 = vpop.f32.mrf.mxu0  ;;  %v3829_v15 = vpop.f32.mrf.mxu1 }
 0x260   :  { %v5959_v51 = vld [vmem:[#allocation8 + $0xc30] sm:$0xf0]  ;;  %4036 = vmatmul.bf16.vlgmr.msrb.gmra.mxu1 %v7251_v13  ;;  %v5069_v41 = vld [vmem:[#allocation8 + $0x518] sm:$0xf] }
 0x261   :  { %v6917_v23 = vld [vmem:[#allocation8 + $0xe14] sm:$0xf]  ;;  %4080 = vmatpush.bf16.msra.mxu1 %v4910_v44  ;;  %v5962_v58 = vor.u32 %v6853_v49, %v5959_v51  ;;  %4060 = vmatpush.bf16.msrb.mxu3 %v6250_v48  ;;  %v3817_v44 = vadd.f32 %v3816_v38, %v7324_v43  ;;  %v4782_v48 = vor.u32 %v6562_v39, %v4781_v36  ;;  %v4493_v49 = vld [vmem:[#allocation8 + $0x98] sm:$0xf] }
 0x262   :  { %v6215_v52 = vld [vmem:[#allocation8 + $0xe30] sm:$0xf0]  ;;  %v6490_v51 = vld [vmem:[#allocation8 + $0xb4] sm:$0xf0] }
 0x263   :  { %v6218_v63 = vor.u32 %v6917_v23, %v6215_v52  ;;  %4068 = vmatpush.bf16.msra.mxu0 %v4622_v54  ;;  %4048 = vmatpush.bf16.msrb.mxu2 %v5962_v58  ;;  %v3830_v23 = vadd.f32 %v3829_v15, %v3817_v44  ;;  %v5070_v52 = vor.u32 %v6634_v42, %v5069_v41  ;;  %v6554_v37 = vld [vmem:[#allocation8 + $0x2b4] sm:$0xf0] }
 0x264   :  { %v5326_v54 = vor.u32 %v6698_v47, %v5325_v46  ;;  %v5037_v55 = vld [vmem:[#allocation8 + $0x4d8] sm:$0xf]  ;;  %v4494_v43 = vor.u32 %v6490_v51, %v4493_v49  ;;  %v4750_v59 = vor.u32 %v6554_v37, %v4749_v53 }
 0x265   :  { %4081 = vmatpush.bf16.msra.mxu1 %v4878_v57  ;;  %4061 = vmatpush.bf16.msrb.mxu3 %v6218_v63  ;;  %v6626_v56 = vld [vmem:[#allocation8 + $0x4f4] sm:$0xf0] }
 0x266   :  { %4049 = vmatmul.bf16.vlgmr.msrb.gmra.mxu2 %v7255_v40  ;;  %v5293_v57 = vld [vmem:[#allocation8 + $0x6d8] sm:$0xf]  ;;  %v5038_v63 = vor.u32 %v6626_v56, %v5037_v55 }
 0x267   :  { %4093 = vmatpush.bf16.msra.mxu2 %v5166_v1  ;;  %4069 = vmatpush.bf16.msra.mxu0 %v4590_v11  ;;  %v6690_v58 = vld [vmem:[#allocation8 + $0x6f4] sm:$0xf0]  ;;  %v3818_v4 = vpop.f32.mrf.mxu0  ;;  %v3831_v10 = vpop.f32.mrf.mxu1 }
 0x268   :  { %4062 = vmatmul.bf16.vlgmr.msrb.gmra.mxu3 %v7257_v45  ;;  %v4461_v60 = vld [vmem:[#allocation8 + $0x58] sm:$0xf]  ;;  %v5294_v6 = vor.u32 %v6690_v58, %v5293_v57 }
 0x269   :  { %4106 = vmatpush.bf16.msra.mxu3 %v5422_v8  ;;  %4082 = vmatpush.bf16.msra.mxu1 %v4846_v16  ;;  %v6482_v61 = vld [vmem:[#allocation8 + $0x74] sm:$0xf0] }
 0x26a   :  { %v4717_v1 = vld [vmem:[#allocation8 + $0x258] sm:$0xf]  ;;  %v4462_v11 = vor.u32 %v6482_v61, %v4461_v60 }
 0x26b   :  { %4094 = vmatpush.bf16.msra.mxu2 %v5134_v62  ;;  %4070 = vmatpush.bf16.msra.mxu0 %v4558_v25  ;;  %v6546_v2 = vld [vmem:[#allocation8 + $0x274] sm:$0xf0]  ;;  %v3842_v25 = vpop.f32.mrf.mxu2 }
 0x26c   :  { %v5005_v8 = vld [vmem:[#allocation8 + $0x498] sm:$0xf]  ;;  %v4718_v17 = vor.u32 %v6546_v2, %v4717_v1  ;;  %v3843_v33 = vadd.f32 %v3842_v25, %v3830_v23 }
 0x26d   :  { %4107 = vmatpush.bf16.msra.mxu3 %v5390_v20  ;;  %4083 = vmatpush.bf16.msra.mxu1 %v4814_v28  ;;  %v6618_v9 = vld [vmem:[#allocation8 + $0x4b4] sm:$0xf0] }
 0x26e   :  { %v5261_v12 = vld [vmem:[#allocation8 + $0x698] sm:$0xf]  ;;  %v5006_v19 = vor.u32 %v6618_v9, %v5005_v8 }
 0x26f   :  { %4095 = vmatpush.bf16.msra.mxu2 %v5102_v34  ;;  %4071 = vmatpush.bf16.msra.mxu0 %v4526_v31  ;;  %v6682_v14 = vld [vmem:[#allocation8 + $0x6b4] sm:$0xf0]  ;;  %v3855_v34 = vpop.f32.mrf.mxu3 }
 0x270   :  { %v4429_v16 = vld [vmem:[#allocation8 + $0x18] sm:$0xf]  ;;  %v5262_v26 = vor.u32 %v6682_v14, %v5261_v12  ;;  %v3856_v46 = vadd.f32 %v3855_v34, %v3843_v33 }
 0x271   :  { %4108 = vmatpush.bf16.msra.mxu3 %v5358_v32  ;;  %4084 = vmatpush.bf16.msra.mxu1 %v4782_v48  ;;  %v6474_v50 = vld [vmem:[#allocation8 + $0x34] sm:$0xf0]  ;;  %v7331_v32 = vld [vmem:[#allocation11] sm:$0xff] }
 0x272   :  { %v4685_v62 = vld [vmem:[#allocation8 + $0x218] sm:$0xf]  ;;  %v4430_v36 = vor.u32 %v6474_v50, %v4429_v16  ;;  %v4288_v41 = vperm.slane %v7331_v32, 3  ;;  %v4278_v55 = vmax.f32 %v3856_v46, 0.0 }
 0x273   :  { %4096 = vmatpush.bf16.msra.mxu2 %v5070_v52  ;;  %4072 = vmatpush.bf16.msra.mxu0 %v4494_v43  ;;  %v6538_v18 = vld [vmem:[#allocation8 + $0x234] sm:$0xf0]  ;;  %v3844_v4 = vpop.f32.mrf.mxu2 }
 0x274   :  { %v5677_v20 = vld [vmem:[#allocation8 + $0x9d8] sm:$0xf]  ;;  %v4686_v42 = vor.u32 %v6538_v18, %v4685_v62  ;;  %v4304_v60 = vmul.f32 %v4288_v41, %v4278_v55 }
 0x275   :  { %4109 = vmatpush.bf16.msra.mxu3 %v5326_v54  ;;  %4085 = vmatpush.bf16.msra.mxu1 %v4750_v59  ;;  %v6786_v21 = vld [vmem:[#allocation8 + $0x9f4] sm:$0xf0] }
 0x276   :  { %v5933_v24 = vld [vmem:[#allocation8 + $0xbd8] sm:$0xf]  ;;  %v5678_v44 = vor.u32 %v6786_v21, %v5677_v20 }
 0x277   :  { %4097 = vmatpush.bf16.msra.mxu2 %v5038_v63  ;;  %v6850_v27 = vld [vmem:[#allocation8 + $0xbf4] sm:$0xf0]  ;;  %4073 = vmatpush.bf16.msra.mxu0 %v4462_v11  ;;  %v7336_v11 = vadd.f32 %v7316_v3, %v4304_v60  ;;  %v3857_v12 = vpop.f32.mrf.mxu3 }
 0x278   :  { %v4973_v28 = vld [vmem:[#allocation8 + $0x458] sm:$0xf]  ;;  %v5934_v47 = vor.u32 %v6850_v27, %v5933_v24 }
 0x279   :  { %4110 = vmatpush.bf16.msra.mxu3 %v5294_v6  ;;  %v6610_v30 = vld [vmem:[#allocation8 + $0x474] sm:$0xf0]  ;;  %4086 = vmatpush.bf16.msra.mxu1 %v4718_v17 }
 0x27a   :  { %v5229_v39 = vld [vmem:[#allocation8 + $0x658] sm:$0xf]  ;;  %v4974_v48 = vor.u32 %v6610_v30, %v4973_v28  ;;  %v871_v30 = vperm.slane %v7320_v22, 4  ;;  %v3881_v22 = vpop.f32.mrf.mxu1 }
 0x27b   :  { %v6674_v38 = vld [vmem:[#allocation8 + $0x674] sm:$0xf0]  ;;  %4098 = vmatpush.bf16.msra.mxu2 %v5006_v19  ;;  %4074 = vmatpush.bf16.msra.mxu0 %v4430_v36 }
 0x27c   :  { %v5645_v15 = vld [vmem:[#allocation8 + $0x998] sm:$0xf]  ;;  %v5230_v52 = vor.u32 %v6674_v38, %v5229_v39 }
 0x27d   :  { %v6778_v31 = vld [vmem:[#allocation8 + $0x9b4] sm:$0xf0]  ;;  %4111 = vmatpush.bf16.msra.mxu3 %v5262_v26  ;;  %4087 = vmatpush.bf16.msra.mxu1 %v4686_v42 }
 0x27e   :  { %v5901_v49 = vld [vmem:[#allocation8 + $0xb98] sm:$0xf]  ;;  %v5646_v57 = vor.u32 %v6778_v31, %v5645_v15  ;;  %4075 = vmatmul.bf16.vlgmr.msra.gmra.mxu0 %v7232_v0  ;;  %v3868_v31 = vpop.f32.mrf.mxu0 }
 0x27f   :  { %v6842_v51 = vld [vmem:[#allocation8 + $0xbb4] sm:$0xf0]  ;;  %4119 = vmatpush.bf16.msrb.mxu0 %v5678_v44  ;;  %4099 = vmatpush.bf16.msra.mxu2 %v4974_v48 }
 0x280   :  { %v4941_v23 = vld [vmem:[#allocation8 + $0x418] sm:$0xf]  ;;  %v5902_v61 = vor.u32 %v6842_v51, %v5901_v49  ;;  %4088 = vmatmul.bf16.vlgmr.msra.gmra.mxu1 %v7235_v5  ;;  %v3869_v49 = vadd.f32 %v3868_v31, %v871_v30  ;;  %v6590_v30 = vld [vmem:[#allocation8 + $0x3dc] sm:$0xf] }
 0x281   :  { %v6602_v53 = vld [vmem:[#allocation8 + $0x434] sm:$0xf0]  ;;  %4132 = vmatpush.bf16.msrb.mxu1 %v5934_v47  ;;  %4112 = vmatpush.bf16.msra.mxu3 %v5230_v52 }
 0x282   :  { %v5197_v37 = vld [vmem:[#allocation8 + $0x618] sm:$0xf]  ;;  %v4942_v63 = vor.u32 %v6602_v53, %v4941_v23  ;;  %v3882_v55 = vadd.f32 %v3881_v22, %v3869_v49 }
 0x283   :  { %v6666_v54 = vld [vmem:[#allocation8 + $0x634] sm:$0xf0]  ;;  %4120 = vmatpush.bf16.msrb.mxu0 %v5646_v57 }
 0x284   :  { %v6189_v56 = vld [vmem:[#allocation8 + $0xdd8] sm:$0xf]  ;;  %v5198_v6 = vor.u32 %v6666_v54, %v5197_v37  ;;  %4100 = vmatpush.bf16.msra.mxu2 %v4942_v63 }
 0x285   :  { %v6914_v43 = vld [vmem:[#allocation8 + $0xdf4] sm:$0xf0]  ;;  %4133 = vmatpush.bf16.msrb.mxu1 %v5902_v61 }
 0x286   :  { %v6445_v58 = vld [vmem:[#allocation8 + $0xfd8] sm:$0xf]  ;;  %v6190_v8 = vor.u32 %v6914_v43, %v6189_v56  ;;  %4113 = vmatpush.bf16.msra.mxu3 %v5198_v6  ;;  %v3870_v12 = vpop.f32.mrf.mxu0 }
 0x287   :  { %v6978_v59 = vld [vmem:[#allocation8 + $0xff4] sm:$0xf0]  ;;  %4101 = vmatmul.bf16.vlgmr.msra.gmra.mxu2 %v7240_v29  ;;  %v4847_v12 = vld [vmem:[#allocation8 + $0x378] sm:$0xf0] }
 0x288   :  { %v5613_v1 = vld [vmem:[#allocation8 + $0x958] sm:$0xf]  ;;  %v6446_v14 = vor.u32 %v6978_v59, %v6445_v58  ;;  %4145 = vmatpush.bf16.msrb.mxu2 %v6190_v8 }
 0x289   :  { %v6770_v2 = vld [vmem:[#allocation8 + $0x974] sm:$0xf0]  ;;  %4114 = vmatmul.bf16.vlgmr.msra.gmra.mxu3 %v7242_v35 }
 0x28a   :  { %v5869_v9 = vld [vmem:[#allocation8 + $0xb58] sm:$0xf]  ;;  %v5614_v50 = vor.u32 %v6770_v2, %v5613_v1  ;;  %4158 = vmatpush.bf16.msrb.mxu3 %v6446_v14 }
 0x28b   :  { %v6834_v10 = vld [vmem:[#allocation8 + $0xb74] sm:$0xf0] }
 0x28c   :  { %v6157_v16 = vld [vmem:[#allocation8 + $0xd98] sm:$0xf]  ;;  %v5870_v19 = vor.u32 %v6834_v10, %v5869_v9  ;;  %4121 = vmatpush.bf16.msrb.mxu0 %v5614_v50  ;;  %v3883_v50 = vpop.f32.mrf.mxu1 }
 0x28d   :  { %v6906_v17 = vld [vmem:[#allocation8 + $0xdb4] sm:$0xf0]  ;;  %v5135_v50 = vld [vmem:[#allocation8 + $0x5b8] sm:$0xf0] }
 0x28e   :  { %v6413_v62 = vld [vmem:[#allocation8 + $0xf98] sm:$0xf]  ;;  %v6158_v24 = vor.u32 %v6906_v17, %v6157_v16  ;;  %4134 = vmatpush.bf16.msrb.mxu1 %v5870_v19 }
 0x28f   :  { %v6970_v18 = vld [vmem:[#allocation8 + $0xfb4] sm:$0xf0] }
 0x290   :  { %v5581_v20 = vld [vmem:[#allocation8 + $0x918] sm:$0xf]  ;;  %v6414_v26 = vor.u32 %v6970_v18, %v6413_v62  ;;  %4146 = vmatpush.bf16.msrb.mxu2 %v6158_v24 }
 0x291   :  { %v6762_v21 = vld [vmem:[#allocation8 + $0x934] sm:$0xf0] }
 0x292   :  { %v5837_v3 = vld [vmem:[#allocation8 + $0xb18] sm:$0xf]  ;;  %v5582_v33 = vor.u32 %v6762_v21, %v5581_v20  ;;  %4159 = vmatpush.bf16.msrb.mxu3 %v6414_v26 }
 0x293   :  { %v6826_v25 = vld [vmem:[#allocation8 + $0xb34] sm:$0xf0] }
 0x294   :  { %v6125_v27 = vld [vmem:[#allocation8 + $0xd58] sm:$0xf]  ;;  %v5838_v39 = vor.u32 %v6826_v25, %v5837_v3  ;;  %4122 = vmatpush.bf16.msrb.mxu0 %v5582_v33  ;;  %v3894_v33 = vpop.f32.mrf.mxu2 }
 0x295   :  { %v6898_v28 = vld [vmem:[#allocation8 + $0xd74] sm:$0xf0] }
 0x296   :  { %v6381_v34 = vld [vmem:[#allocation8 + $0xf58] sm:$0xf]  ;;  %v6126_v42 = vor.u32 %v6898_v28, %v6125_v27  ;;  %4135 = vmatpush.bf16.msrb.mxu1 %v5838_v39  ;;  %v6526_v27 = vld [vmem:[#allocation8 + $0x1dc] sm:$0xf] }
 0x297   :  { %v6962_v36 = vld [vmem:[#allocation8 + $0xf74] sm:$0xf0]  ;;  %v4655_v28 = vld [vmem:[#allocation8 + $0x1f8] sm:$0xf0] }
 0x298   :  { %v5549_v38 = vld [vmem:[#allocation8 + $0x8d8] sm:$0xf]  ;;  %v6382_v46 = vor.u32 %v6962_v36, %v6381_v34  ;;  %4147 = vmatpush.bf16.msrb.mxu2 %v6126_v42  ;;  %v4911_v36 = vld [vmem:[#allocation8 + $0x3f8] sm:$0xf0]  ;;  %v3907_v42 = vpop.f32.mrf.mxu3 }
 0x299   :  { %v6754_v41 = vld [vmem:[#allocation8 + $0x8f4] sm:$0xf0]  ;;  %v4914_v22 = vor.u32 %v6590_v30, %v4911_v36  ;;  %v5103_v30 = vld [vmem:[#allocation8 + $0x578] sm:$0xf0] }
 0x29a   :  { %v5805_v44 = vld [vmem:[#allocation8 + $0xad8] sm:$0xf]  ;;  %v5550_v51 = vor.u32 %v6754_v41, %v5549_v38  ;;  %4160 = vmatpush.bf16.msrb.mxu3 %v6382_v46  ;;  %v3895_v41 = vadd.f32 %v3894_v33, %v3882_v55  ;;  %v5359_v36 = vld [vmem:[#allocation8 + $0x778] sm:$0xf0] }
 0x29b   :  { %v6818_v15 = vld [vmem:[#allocation8 + $0xaf4] sm:$0xf0] }
 0x29c   :  { %v6093_v47 = vld [vmem:[#allocation8 + $0xd18] sm:$0xf]  ;;  %v5806_v53 = vor.u32 %v6818_v15, %v5805_v44  ;;  %4123 = vmatpush.bf16.msrb.mxu0 %v5550_v51  ;;  %v7342_v49 = vadd.f32 %v3907_v42, %v3895_v41  ;;  %v4527_v41 = vld [vmem:[#allocation8 + $0xf8] sm:$0xf0] }
 0x29d   :  { %v6890_v48 = vld [vmem:[#allocation8 + $0xd34] sm:$0xf0] }
 0x29e   :  { %v6349_v23 = vld [vmem:[#allocation8 + $0xf18] sm:$0xf]  ;;  %v6094_v56 = vor.u32 %v6890_v48, %v6093_v47  ;;  %4136 = vmatpush.bf16.msrb.mxu1 %v5806_v53  ;;  %v4658_v47 = vor.u32 %v6526_v27, %v4655_v28  ;;  %v6518_v48 = vld [vmem:[#allocation8 + $0x19c] sm:$0xf] }
 0x29f   :  { %v6954_v52 = vld [vmem:[#allocation8 + $0xf34] sm:$0xf0]  ;;  %v4879_v53 = vld [vmem:[#allocation8 + $0x3b8] sm:$0xf0] }
 0x2a0   :  { %v5517_v37 = vld [vmem:[#allocation8 + $0x898] sm:$0xf]  ;;  %v6350_v58 = vor.u32 %v6954_v52, %v6349_v23  ;;  %4148 = vmatpush.bf16.msrb.mxu2 %v6094_v56  ;;  %v4623_v23 = vld [vmem:[#allocation8 + $0x1b8] sm:$0xf0] }
 0x2a1   :  { %v6746_v54 = vld [vmem:[#allocation8 + $0x8b4] sm:$0xf0]  ;;  %v6582_v52 = vld [vmem:[#allocation8 + $0x39c] sm:$0xf] }
 0x2a2   :  { %v5773_v43 = vld [vmem:[#allocation8 + $0xa98] sm:$0xf]  ;;  %v5518_v61 = vor.u32 %v6746_v54, %v5517_v37  ;;  %4161 = vmatpush.bf16.msrb.mxu3 %v6350_v58  ;;  %v5167_v58 = vld [vmem:[#allocation8 + $0x5f8] sm:$0xf0] }
 0x2a3   :  { %v6810_v57 = vld [vmem:[#allocation8 + $0xab4] sm:$0xf0]  ;;  %v6638_v28 = vld [vmem:[#allocation8 + $0x55c] sm:$0xf] }
 0x2a4   :  { %v6061_v59 = vld [vmem:[#allocation8 + $0xcd8] sm:$0xf]  ;;  %v5774_v2 = vor.u32 %v6810_v57, %v5773_v43  ;;  %4124 = vmatpush.bf16.msrb.mxu0 %v5518_v61  ;;  %v6654_v57 = vld [vmem:[#allocation8 + $0x5dc] sm:$0xf]  ;;  %v5106_v42 = vor.u32 %v6638_v28, %v5103_v30 }
 0x2a5   :  { %v6882_v60 = vld [vmem:[#allocation8 + $0xcf4] sm:$0xf0]  ;;  %v5423_v61 = vld [vmem:[#allocation8 + $0x7f8] sm:$0xf0] }
 0x2a6   :  { %v6317_v63 = vld [vmem:[#allocation8 + $0xed8] sm:$0xf]  ;;  %v6062_v8 = vor.u32 %v6882_v60, %v6061_v59  ;;  %4137 = vmatpush.bf16.msrb.mxu1 %v5774_v2  ;;  %v4626_v59 = vor.u32 %v6518_v48, %v4623_v23  ;;  %v6718_v60 = vld [vmem:[#allocation8 + $0x7dc] sm:$0xf] }
 0x2a7   :  { %v6946_v1 = vld [vmem:[#allocation8 + $0xef4] sm:$0xf0]  ;;  %v6510_v2 = vld [vmem:[#allocation8 + $0x15c] sm:$0xf] }
 0x2a8   :  { %v5485_v4 = vld [vmem:[#allocation8 + $0x858] sm:$0xf]  ;;  %v6318_v14 = vor.u32 %v6946_v1, %v6317_v63  ;;  %4149 = vmatpush.bf16.msrb.mxu2 %v6062_v8  ;;  %v4882_v63 = vor.u32 %v6582_v52, %v4879_v53  ;;  %v5071_v48 = vld [vmem:[#allocation8 + $0x538] sm:$0xf0] }
 0x2a9   :  { %v6738_v6 = vld [vmem:[#allocation8 + $0x874] sm:$0xf0]  ;;  %v6694_v52 = vld [vmem:[#allocation8 + $0x71c] sm:$0xf] }
 0x2aa   :  { %v5741_v9 = vld [vmem:[#allocation8 + $0xa58] sm:$0xf]  ;;  %v5486_v62 = vor.u32 %v6738_v6, %v5485_v4  ;;  %4162 = vmatpush.bf16.msrb.mxu3 %v6318_v14  ;;  %v4591_v4 = vld [vmem:[#allocation8 + $0x178] sm:$0xf0]  ;;  %v3896_v6 = vpop.f32.mrf.mxu2  ;;  %v3909_v14 = vpop.f32.mrf.mxu3 }
 0x2ab   :  { %v6802_v10 = vld [vmem:[#allocation8 + $0xa74] sm:$0xf0]  ;;  %v5327_v53 = vld [vmem:[#allocation8 + $0x738] sm:$0xf0] }
 0x2ac   :  { %v6029_v16 = vld [vmem:[#allocation8 + $0xc98] sm:$0xf]  ;;  %v5742_v21 = vor.u32 %v6802_v10, %v5741_v9  ;;  %4125 = vmatpush.bf16.msrb.mxu0 %v5486_v62  ;;  %v5170_v9 = vor.u32 %v6654_v57, %v5167_v58  ;;  %v6574_v10 = vld [vmem:[#allocation8 + $0x35c] sm:$0xf]  ;;  %v4594_v62 = vor.u32 %v6510_v2, %v4591_v4 }
 0x2ad   :  { %v6874_v17 = vld [vmem:[#allocation8 + $0xcb4] sm:$0xf0]  ;;  %v6550_v57 = vld [vmem:[#allocation8 + $0x29c] sm:$0xf] }
 0x2ae   :  { %v6285_v18 = vld [vmem:[#allocation8 + $0xe98] sm:$0xf]  ;;  %v6030_v26 = vor.u32 %v6874_v17, %v6029_v16  ;;  %4138 = vmatpush.bf16.msrb.mxu1 %v5742_v21  ;;  %v5426_v16 = vor.u32 %v6718_v60, %v5423_v61  ;;  %v6646_v17 = vld [vmem:[#allocation8 + $0x59c] sm:$0xf] }
 0x2af   :  { %v6938_v19 = vld [vmem:[#allocation8 + $0xeb4] sm:$0xf0]  ;;  %v6502_v21 = vld [vmem:[#allocation8 + $0x11c] sm:$0xf] }
 0x2b0   :  { %v5453_v20 = vld [vmem:[#allocation8 + $0x818] sm:$0xf]  ;;  %v6286_v34 = vor.u32 %v6938_v19, %v6285_v18  ;;  %4150 = vmatpush.bf16.msrb.mxu2 %v6030_v26  ;;  %v6710_v18 = vld [vmem:[#allocation8 + $0x79c] sm:$0xf] }
 0x2b1   :  { %v6730_v24 = vld [vmem:[#allocation8 + $0x834] sm:$0xf0]  ;;  %v5391_v19 = vld [vmem:[#allocation8 + $0x7b8] sm:$0xf0] }
 0x2b2   :  { %v5709_v3 = vld [vmem:[#allocation8 + $0xa18] sm:$0xf]  ;;  %v5454_v44 = vor.u32 %v6730_v24, %v5453_v20  ;;  %4163 = vmatpush.bf16.msrb.mxu3 %v6286_v34  ;;  %v4850_v20 = vor.u32 %v6574_v10, %v4847_v12  ;;  %v4559_v24 = vld [vmem:[#allocation8 + $0x138] sm:$0xf0]  ;;  %v5394_v27 = vor.u32 %v6710_v18, %v5391_v19 }
 0x2b3   :  { %v6794_v25 = vld [vmem:[#allocation8 + $0xa34] sm:$0xf0]  ;;  %v4815_v26 = vld [vmem:[#allocation8 + $0x338] sm:$0xf0]  ;;  %v4562_v33 = vor.u32 %v6502_v21, %v4559_v24 }
 0x2b4   :  { %v5997_v39 = vld [vmem:[#allocation8 + $0xc58] sm:$0xf]  ;;  %v5710_v46 = vor.u32 %v6794_v25, %v5709_v3  ;;  %4126 = vmatpush.bf16.msrb.mxu0 %v5454_v44  ;;  %v5138_v3 = vor.u32 %v6646_v17, %v5135_v50  ;;  %v6566_v25 = vld [vmem:[#allocation8 + $0x31c] sm:$0xf] }
 0x2b5   :  { %v6866_v38 = vld [vmem:[#allocation8 + $0xc74] sm:$0xf0]  ;;  %v6702_v34 = vld [vmem:[#allocation8 + $0x75c] sm:$0xf] }
 0x2b6   :  { %v6253_v15 = vld [vmem:[#allocation8 + $0xe58] sm:$0xf]  ;;  %v5998_v51 = vor.u32 %v6866_v38, %v5997_v39  ;;  %4139 = vmatpush.bf16.msrb.mxu1 %v5710_v46  ;;  %v4818_v39 = vor.u32 %v6566_v25, %v4815_v26  ;;  %v6494_v38 = vld [vmem:[#allocation8 + $0xdc] sm:$0xf]  ;;  %v5362_v46 = vor.u32 %v6702_v34, %v5359_v36 }
 0x2b7   :  { %v6930_v31 = vld [vmem:[#allocation8 + $0xe74] sm:$0xf0]  ;;  %4127 = vmatmul.bf16.vlgmr.msrb.gmra.mxu0 %v7249_v7  ;;  %v6558_v44 = vld [vmem:[#allocation8 + $0x2dc] sm:$0xf]  ;;  %v4530_v23 = vor.u32 %v6494_v38, %v4527_v41 }
 0x2b8   :  { %v6254_v37 = vor.u32 %v6930_v31, %v6253_v15  ;;  %v5965_v54 = vld [vmem:[#allocation8 + $0xc18] sm:$0xf]  ;;  %4171 = vmatpush.bf16.msra.mxu0 %v4658_v47  ;;  %4151 = vmatpush.bf16.msrb.mxu2 %v5998_v51  ;;  %v4783_v15 = vld [vmem:[#allocation8 + $0x2f8] sm:$0xf0]  ;;  %v3920_v31 = vpop.f32.mrf.mxu0  ;;  %v3933_v51 = vpop.f32.mrf.mxu1 }
 0x2b9   :  { %v6858_v55 = vld [vmem:[#allocation8 + $0xc34] sm:$0xf0]  ;;  %4140 = vmatmul.bf16.vlgmr.msrb.gmra.mxu1 %v7251_v13  ;;  %v6630_v47 = vld [vmem:[#allocation8 + $0x51c] sm:$0xf] }
 0x2ba   :  { %v6221_v56 = vld [vmem:[#allocation8 + $0xe18] sm:$0xf]  ;;  %4184 = vmatpush.bf16.msra.mxu1 %v4914_v22  ;;  %v5966_v1 = vor.u32 %v6858_v55, %v5965_v54  ;;  %4164 = vmatpush.bf16.msrb.mxu3 %v6254_v37  ;;  %v3921_v22 = vadd.f32 %v3920_v31, %v7342_v49  ;;  %v4786_v37 = vor.u32 %v6558_v44, %v4783_v15  ;;  %v6486_v54 = vld [vmem:[#allocation8 + $0x9c] sm:$0xf] }
 0x2bb   :  { %v6922_v43 = vld [vmem:[#allocation8 + $0xe34] sm:$0xf0]  ;;  %v4495_v55 = vld [vmem:[#allocation8 + $0xb8] sm:$0xf0] }
 0x2bc   :  { %v6222_v8 = vor.u32 %v6922_v43, %v6221_v56  ;;  %4172 = vmatpush.bf16.msra.mxu0 %v4626_v59  ;;  %4152 = vmatpush.bf16.msrb.mxu2 %v5966_v1  ;;  %v3934_v56 = vadd.f32 %v3933_v51, %v3921_v22  ;;  %v5074_v43 = vor.u32 %v6630_v47, %v5071_v48  ;;  %v4751_v58 = vld [vmem:[#allocation8 + $0x2b8] sm:$0xf0] }
 0x2bd   :  { %v5330_v59 = vor.u32 %v6694_v52, %v5327_v53  ;;  %v6622_v60 = vld [vmem:[#allocation8 + $0x4dc] sm:$0xf]  ;;  %v4498_v49 = vor.u32 %v6486_v54, %v4495_v55  ;;  %v4754_v2 = vor.u32 %v6550_v57, %v4751_v58 }
 0x2be   :  { %4185 = vmatpush.bf16.msra.mxu1 %v4882_v63  ;;  %4165 = vmatpush.bf16.msrb.mxu3 %v6222_v8  ;;  %v5039_v61 = vld [vmem:[#allocation8 + $0x4f8] sm:$0xf0] }
 0x2bf   :  { %4153 = vmatmul.bf16.vlgmr.msrb.gmra.mxu2 %v7255_v40  ;;  %v6686_v63 = vld [vmem:[#allocation8 + $0x6dc] sm:$0xf]  ;;  %v5042_v8 = vor.u32 %v6622_v60, %v5039_v61 }
 0x2c0   :  { %4197 = vmatpush.bf16.msra.mxu2 %v5170_v9  ;;  %4173 = vmatpush.bf16.msra.mxu0 %v4594_v62  ;;  %v5295_v1 = vld [vmem:[#allocation8 + $0x6f8] sm:$0xf0]  ;;  %v3922_v12 = vpop.f32.mrf.mxu0  ;;  %v3935_v50 = vpop.f32.mrf.mxu1 }
 0x2c1   :  { %4166 = vmatmul.bf16.vlgmr.msrb.gmra.mxu3 %v7257_v45  ;;  %v6478_v4 = vld [vmem:[#allocation8 + $0x5c] sm:$0xf]  ;;  %v5298_v14 = vor.u32 %v6686_v63, %v5295_v1 }
 0x2c2   :  { %4210 = vmatpush.bf16.msra.mxu3 %v5426_v16  ;;  %4186 = vmatpush.bf16.msra.mxu1 %v4850_v20  ;;  %v4463_v6 = vld [vmem:[#allocation8 + $0x78] sm:$0xf0] }
 0x2c3   :  { %v6542_v9 = vld [vmem:[#allocation8 + $0x25c] sm:$0xf]  ;;  %v4466_v62 = vor.u32 %v6478_v4, %v4463_v6 }
 0x2c4   :  { %4198 = vmatpush.bf16.msra.mxu2 %v5138_v3  ;;  %4174 = vmatpush.bf16.msra.mxu0 %v4562_v33  ;;  %v4719_v10 = vld [vmem:[#allocation8 + $0x278] sm:$0xf0]  ;;  %v3946_v33 = vpop.f32.mrf.mxu2 }
 0x2c5   :  { %v6614_v16 = vld [vmem:[#allocation8 + $0x49c] sm:$0xf]  ;;  %v4722_v21 = vor.u32 %v6542_v9, %v4719_v10  ;;  %v3947_v41 = vadd.f32 %v3946_v33, %v3934_v56 }
 0x2c6   :  { %4211 = vmatpush.bf16.msra.mxu3 %v5394_v27  ;;  %4187 = vmatpush.bf16.msra.mxu1 %v4818_v39  ;;  %v5007_v17 = vld [vmem:[#allocation8 + $0x4b8] sm:$0xf0] }
 0x2c7   :  { %v6678_v18 = vld [vmem:[#allocation8 + $0x69c] sm:$0xf]  ;;  %v5010_v26 = vor.u32 %v6614_v16, %v5007_v17 }
 0x2c8   :  { %4199 = vmatpush.bf16.msra.mxu2 %v5106_v42  ;;  %4175 = vmatpush.bf16.msra.mxu0 %v4530_v23  ;;  %v5263_v19 = vld [vmem:[#allocation8 + $0x6b8] sm:$0xf0]  ;;  %v3959_v42 = vpop.f32.mrf.mxu3 }
 0x2c9   :  { %v6470_v20 = vld [vmem:[#allocation8 + $0x1c] sm:$0xf]  ;;  %v5266_v34 = vor.u32 %v6678_v18, %v5263_v19  ;;  %v3960_v23 = vadd.f32 %v3959_v42, %v3947_v41 }
 0x2ca   :  { %4212 = vmatpush.bf16.msra.mxu3 %v5362_v46  ;;  %4188 = vmatpush.bf16.msra.mxu1 %v4786_v37  ;;  %v4431_v24 = vld [vmem:[#allocation8 + $0x38] sm:$0xf0]  ;;  %v4289_v46 = vperm.slane %v7331_v32, 4 }
 0x2cb   :  { %v6534_v3 = vld [vmem:[#allocation8 + $0x21c] sm:$0xf]  ;;  %v4434_v44 = vor.u32 %v6470_v20, %v4431_v24 }
 0x2cc   :  { %4200 = vmatpush.bf16.msra.mxu2 %v5074_v43  ;;  %4176 = vmatpush.bf16.msra.mxu0 %v4498_v49  ;;  %v4687_v25 = vld [vmem:[#allocation8 + $0x238] sm:$0xf0]  ;;  %v3948_v10 = vpop.f32.mrf.mxu2 }
 0x2cd   :  { %v6782_v27 = vld [vmem:[#allocation8 + $0x9dc] sm:$0xf]  ;;  %v4690_v47 = vor.u32 %v6534_v3, %v4687_v25 }
 0x2ce   :  { %4213 = vmatpush.bf16.msra.mxu3 %v5330_v59  ;;  %4189 = vmatpush.bf16.msra.mxu1 %v4754_v2  ;;  %v5679_v28 = vld [vmem:[#allocation8 + $0x9f8] sm:$0xf0]  ;;  %v4279_v59 = vmax.f32 %v3960_v23, 0.0 }
 0x2cf   :  { %v6846_v30 = vld [vmem:[#allocation8 + $0xbdc] sm:$0xf]  ;;  %v5682_v48 = vor.u32 %v6782_v27, %v5679_v28 }
 0x2d0   :  { %4201 = vmatpush.bf16.msra.mxu2 %v5042_v8  ;;  %v5935_v36 = vld [vmem:[#allocation8 + $0xbf8] sm:$0xf0]  ;;  %4177 = vmatpush.bf16.msra.mxu0 %v4466_v62  ;;  %v4305_v2 = vmul.f32 %v4289_v46, %v4279_v59  ;;  %v3961_v62 = vpop.f32.mrf.mxu3 }
 0x2d1   :  { %v6606_v39 = vld [vmem:[#allocation8 + $0x45c] sm:$0xf]  ;;  %v5938_v52 = vor.u32 %v6846_v30, %v5935_v36 }
 0x2d2   :  { %4214 = vmatpush.bf16.msra.mxu3 %v5298_v14  ;;  %v4975_v38 = vld [vmem:[#allocation8 + $0x478] sm:$0xf0]  ;;  %4190 = vmatpush.bf16.msra.mxu1 %v4722_v21  ;;  %v7352_v50 = vadd.f32 %v7336_v11, %v4305_v2 }
 0x2d3   :  { %v6670_v15 = vld [vmem:[#allocation8 + $0x65c] sm:$0xf]  ;;  %v4978_v53 = vor.u32 %v6606_v39, %v4975_v38 }
 0x2d4   :  { %v5231_v31 = vld [vmem:[#allocation8 + $0x678] sm:$0xf0]  ;;  %4202 = vmatpush.bf16.msra.mxu2 %v5010_v26  ;;  %4178 = vmatpush.bf16.msra.mxu0 %v4434_v44 }
 0x2d5   :  { %v6774_v22 = vld [vmem:[#allocation8 + $0x99c] sm:$0xf]  ;;  %v5234_v56 = vor.u32 %v6670_v15, %v5231_v31 }
 0x2d6   :  { %v5647_v51 = vld [vmem:[#allocation8 + $0x9b8] sm:$0xf0]  ;;  %4215 = vmatpush.bf16.msra.mxu3 %v5266_v34  ;;  %4191 = vmatpush.bf16.msra.mxu1 %v4690_v47  ;;  %v7356_v34 = vld [vmem:[#allocation10] sm:$0xff] }
 0x2d7   :  { %v6838_v37 = vld [vmem:[#allocation8 + $0xb9c] sm:$0xf]  ;;  %v5650_v49 = vor.u32 %v6774_v22, %v5647_v51  ;;  %4179 = vmatmul.bf16.vlgmr.msra.gmra.mxu0 %v7232_v0  ;;  %v872_v36 = vperm.slane %v7356_v34, 5 }
 0x2d8   :  { %v5903_v54 = vld [vmem:[#allocation8 + $0xbb8] sm:$0xf0]  ;;  %4223 = vmatpush.bf16.msrb.mxu0 %v5682_v48  ;;  %4203 = vmatpush.bf16.msra.mxu2 %v4978_v53 }
 0x2d9   :  { %v6598_v55 = vld [vmem:[#allocation8 + $0x41c] sm:$0xf]  ;;  %v5906_v4 = vor.u32 %v6838_v37, %v5903_v54  ;;  %4192 = vmatmul.bf16.vlgmr.msra.gmra.mxu1 %v7235_v5 }
 0x2da   :  { %v4943_v43 = vld [vmem:[#allocation8 + $0x438] sm:$0xf0]  ;;  %4236 = vmatpush.bf16.msrb.mxu1 %v5938_v52  ;;  %4216 = vmatpush.bf16.msra.mxu3 %v5234_v56  ;;  %v3985_v52 = vpop.f32.mrf.mxu1 }
 0x2db   :  { %v6662_v57 = vld [vmem:[#allocation8 + $0x61c] sm:$0xf]  ;;  %v4946_v6 = vor.u32 %v6598_v55, %v4943_v43 }
 0x2dc   :  { %v5199_v58 = vld [vmem:[#allocation8 + $0x638] sm:$0xf0]  ;;  %4224 = vmatpush.bf16.msrb.mxu0 %v5650_v49 }
 0x2dd   :  { %v6910_v60 = vld [vmem:[#allocation8 + $0xddc] sm:$0xf]  ;;  %v5202_v12 = vor.u32 %v6662_v57, %v5199_v58  ;;  %4204 = vmatpush.bf16.msra.mxu2 %v4946_v6 }
 0x2de   :  { %v6191_v61 = vld [vmem:[#allocation8 + $0xdf8] sm:$0xf0]  ;;  %4237 = vmatpush.bf16.msrb.mxu1 %v5906_v4 }
 0x2df   :  { %v6974_v63 = vld [vmem:[#allocation8 + $0xfdc] sm:$0xf]  ;;  %v6194_v14 = vor.u32 %v6910_v60, %v6191_v61  ;;  %4217 = vmatpush.bf16.msra.mxu3 %v5202_v12 }
 0x2e0   :  { %v6447_v1 = vld [vmem:[#allocation8 + $0xff8] sm:$0xf0]  ;;  %4205 = vmatmul.bf16.vlgmr.msra.gmra.mxu2 %v7240_v29  ;;  %v3972_v29 = vpop.f32.mrf.mxu0 }
 0x2e1   :  { %v6766_v8 = vld [vmem:[#allocation8 + $0x95c] sm:$0xf]  ;;  %v6450_v18 = vor.u32 %v6974_v63, %v6447_v1  ;;  %4249 = vmatpush.bf16.msrb.mxu2 %v6194_v14  ;;  %v3973_v23 = vadd.f32 %v3972_v29, %v872_v36  ;;  %v4011_v36 = vpop.f32.mrf.mxu3 }
 0x2e2   :  { %v5615_v9 = vld [vmem:[#allocation8 + $0x978] sm:$0xf0]  ;;  %4218 = vmatmul.bf16.vlgmr.msra.gmra.mxu3 %v7242_v35 }
 0x2e3   :  { %v6830_v16 = vld [vmem:[#allocation8 + $0xb5c] sm:$0xf]  ;;  %v5618_v21 = vor.u32 %v6766_v8, %v5615_v9  ;;  %4262 = vmatpush.bf16.msrb.mxu3 %v6450_v18  ;;  %v3986_v43 = vadd.f32 %v3985_v52, %v3973_v23  ;;  %v3987_v18 = vpop.f32.mrf.mxu1 }
 0x2e4   :  { %v5871_v17 = vld [vmem:[#allocation8 + $0xb78] sm:$0xf0] }
 0x2e5   :  { %v6902_v19 = vld [vmem:[#allocation8 + $0xd9c] sm:$0xf]  ;;  %v5874_v0 = vor.u32 %v6830_v16, %v5871_v17  ;;  %4225 = vmatpush.bf16.msrb.mxu0 %v5618_v21 }
 0x2e6   :  { %v6159_v20 = vld [vmem:[#allocation8 + $0xdb8] sm:$0xf0] }
 0x2e7   :  { %v6966_v24 = vld [vmem:[#allocation8 + $0xf9c] sm:$0xf]  ;;  %v6162_v27 = vor.u32 %v6902_v19, %v6159_v20  ;;  %4238 = vmatpush.bf16.msrb.mxu1 %v5874_v0 }
 0x2e8   :  { %v6415_v3 = vld [vmem:[#allocation8 + $0xfb8] sm:$0xf0]  ;;  %v3974_v14 = vpop.f32.mrf.mxu0 }
 0x2e9   :  { %v6758_v25 = vld [vmem:[#allocation8 + $0x91c] sm:$0xf]  ;;  %v6418_v30 = vor.u32 %v6966_v24, %v6415_v3  ;;  %4250 = vmatpush.bf16.msrb.mxu2 %v6162_v27  ;;  %v4013_v52 = vpop.f32.mrf.mxu3 }
 0x2ea   :  { %v5583_v26 = vld [vmem:[#allocation8 + $0x938] sm:$0xf0] }
 0x2eb   :  { %v6822_v11 = vld [vmem:[#allocation8 + $0xb1c] sm:$0xf]  ;;  %v5586_v39 = vor.u32 %v6758_v25, %v5583_v26  ;;  %4263 = vmatpush.bf16.msrb.mxu3 %v6418_v30 }
 0x2ec   :  { %v5839_v28 = vld [vmem:[#allocation8 + $0xb38] sm:$0xf0] }
 0x2ed   :  { %v6894_v5 = vld [vmem:[#allocation8 + $0xd5c] sm:$0xf]  ;;  %v5842_v42 = vor.u32 %v6822_v11, %v5839_v28  ;;  %4226 = vmatpush.bf16.msrb.mxu0 %v5586_v39  ;;  %v3998_v11 = vpop.f32.mrf.mxu2 }
 0x2ee   :  { %v6127_v33 = vld [vmem:[#allocation8 + $0xd78] sm:$0xf0] }
 0x2ef   :  { %v6958_v38 = vld [vmem:[#allocation8 + $0xf5c] sm:$0xf]  ;;  %v6130_v31 = vor.u32 %v6894_v5, %v6127_v33  ;;  %4239 = vmatpush.bf16.msrb.mxu1 %v5842_v42  ;;  %v3999_v33 = vadd.f32 %v3998_v11, %v3986_v43 }
 0x2f0   :  { %v6383_v41 = vld [vmem:[#allocation8 + $0xf78] sm:$0xf0] }
 0x2f1   :  { %v6750_v44 = vld [vmem:[#allocation8 + $0x8dc] sm:$0xf]  ;;  %v6386_v48 = vor.u32 %v6958_v38, %v6383_v41  ;;  %4251 = vmatpush.bf16.msrb.mxu2 %v6130_v31 }
 0x2f2   :  { %v5551_v15 = vld [vmem:[#allocation8 + $0x8f8] sm:$0xf0] }
 0x2f3   :  { %v6814_v46 = vld [vmem:[#allocation8 + $0xadc] sm:$0xf]  ;;  %v5554_v53 = vor.u32 %v6750_v44, %v5551_v15  ;;  %4264 = vmatpush.bf16.msrb.mxu3 %v6386_v48  ;;  %v4012_v44 = vadd.f32 %v4011_v36, %v3999_v33 }
 0x2f4   :  { %v5807_v47 = vld [vmem:[#allocation8 + $0xaf8] sm:$0xf0] }
 0x2f5   :  { %v6886_v22 = vld [vmem:[#allocation8 + $0xd1c] sm:$0xf]  ;;  %v5810_v35 = vor.u32 %v6814_v46, %v5807_v47  ;;  %4227 = vmatpush.bf16.msrb.mxu0 %v5554_v53  ;;  %v4024_v53 = vpop.f32.mrf.mxu0 }
 0x2f6   :  { %v6095_v51 = vld [vmem:[#allocation8 + $0xd38] sm:$0xf0] }
 0x2f7   :  { %v6950_v37 = vld [vmem:[#allocation8 + $0xf1c] sm:$0xf]  ;;  %v6098_v57 = vor.u32 %v6886_v22, %v6095_v51  ;;  %4240 = vmatpush.bf16.msrb.mxu1 %v5810_v35  ;;  %v4000_v51 = vpop.f32.mrf.mxu2 }
 0x2f8   :  { %v6351_v54 = vld [vmem:[#allocation8 + $0xf38] sm:$0xf0] }
 0x2f9   :  { %v6742_v55 = vld [vmem:[#allocation8 + $0x89c] sm:$0xf]  ;;  %v6354_v60 = vor.u32 %v6950_v37, %v6351_v54  ;;  %4252 = vmatpush.bf16.msrb.mxu2 %v6098_v57  ;;  %v4025_v37 = vadd.f32 %v4024_v53, %v4012_v44  ;;  %v4037_v54 = vpop.f32.mrf.mxu1  ;;  %v874_v44 = vperm.slane %v7356_v34, 7 }
 0x2fa   :  { %v5519_v56 = vld [vmem:[#allocation8 + $0x8b8] sm:$0xf0] }
 0x2fb   :  { %v6806_v58 = vld [vmem:[#allocation8 + $0xa9c] sm:$0xf]  ;;  %v5522_v63 = vor.u32 %v6742_v55, %v5519_v56  ;;  %4265 = vmatpush.bf16.msrb.mxu3 %v6354_v60  ;;  %v4038_v35 = vadd.f32 %v4037_v54, %v4025_v37 }
 0x2fc   :  { %v5775_v59 = vld [vmem:[#allocation8 + $0xab8] sm:$0xf0] }
 0x2fd   :  { %v6878_v61 = vld [vmem:[#allocation8 + $0xcdc] sm:$0xf]  ;;  %v5778_v4 = vor.u32 %v6806_v58, %v5775_v59  ;;  %4228 = vmatpush.bf16.msrb.mxu0 %v5522_v63  ;;  %v4026_v55 = vpop.f32.mrf.mxu0  ;;  %v4063_v58 = vpop.f32.mrf.mxu3  ;;  %v4290_v59 = vperm.slane %v7331_v32, 5 }
 0x2fe   :  { %v6063_v49 = vld [vmem:[#allocation8 + $0xcf8] sm:$0xf0] }
 0x2ff   :  { %v6942_v1 = vld [vmem:[#allocation8 + $0xedc] sm:$0xf]  ;;  %v6066_v9 = vor.u32 %v6878_v61, %v6063_v49  ;;  %4241 = vmatpush.bf16.msrb.mxu1 %v5778_v4  ;;  %v4050_v43 = vpop.f32.mrf.mxu2 }
 0x300   :  { %v6319_v2 = vld [vmem:[#allocation8 + $0xef8] sm:$0xf0]  ;;  %v4051_v57 = vadd.f32 %v4050_v43, %v4038_v35 }
 0x301   :  { %v6734_v6 = vld [vmem:[#allocation8 + $0x85c] sm:$0xf]  ;;  %v6322_v16 = vor.u32 %v6942_v1, %v6319_v2  ;;  %4253 = vmatpush.bf16.msrb.mxu2 %v6066_v9  ;;  %v4039_v56 = vpop.f32.mrf.mxu1 }
 0x302   :  { %v5487_v8 = vld [vmem:[#allocation8 + $0x878] sm:$0xf0]  ;;  %v6990_v56 = vld [vmem:[#allocation11] sm:$0xff] }
 0x303   :  { %v6798_v10 = vld [vmem:[#allocation8 + $0xa5c] sm:$0xf]  ;;  %v5490_v19 = vor.u32 %v6734_v6, %v5487_v8  ;;  %4266 = vmatpush.bf16.msrb.mxu3 %v6322_v16  ;;  %v4292_v43 = vperm.slane %v6990_v56, 7 }
 0x304   :  { %v5743_v12 = vld [vmem:[#allocation8 + $0xa78] sm:$0xf0] }
 0x305   :  { %v6870_v17 = vld [vmem:[#allocation8 + $0xc9c] sm:$0xf]  ;;  %v5746_v24 = vor.u32 %v6798_v10, %v5743_v12  ;;  %4229 = vmatpush.bf16.msrb.mxu0 %v5490_v19  ;;  %v4065_v49 = vpop.f32.mrf.mxu3  ;;  %v4076_v63 = vpop.f32.mrf.mxu0 }
 0x306   :  { %v6031_v62 = vld [vmem:[#allocation8 + $0xcb8] sm:$0xf0] }
 0x307   :  { %v6934_v20 = vld [vmem:[#allocation8 + $0xe9c] sm:$0xf]  ;;  %v6034_v25 = vor.u32 %v6870_v17, %v6031_v62  ;;  %4242 = vmatpush.bf16.msrb.mxu1 %v5746_v24  ;;  %v4052_v61 = vpop.f32.mrf.mxu2 }
 0x308   :  { %v6287_v21 = vld [vmem:[#allocation8 + $0xeb8] sm:$0xf0] }
 0x309   :  { %v6726_v3 = vld [vmem:[#allocation8 + $0x81c] sm:$0xf]  ;;  %v6290_v28 = vor.u32 %v6934_v20, %v6287_v21  ;;  %4254 = vmatpush.bf16.msrb.mxu2 %v6034_v25  ;;  %v4089_v2 = vpop.f32.mrf.mxu1 }
 0x30a   :  { %v5455_v0 = vld [vmem:[#allocation8 + $0x838] sm:$0xf0] }
 0x30b   :  { %v6790_v26 = vld [vmem:[#allocation8 + $0xa1c] sm:$0xf]  ;;  %v5458_v39 = vor.u32 %v6726_v3, %v5455_v0  ;;  %4267 = vmatpush.bf16.msrb.mxu3 %v6290_v28 }
 0x30c   :  { %v5711_v27 = vld [vmem:[#allocation8 + $0xa38] sm:$0xf0] }
 0x30d   :  { %v6862_v30 = vld [vmem:[#allocation8 + $0xc5c] sm:$0xf]  ;;  %v5714_v42 = vor.u32 %v6790_v26, %v5711_v27  ;;  %4230 = vmatpush.bf16.msrb.mxu0 %v5458_v39  ;;  %v4078_v6 = vpop.f32.mrf.mxu0  ;;  %v4115_v12 = vpop.f32.mrf.mxu3  ;;  %v4291_v26 = vperm.slane %v7331_v32, 6 }
 0x30e   :  { %v5999_v5 = vld [vmem:[#allocation8 + $0xc78] sm:$0xf0] }
 0x30f   :  { %v6926_v38 = vld [vmem:[#allocation8 + $0xe5c] sm:$0xf]  ;;  %v6002_v15 = vor.u32 %v6862_v30, %v5999_v5  ;;  %4243 = vmatpush.bf16.msrb.mxu1 %v5714_v42  ;;  %v4102_v9 = vpop.f32.mrf.mxu2 }
 0x310   :  { %v6255_v41 = vld [vmem:[#allocation8 + $0xe78] sm:$0xf0]  ;;  %4231 = vmatmul.bf16.vlgmr.msrb.gmra.mxu0 %v7249_v7  ;;  %v4064_v7 = vadd.f32 %v4063_v58, %v4051_v57 }
 0x311   :  { %v6258_v31 = vor.u32 %v6926_v38, %v6255_v41  ;;  %v6854_v46 = vld [vmem:[#allocation8 + $0xc1c] sm:$0xf]  ;;  %4255 = vmatpush.bf16.msrb.mxu2 %v6002_v15  ;;  %v4091_v8 = vpop.f32.mrf.mxu1 }
 0x312   :  { %v5967_v47 = vld [vmem:[#allocation8 + $0xc38] sm:$0xf0]  ;;  %4244 = vmatmul.bf16.vlgmr.msrb.gmra.mxu1 %v7251_v13  ;;  %v4280_v60 = vmax.f32 %v4064_v7, 0.0 }
 0x313   :  { %v6918_v29 = vld [vmem:[#allocation8 + $0xe1c] sm:$0xf]  ;;  %v5970_v22 = vor.u32 %v6854_v46, %v5967_v47  ;;  %4268 = vmatpush.bf16.msrb.mxu3 %v6258_v31 }
 0x314   :  { %v6223_v48 = vld [vmem:[#allocation8 + $0xe38] sm:$0xf0]  ;;  %v4306_v13 = vmul.f32 %v4290_v59, %v4280_v60  ;;  %v4319_v60 = vstv %s7381_s6 }
 0x315   :  { %v6226_v23 = vor.u32 %v6918_v29, %v6223_v48  ;;  %4256 = vmatpush.bf16.msrb.mxu2 %v5970_v22  ;;  %v4117_v17 = vpop.f32.mrf.mxu3 }
 0x317   :  { %4269 = vmatpush.bf16.msrb.mxu3 %v6226_v23  ;;  %v4104_v16 = vpop.f32.mrf.mxu2 }
 0x318   :  { %4257 = vmatmul.bf16.vlgmr.msrb.gmra.mxu2 %v7255_v40  ;;  %v4313_v40 = vadd.f32 %v7352_v50, %v4306_v13 }
 0x31a   :  { %4270 = vmatmul.bf16.vlgmr.msrb.gmra.mxu3 %v7257_v45  ;;  %v873_v45 = vperm.slane %v7356_v34, 6 }
 0x31c   :  { %v4077_v1 = vadd.f32 %v4076_v63, %v873_v45 }
 0x31e   :  { %v4090_v4 = vadd.f32 %v4089_v2, %v4077_v1 }
 0x320   :  { %v4103_v10 = vadd.f32 %v4102_v9, %v4090_v4 }
 0x322   :  { %v4116_v14 = vadd.f32 %v4115_v12, %v4103_v10 }
 0x334   :  { %v4128_v62 = vpop.f32.mrf.mxu0 }
 0x335   :  { %v4129_v18 = vadd.f32 %v4128_v62, %v4116_v14 }
 0x336   :  { %v4141_v19 = vpop.f32.mrf.mxu1 }
 0x337   :  { %v4142_v20 = vadd.f32 %v4141_v19, %v4129_v18 }
 0x33c   :  { %v4130_v21 = vpop.f32.mrf.mxu0 }
 0x33e   :  { %v4143_v50 = vpop.f32.mrf.mxu1 }
 0x342   :  { %v4154_v24 = vpop.f32.mrf.mxu2 }
 0x343   :  { %v4155_v3 = vadd.f32 %v4154_v24, %v4142_v20 }
 0x344   :  { %v4167_v0 = vpop.f32.mrf.mxu3 }
 0x345   :  { %v4168_v25 = vadd.f32 %v4167_v0, %v4155_v3 }
 0x347   :  { %v4281_v27 = vmax.f32 %v4168_v25, 0.0 }
 0x349   :  { %v4307_v11 = vmul.f32 %v4291_v26, %v4281_v27 }
 0x34a   :  { %v4156_v28 = vpop.f32.mrf.mxu2 }
 0x34b   :  { %v4314_v5 = vadd.f32 %v4313_v40, %v4307_v11 }
 0x34c   :  { %v4169_v30 = vpop.f32.mrf.mxu3 }
 0x354   :  { %v4180_v33 = vpop.f32.mrf.mxu0 }
 0x355   :  { %v4181_v46 = vadd.f32 %v4180_v33, %v874_v44 }
 0x356   :  { %v4193_v36 = vpop.f32.mrf.mxu1 }
 0x357   :  { %v4194_v47 = vadd.f32 %v4193_v36, %v4181_v46 }
 0x35c   :  { %v4182_v39 = vpop.f32.mrf.mxu0 }
 0x35e   :  { %v4195_v38 = vpop.f32.mrf.mxu1 }
 0x363   :  { %v4206_v41 = vpop.f32.mrf.mxu2 }
 0x364   :  { %v4207_v48 = vadd.f32 %v4206_v41, %v4194_v47 }
 0x365   :  { %v4219_v42 = vpop.f32.mrf.mxu3 }
 0x366   :  { %v4220_v22 = vadd.f32 %v4219_v42, %v4207_v48 }
 0x36b   :  { %v4208_v15 = vpop.f32.mrf.mxu2 }
 0x36d   :  { %v4221_v31 = vpop.f32.mrf.mxu3 }
 0x38d   :  { %v4232_v29 = vpop.f32.mrf.mxu0 }
 0x38e   :  { %v4233_v51 = vadd.f32 %v4232_v29, %v4220_v22 }
 0x38f   :  { %v4245_v32 = vpop.f32.mrf.mxu1 }
 0x390   :  { %v4246_v53 = vadd.f32 %v4245_v32, %v4233_v51 }
 0x395   :  { %v4234_v23 = vpop.f32.mrf.mxu0 }
 0x397   :  { %v4247_v52 = vpop.f32.mrf.mxu1 }
 0x39b   :  { %v4258_v37 = vpop.f32.mrf.mxu2 }
 0x39c   :  { %v4259_v54 = vadd.f32 %v4258_v37, %v4246_v53 }
 0x39d   :  { %v4271_v35 = vpop.f32.mrf.mxu3 }
 0x39e   :  { %v4272_v55 = vadd.f32 %v4271_v35, %v4259_v54 }
 0x3a0   :  { %v4282_v57 = vmax.f32 %v4272_v55, 0.0 }
 0x3a2   :  { %v4308_v34 = vmul.f32 %v4292_v43, %v4282_v57 }
 0x3a3   :  { %v4260_v58 = vpop.f32.mrf.mxu2 }
 0x3a4   :  { %v4315_v59 = vadd.f32 %v4314_v5, %v4308_v34 }
 0x3a5   :  { %v4273_v7 = vpop.f32.mrf.mxu3 }
 0x3a6   :  { %4316 = vadd.xlane.f32.xlu0 %v4315_v59 }
 0x419   :  { %v4317_v13 = vpop.xlane.xlu0 %4316 }
 0x41a   :  { %v4320_v61 = vadd.f32 %v4319_v60, %v4317_v13 }
 0x41c   :  { %4322 = vst.msk [vmem:[%s7382_s7] sm:$0xff] %vm4321_vm1, %v4320_v61 }
 0x41d   :  { %4327 = vsyncpa [#allocation4], 1 }
 0x41e   :  { %4328 = vsyncpa [#allocation6], 1 }
 0x41f   :  { %4329 = vsyncpa [#allocation9], 1 }
 0x420   :  { %4330 = vsyncpa [#allocation12], 1 }

</bundles_post_ra>
